<compile_context>
chip_gen: v7x
topology: tpu7x:2x2x1
jax: 0.10.0
libtpu: 0.0.40
codegen_flags: <defaults>
</compile_context>

<pallas_src>
import functools
import math

import jax
import jax.numpy as jnp
from jax.experimental import pallas as pl
from jax.experimental.pallas import tpu as pltpu


def _round_up(x, m):
    return (x + m - 1) // m * m


def _pick_row_tile(m, cap=512):
    """Pick (tm, m_pad): tm multiple of 8, m_pad multiple of tm, minimal padding."""
    m8 = _round_up(m, 8)
    if m8 <= cap:
        return m8, m8
    best = None
    for d in range(8, cap + 1, 8):
        if m8 % d == 0:
            best = d
    if best is not None:
        return best, m8
    tm = 256                                # fallback: fixed tile with padding
    return tm, _round_up(m8, tm)


# ---------------------------------------------------------------------------
# Kernel 1: fused conv (im2col matmul) + BatchNorm(batch stats) + LeakyReLU
# ---------------------------------------------------------------------------
def _conv_bn_lrelu_kernel(p_ref, w_ref, b_ref, o_ref, acc_ref, *,
                          m_actual, m_pad, eps):
    i = pl.program_id(0)
    tm = p_ref.shape[0]

    # MXU matmul on bf16 operands, f32 accumulation; bias add in f32.
    y = jnp.dot(p_ref[...], w_ref[...], preferred_element_type=jnp.float32)
    y = y + b_ref[...]
    row0 = pl.multiple_of(i * tm, 8)
    acc_ref[pl.ds(row0, tm), :] = y

    @pl.when(i == pl.num_programs(0) - 1)
    def _():
        acc = acc_ref[...]                                     # (M_pad, OCp) f32
        if m_pad > m_actual:                                   # compile-time branch
            rows = jax.lax.broadcasted_iota(jnp.int32, acc.shape, 0)
            xm = jnp.where(rows < m_actual, acc, 0.0)          # ignore padded rows
        else:
            xm = acc
        inv_m = 1.0 / float(m_actual)
        s = jnp.sum(xm, axis=0, keepdims=True)                 # single pass:
        ss = jnp.sum(xm * xm, axis=0, keepdims=True)           # sum + sumsq
        mean = s * inv_m
        var = jnp.maximum(ss * inv_m - mean * mean, 0.0)       # biased var (PyTorch)
        yn = (acc - mean) * jax.lax.rsqrt(var + eps)           # gamma=1, beta=0
        yn = jnp.where(yn >= 0, yn, 0.01 * yn)                 # LeakyReLU(0.01)
        o_ref[...] = yn.astype(o_ref.dtype)


def _im2col_nhwc(x, kh, kw, s):
    # TODO(synk): patch matrix is still materialized by XLA; an in-kernel
    # unfold (strided-slice index_map) would remove this extra HBM round trip.
    N, H, W, C = x.shape
    oh = (H - kh) // s + 1
    ow = (W - kw) // s + 1
    cols = []
    for i in range(kh):
        for j in range(kw):
            cols.append(x[:, i:i + s * (oh - 1) + 1:s, j:j + s * (ow - 1) + 1:s, :])
    patches = jnp.concatenate(cols, axis=-1)                   # (N, oh, ow, kh*kw*C)
    return patches.reshape(N * oh * ow, kh * kw * C), oh, ow


def conv_bn_lrelu(x, w, b, stride, eps=1e-5):
    """x: (N, H, W, C) channel-last; w: (OC, IC, KH, KW) PyTorch layout."""
    OC, IC, KH, KW = w.shape
    N = x.shape[0]

    patches, oh, ow = _im2col_nhwc(x, KH, KW, stride)          # (M, KH*KW*IC)
    M, K = patches.shape

    # Weight reordered to channel-last patch order (kh, kw, ic) -> OC, and the
    # output-channel axis zero-padded to 128 lanes for dense stores.
    wmat = w.transpose(2, 3, 1, 0).reshape(K, OC)
    OCp = max(128, _round_up(OC, 128))
    wmat = jnp.pad(wmat, ((0, 0), (0, OCp - OC))).astype(jnp.bfloat16)
    bias = jnp.pad(b, (0, OCp - OC)).reshape(1, OCp).astype(jnp.float32)

    # Row tiling: largest multiple-of-8 divisor of round_up(M, 8) under 512
    # (zero or minimal padded rows; small double-buffered VMEM footprint).
    tm, M_pad = _pick_row_tile(M)
    patches = jnp.pad(patches, ((0, M_pad - M), (0, 0))).astype(jnp.bfloat16)

    out = pl.pallas_call(
        functools.partial(_conv_bn_lrelu_kernel, m_actual=M, m_pad=M_pad, eps=eps),
        out_shape=jax.ShapeDtypeStruct((M_pad, OCp), jnp.bfloat16),
        grid=(M_pad // tm,),
        in_specs=[
            pl.BlockSpec((tm, K), lambda i: (i, 0)),           # streamed patch tiles
            pl.BlockSpec((K, OCp), lambda i: (0, 0)),          # resident weights
            pl.BlockSpec((1, OCp), lambda i: (0, 0)),          # resident bias
        ],
        out_specs=pl.BlockSpec((M_pad, OCp), lambda i: (0, 0)),  # resident output
        scratch_shapes=[pltpu.VMEM((M_pad, OCp), jnp.float32)],  # f32 accumulator
        compiler_params=pltpu.CompilerParams(
            dimension_semantics=("arbitrary",),
            vmem_limit_bytes=32 * 1024 * 1024,
        ),
        cost_estimate=pl.CostEstimate(
            flops=2 * M_pad * K * OCp,
            transcendentals=0,
            bytes_accessed=M_pad * K * 2 + K * OCp * 2 + M_pad * OCp * 2,
        ),
    )(patches, wmat, bias)

    return out[:M, :OC].reshape(N, oh, ow, OC)


# ---------------------------------------------------------------------------
# Kernel 2: the whole FC tail (cnn linears + telemetry branch + head + tanh)
# ---------------------------------------------------------------------------
def _fc_tail_kernel(x_ref, t_ref,
                    l1w, l1b, l2w, l2b,
                    f1w, f1b, f2w, f2b,
                    o1wx, o1wt, o1b, o2w, o2b, o3w, o3b,
                    o_ref):
    def lrelu(v):
        return jnp.where(v >= 0, v, 0.01 * v)

    def mm(a, w_ref_):
        return jnp.dot(a, w_ref_[...], preferred_element_type=jnp.float32)

    bf = jnp.bfloat16

    # CNN tail: 1024 -> 256 -> 128
    h = lrelu(mm(x_ref[...], l1w) + l1b[...])
    h = lrelu(mm(h.astype(bf), l2w) + l2b[...])

    # Telemetry branch: 18 -> 128 -> 128
    # TODO(synk): Dropout(0.2) layers treated as identity (eval-mode semantics).
    t = lrelu(mm(t_ref[...], f1w) + f1b[...])
    t = lrelu(mm(t.astype(bf), f2w) + f2b[...])

    # Head: concat([h, t]) @ o1w  ==  h @ o1w[:128] + t @ o1w[128:]
    o = lrelu(mm(h.astype(bf), o1wx) + mm(t.astype(bf), o1wt) + o1b[...])
    o = lrelu(mm(o.astype(bf), o2w) + o2b[...])
    o = jnp.tanh(mm(o.astype(bf), o3w) + o3b[...])
    o_ref[...] = o.astype(o_ref.dtype)


def fc_tail(x_flat, telemetry, l1_w, params):
    B = x_flat.shape[0]
    bf, f32 = jnp.bfloat16, jnp.float32
    o1_wx = params["o1_w"][:128]    # acts on the cnn_out half of the concat
    o1_wt = params["o1_w"][128:]    # acts on the telemetry half

    args = [
        x_flat.astype(bf), telemetry.astype(bf),
        l1_w.astype(bf), params["l1_b"].reshape(1, -1).astype(f32),
        params["l2_w"].astype(bf), params["l2_b"].reshape(1, -1).astype(f32),
        params["f1_w"].astype(bf), params["f1_b"].reshape(1, -1).astype(f32),
        params["f2_w"].astype(bf), params["f2_b"].reshape(1, -1).astype(f32),
        o1_wx.astype(bf), o1_wt.astype(bf),
        params["o1_b"].reshape(1, -1).astype(f32),
        params["o2_w"].astype(bf), params["o2_b"].reshape(1, -1).astype(f32),
        params["o3_w"].astype(bf), params["o3_b"].reshape(1, -1).astype(f32),
    ]
    in_specs = [pl.BlockSpec(tuple(a.shape), lambda i: (0, 0)) for a in args]

    return pl.pallas_call(
        _fc_tail_kernel,
        out_shape=jax.ShapeDtypeStruct((B, 2), jnp.float32),
        grid=(1,),
        in_specs=in_specs,
        out_specs=pl.BlockSpec((B, 2), lambda i: (0, 0)),
        compiler_params=pltpu.CompilerParams(dimension_semantics=("arbitrary",)),
    )(*args)


# ---------------------------------------------------------------------------
# Parameter initialization (matches initialize_weights semantics)
# ---------------------------------------------------------------------------
def _xavier_uniform(key, fan_in, fan_out):
    bound = math.sqrt(6.0 / (fan_in + fan_out))
    return jax.random.uniform(key, (fan_in, fan_out), jnp.float32, -bound, bound)


def _kaiming_normal_conv(key, oc, ic, kh, kw):
    fan_out = oc * kh * kw
    std = math.sqrt(2.0 / fan_out)
    return std * jax.random.normal(key, (oc, ic, kh, kw), jnp.float32)


def init_params(key):
    ks = jax.random.split(key, 12)
    p = {}
    p["c1_w"] = _kaiming_normal_conv(ks[0], 32, 12, 8, 8)
    p["c1_b"] = jnp.zeros((32,), jnp.float32)
    p["c2_w"] = _kaiming_normal_conv(ks[1], 64, 32, 4, 4)
    p["c2_b"] = jnp.zeros((64,), jnp.float32)
    p["c3_w"] = _kaiming_normal_conv(ks[2], 64, 64, 3, 3)
    p["c3_b"] = jnp.zeros((64,), jnp.float32)
    p["l1_w"] = _xavier_uniform(ks[3], 1024, 256)
    p["l1_b"] = jnp.zeros((256,), jnp.float32)
    p["l2_w"] = _xavier_uniform(ks[4], 256, 128)
    p["l2_b"] = jnp.zeros((128,), jnp.float32)
    p["f1_w"] = _xavier_uniform(ks[5], 18, 128)
    p["f1_b"] = jnp.zeros((128,), jnp.float32)
    p["f2_w"] = _xavier_uniform(ks[6], 128, 128)
    p["f2_b"] = jnp.zeros((128,), jnp.float32)
    p["o1_w"] = _xavier_uniform(ks[7], 256, 256)
    p["o1_b"] = jnp.zeros((256,), jnp.float32)
    p["o2_w"] = _xavier_uniform(ks[8], 256, 64)
    p["o2_b"] = jnp.zeros((64,), jnp.float32)
    p["o3_w"] = _xavier_uniform(ks[9], 64, 2)
    p["o3_b"] = jnp.zeros((2,), jnp.float32)
    return p


# ---------------------------------------------------------------------------
# Full forward pass
# ---------------------------------------------------------------------------
def actor_forward(params, framestack, telemetry):
    B, S, C, H, W = framestack.shape
    # PyTorch: view(B, S*C, H, W).  We go channel-last once; channel index
    # order (s, c) matches PyTorch's fused channel order.
    x = framestack.reshape(B, S * C, H, W).transpose(0, 2, 3, 1)   # (B, H, W, 12)

    x = conv_bn_lrelu(x, params["c1_w"], params["c1_b"], stride=4)  # (B,20,20,32)
    x = conv_bn_lrelu(x, params["c2_w"], params["c2_b"], stride=2)  # (B, 9, 9,64)
    x = conv_bn_lrelu(x, params["c3_w"], params["c3_b"], stride=2)  # (B, 4, 4,64)

    # PyTorch Flatten is channel-major (c, h, w); ours is (h, w, c).  Permute
    # the Linear(1024,256) weight rows once so the matmul matches exactly.
    Hf, Wf, Cf = x.shape[1], x.shape[2], x.shape[3]
    l1_w = (params["l1_w"].reshape(Cf, Hf, Wf, -1)
            .transpose(1, 2, 0, 3).reshape(Cf * Hf * Wf, -1))
    x_flat = x.reshape(B, -1)                                       # (B, 1024)

    return fc_tail(x_flat, telemetry, l1_w, params)                 # (B, 2)


if __name__ == "__main__":
    key = jax.random.PRNGKey(0)
    k_params, k_fs, k_tel = jax.random.split(key, 3)

    params = init_params(k_params)

    # stack*C = 12 input channels, 84x84 frames (Flatten -> 1024 = 64*4*4),
    # telemetry has 18 features.
    framestack = jax.random.normal(k_fs, (2, 4, 3, 84, 84), jnp.float32)
    telemetry = jax.random.normal(k_tel, (2, 18), jnp.float32)

    fwd = jax.jit(actor_forward)
    out = fwd(params, framestack, telemetry)
    out = jax.block_until_ready(out)
    assert out.shape == (2, 2)
    assert bool(jnp.all(jnp.isfinite(out)))
    assert bool(jnp.all(jnp.abs(out) <= 1.0))
    print("KERNEL_OK")
</pallas_src>

<mosaic_0001>
module attributes {stable_mosaic.version = 11 : i64} {
  func.func @_conv_bn_lrelu_kernel(%arg0: i32, %arg1: memref<400x768xbf16, #tpu.memory_space<vmem>>, %arg2: memref<768x128xbf16, #tpu.memory_space<vmem>>, %arg3: memref<1x128xf32, #tpu.memory_space<vmem>>, %arg4: memref<800x128xbf16, #tpu.memory_space<vmem>>, %arg5: memref<800x128xf32, #tpu.memory_space<vmem>>) attributes {dimension_semantics = [#tpu.dimension_semantics<arbitrary>], iteration_bounds = array<i64: 2>, scalar_prefetch = 0 : i64, scratch_operands = 1 : i64, tpu.core_type = #tpu.core_type<tc>, window_params = [{transform_indices = @transform_0, window_bounds = array<i64: 400, 768>}, {pipeline_mode = #tpu.pipeline_mode<synchronous>, transform_indices = @transform_1, window_bounds = array<i64: 768, 128>}, {pipeline_mode = #tpu.pipeline_mode<synchronous>, transform_indices = @transform_2, window_bounds = array<i64: 1, 128>}, {pipeline_mode = #tpu.pipeline_mode<synchronous>, transform_indices = @transform_3, window_bounds = array<i64: 800, 128>}]} {
    %c0 = arith.constant 0 : index
    %c0_0 = arith.constant 0 : index
    %0 = vector.load %arg1[%c0, %c0_0] : memref<400x768xbf16, #tpu.memory_space<vmem>>, vector<400x768xbf16>
    %c0_1 = arith.constant 0 : index
    %c0_2 = arith.constant 0 : index
    %1 = vector.load %arg2[%c0_1, %c0_2] : memref<768x128xbf16, #tpu.memory_space<vmem>>, vector<768x128xbf16>
    %cst = arith.constant dense<0.000000e+00> : vector<400x128xf32>
    %2 = tpu.matmul %0, %1, %cst {dimension_numbers = #tpu.dot_dimension_numbers<[1], [0], [0], [1], [0, 0, 1, 1], [], []>} : vector<400x768xbf16>, vector<768x128xbf16>, vector<400x128xf32> -> vector<400x128xf32>
    %c0_3 = arith.constant 0 : index
    %c0_4 = arith.constant 0 : index
    %3 = vector.load %arg3[%c0_3, %c0_4] : memref<1x128xf32, #tpu.memory_space<vmem>>, vector<1x128xf32>
    %4 = vector.broadcast %3 : vector<1x128xf32> to vector<400x128xf32>
    %5 = arith.addf %2, %4 : vector<400x128xf32>
    %c400_i32 = arith.constant 400 : i32
    %6 = arith.muli %arg0, %c400_i32 : i32
    %7 = tpu.assume_multiple %6, 8 : i32
    %8 = arith.index_cast %7 : i32 to index
    %c0_5 = arith.constant 0 : index
    %9 = vector.load %arg5[%8, %c0_5] : memref<800x128xf32, #tpu.memory_space<vmem>>, vector<400x128xf32>
    tpu.vector_store %arg5[%8, %c0_5], %5 {strides = array<i32>} : memref<800x128xf32, #tpu.memory_space<vmem>>, vector<400x128xf32>,
    %c1_i32 = arith.constant 1 : i32
    %10 = arith.cmpi eq, %arg0, %c1_i32 : i32
    %11 = arith.extui %10 : i1 to i32
    %c0_i32 = arith.constant 0 : i32
    %12 = arith.cmpi ne, %11, %c0_i32 : i32
    scf.if %12 {
      %c0_6 = arith.constant 0 : index
      %c0_7 = arith.constant 0 : index
      %13 = vector.load %arg5[%c0_6, %c0_7] : memref<800x128xf32, #tpu.memory_space<vmem>>, vector<800x128xf32>
      %cst_8 = arith.constant dense<0.000000e+00> : vector<128xf32>
      %14 = vector.multi_reduction <add>, %13, %cst_8 [0] : vector<800x128xf32> to vector<128xf32>
      %15 = vector.shape_cast %14 : vector<128xf32> to vector<1x128xf32>
      %16 = arith.mulf %13, %13 : vector<800x128xf32>
      %cst_9 = arith.constant dense<0.000000e+00> : vector<128xf32>
      %17 = vector.multi_reduction <add>, %16, %cst_9 [0] : vector<800x128xf32> to vector<128xf32>
      %18 = vector.shape_cast %17 : vector<128xf32> to vector<1x128xf32>
      %cst_10 = arith.constant 1.250000e-03 : f32
      %19 = vector.broadcast %cst_10 : f32 to vector<1x128xf32>
      %20 = arith.mulf %15, %19 : vector<1x128xf32>
      %cst_11 = arith.constant 1.250000e-03 : f32
      %21 = vector.broadcast %cst_11 : f32 to vector<1x128xf32>
      %22 = arith.mulf %18, %21 : vector<1x128xf32>
      %23 = arith.mulf %20, %20 : vector<1x128xf32>
      %24 = arith.subf %22, %23 : vector<1x128xf32>
      %cst_12 = arith.constant 0.000000e+00 : f32
      %25 = vector.broadcast %cst_12 : f32 to vector<1x128xf32>
      %26 = arith.maximumf %24, %25 : vector<1x128xf32>
      %27 = vector.broadcast %20 : vector<1x128xf32> to vector<800x128xf32>
      %28 = arith.subf %13, %27 : vector<800x128xf32>
      %cst_13 = arith.constant 9.99999974E-6 : f32
      %29 = vector.broadcast %cst_13 : f32 to vector<1x128xf32>
      %30 = arith.addf %26, %29 : vector<1x128xf32>
      %31 = math.rsqrt %30 : vector<1x128xf32>
      %32 = vector.broadcast %31 : vector<1x128xf32> to vector<800x128xf32>
      %33 = arith.mulf %28, %32 : vector<800x128xf32>
      %cst_14 = arith.constant 0.000000e+00 : f32
      %34 = vector.broadcast %cst_14 : f32 to vector<800x128xf32>
      %35 = arith.cmpf oge, %33, %34 : vector<800x128xf32>
      %cst_15 = arith.constant 0.00999999977 : f32
      %36 = vector.broadcast %cst_15 : f32 to vector<800x128xf32>
      %37 = arith.mulf %36, %33 : vector<800x128xf32>
      %38 = arith.select %35, %33, %37 : vector<800x128xi1>, vector<800x128xf32>
      %39 = arith.truncf %38 : vector<800x128xf32> to vector<800x128xbf16>
      %c0_16 = arith.constant 0 : index
      %c0_17 = arith.constant 0 : index
      %40 = vector.load %arg4[%c0_16, %c0_17] : memref<800x128xbf16, #tpu.memory_space<vmem>>, vector<800x128xbf16>
      tpu.vector_store %arg4[%c0_16, %c0_17], %39 {strides = array<i32>} : memref<800x128xbf16, #tpu.memory_space<vmem>>, vector<800x128xbf16>,
    } else {
    }
    return
  }
  func.func @transform_0(%arg0: i32) -> (i32, i32) {
    %c0_i32 = arith.constant 0 : i32
    %c0_i32_0 = arith.constant 0 : i32
    return %arg0, %c0_i32 : i32, i32
  }
  func.func @transform_1(%arg0: i32) -> (i32, i32) {
    %c0_i32 = arith.constant 0 : i32
    %c0_i32_0 = arith.constant 0 : i32
    %c0_i32_1 = arith.constant 0 : i32
    return %c0_i32, %c0_i32_0 : i32, i32
  }
  func.func @transform_2(%arg0: i32) -> (i32, i32) {
    %c0_i32 = arith.constant 0 : i32
    %c0_i32_0 = arith.constant 0 : i32
    %c0_i32_1 = arith.constant 0 : i32
    return %c0_i32, %c0_i32_0 : i32, i32
  }
  func.func @transform_3(%arg0: i32) -> (i32, i32) {
    %c0_i32 = arith.constant 0 : i32
    %c0_i32_0 = arith.constant 0 : i32
    %c0_i32_1 = arith.constant 0 : i32
    return %c0_i32, %c0_i32_0 : i32, i32
  }
}

module attributes {stable_mosaic.version = 11 : i64} {
  func.func @_conv_bn_lrelu_kernel(%arg0: i32, %arg1: memref<168x512xbf16, #tpu.memory_space<vmem>>, %arg2: memref<512x128xbf16, #tpu.memory_space<vmem>>, %arg3: memref<1x128xf32, #tpu.memory_space<vmem>>, %arg4: memref<168x128xbf16, #tpu.memory_space<vmem>>, %arg5: memref<168x128xf32, #tpu.memory_space<vmem>>) attributes {dimension_semantics = [#tpu.dimension_semantics<arbitrary>], iteration_bounds = array<i64: 1>, scalar_prefetch = 0 : i64, scratch_operands = 1 : i64, tpu.core_type = #tpu.core_type<tc>, window_params = [{transform_indices = @transform_0, window_bounds = array<i64: 168, 512>}, {pipeline_mode = #tpu.pipeline_mode<synchronous>, transform_indices = @transform_1, window_bounds = array<i64: 512, 128>}, {pipeline_mode = #tpu.pipeline_mode<synchronous>, transform_indices = @transform_2, window_bounds = array<i64: 1, 128>}, {pipeline_mode = #tpu.pipeline_mode<synchronous>, transform_indices = @transform_3, window_bounds = array<i64: 168, 128>}]} {
    %c0 = arith.constant 0 : index
    %c0_0 = arith.constant 0 : index
    %0 = vector.load %arg1[%c0, %c0_0] : memref<168x512xbf16, #tpu.memory_space<vmem>>, vector<168x512xbf16>
    %c0_1 = arith.constant 0 : index
    %c0_2 = arith.constant 0 : index
    %1 = vector.load %arg2[%c0_1, %c0_2] : memref<512x128xbf16, #tpu.memory_space<vmem>>, vector<512x128xbf16>
    %cst = arith.constant dense<0.000000e+00> : vector<168x128xf32>
    %2 = tpu.matmul %0, %1, %cst {dimension_numbers = #tpu.dot_dimension_numbers<[1], [0], [0], [1], [0, 0, 1, 1], [], []>} : vector<168x512xbf16>, vector<512x128xbf16>, vector<168x128xf32> -> vector<168x128xf32>
    %c0_3 = arith.constant 0 : index
    %c0_4 = arith.constant 0 : index
    %3 = vector.load %arg3[%c0_3, %c0_4] : memref<1x128xf32, #tpu.memory_space<vmem>>, vector<1x128xf32>
    %4 = vector.broadcast %3 : vector<1x128xf32> to vector<168x128xf32>
    %5 = arith.addf %2, %4 : vector<168x128xf32>
    %c168_i32 = arith.constant 168 : i32
    %6 = arith.muli %arg0, %c168_i32 : i32
    %7 = tpu.assume_multiple %6, 8 : i32
    %8 = arith.index_cast %7 : i32 to index
    %c0_5 = arith.constant 0 : index
    %9 = vector.load %arg5[%8, %c0_5] : memref<168x128xf32, #tpu.memory_space<vmem>>, vector<168x128xf32>
    tpu.vector_store %arg5[%8, %c0_5], %5 {strides = array<i32>} : memref<168x128xf32, #tpu.memory_space<vmem>>, vector<168x128xf32>,
    %c0_i32 = arith.constant 0 : i32
    %10 = arith.cmpi eq, %arg0, %c0_i32 : i32
    %11 = arith.extui %10 : i1 to i32
    %c0_i32_6 = arith.constant 0 : i32
    %12 = arith.cmpi ne, %11, %c0_i32_6 : i32
    scf.if %12 {
      %c0_7 = arith.constant 0 : index
      %c0_8 = arith.constant 0 : index
      %13 = vector.load %arg5[%c0_7, %c0_8] : memref<168x128xf32, #tpu.memory_space<vmem>>, vector<168x128xf32>
      %14 = tpu.iota {dimensions = array<i32: 0>} : vector<168x128xi32>
      %c162_i32 = arith.constant 162 : i32
      %15 = vector.broadcast %c162_i32 : i32 to vector<168x128xi32>
      %16 = arith.cmpi slt, %14, %15 : vector<168x128xi32>
      %cst_9 = arith.constant 0.000000e+00 : f32
      %17 = vector.broadcast %cst_9 : f32 to vector<168x128xf32>
      %18 = arith.select %16, %13, %17 : vector<168x128xi1>, vector<168x128xf32>
      %cst_10 = arith.constant dense<0.000000e+00> : vector<128xf32>
      %19 = vector.multi_reduction <add>, %18, %cst_10 [0] : vector<168x128xf32> to vector<128xf32>
      %20 = vector.shape_cast %19 : vector<128xf32> to vector<1x128xf32>
      %21 = arith.mulf %18, %18 : vector<168x128xf32>
      %cst_11 = arith.constant dense<0.000000e+00> : vector<128xf32>
      %22 = vector.multi_reduction <add>, %21, %cst_11 [0] : vector<168x128xf32> to vector<128xf32>
      %23 = vector.shape_cast %22 : vector<128xf32> to vector<1x128xf32>
      %cst_12 = arith.constant 0.00617283955 : f32
      %24 = vector.broadcast %cst_12 : f32 to vector<1x128xf32>
      %25 = arith.mulf %20, %24 : vector<1x128xf32>
      %cst_13 = arith.constant 0.00617283955 : f32
      %26 = vector.broadcast %cst_13 : f32 to vector<1x128xf32>
      %27 = arith.mulf %23, %26 : vector<1x128xf32>
      %28 = arith.mulf %25, %25 : vector<1x128xf32>
      %29 = arith.subf %27, %28 : vector<1x128xf32>
      %cst_14 = arith.constant 0.000000e+00 : f32
      %30 = vector.broadcast %cst_14 : f32 to vector<1x128xf32>
      %31 = arith.maximumf %29, %30 : vector<1x128xf32>
      %32 = vector.broadcast %25 : vector<1x128xf32> to vector<168x128xf32>
      %33 = arith.subf %13, %32 : vector<168x128xf32>
      %cst_15 = arith.constant 9.99999974E-6 : f32
      %34 = vector.broadcast %cst_15 : f32 to vector<1x128xf32>
      %35 = arith.addf %31, %34 : vector<1x128xf32>
      %36 = math.rsqrt %35 : vector<1x128xf32>
      %37 = vector.broadcast %36 : vector<1x128xf32> to vector<168x128xf32>
      %38 = arith.mulf %33, %37 : vector<168x128xf32>
      %cst_16 = arith.constant 0.000000e+00 : f32
      %39 = vector.broadcast %cst_16 : f32 to vector<168x128xf32>
      %40 = arith.cmpf oge, %38, %39 : vector<168x128xf32>
      %cst_17 = arith.constant 0.00999999977 : f32
      %41 = vector.broadcast %cst_17 : f32 to vector<168x128xf32>
      %42 = arith.mulf %41, %38 : vector<168x128xf32>
      %43 = arith.select %40, %38, %42 : vector<168x128xi1>, vector<168x128xf32>
      %44 = arith.truncf %43 : vector<168x128xf32> to vector<168x128xbf16>
      %c0_18 = arith.constant 0 : index
      %c0_19 = arith.constant 0 : index
      %45 = vector.load %arg4[%c0_18, %c0_19] : memref<168x128xbf16, #tpu.memory_space<vmem>>, vector<168x128xbf16>
      tpu.vector_store %arg4[%c0_18, %c0_19], %44 {strides = array<i32>} : memref<168x128xbf16, #tpu.memory_space<vmem>>, vector<168x128xbf16>,
    } else {
    }
    return
  }
  func.func @transform_0(%arg0: i32) -> (i32, i32) {
    %c0_i32 = arith.constant 0 : i32
    %c0_i32_0 = arith.constant 0 : i32
    return %arg0, %c0_i32 : i32, i32
  }
  func.func @transform_1(%arg0: i32) -> (i32, i32) {
    %c0_i32 = arith.constant 0 : i32
    %c0_i32_0 = arith.constant 0 : i32
    %c0_i32_1 = arith.constant 0 : i32
    return %c0_i32, %c0_i32_0 : i32, i32
  }
  func.func @transform_2(%arg0: i32) -> (i32, i32) {
    %c0_i32 = arith.constant 0 : i32
    %c0_i32_0 = arith.constant 0 : i32
    %c0_i32_1 = arith.constant 0 : i32
    return %c0_i32, %c0_i32_0 : i32, i32
  }
  func.func @transform_3(%arg0: i32) -> (i32, i32) {
    %c0_i32 = arith.constant 0 : i32
    %c0_i32_0 = arith.constant 0 : i32
    %c0_i32_1 = arith.constant 0 : i32
    return %c0_i32, %c0_i32_0 : i32, i32
  }
}

module attributes {stable_mosaic.version = 11 : i64} {
  func.func @_conv_bn_lrelu_kernel(%arg0: i32, %arg1: memref<32x576xbf16, #tpu.memory_space<vmem>>, %arg2: memref<576x128xbf16, #tpu.memory_space<vmem>>, %arg3: memref<1x128xf32, #tpu.memory_space<vmem>>, %arg4: memref<32x128xbf16, #tpu.memory_space<vmem>>, %arg5: memref<32x128xf32, #tpu.memory_space<vmem>>) attributes {dimension_semantics = [#tpu.dimension_semantics<arbitrary>], iteration_bounds = array<i64: 1>, scalar_prefetch = 0 : i64, scratch_operands = 1 : i64, tpu.core_type = #tpu.core_type<tc>, window_params = [{transform_indices = @transform_0, window_bounds = array<i64: 32, 576>}, {pipeline_mode = #tpu.pipeline_mode<synchronous>, transform_indices = @transform_1, window_bounds = array<i64: 576, 128>}, {pipeline_mode = #tpu.pipeline_mode<synchronous>, transform_indices = @transform_2, window_bounds = array<i64: 1, 128>}, {pipeline_mode = #tpu.pipeline_mode<synchronous>, transform_indices = @transform_3, window_bounds = array<i64: 32, 128>}]} {
    %c0 = arith.constant 0 : index
    %c0_0 = arith.constant 0 : index
    %0 = vector.load %arg1[%c0, %c0_0] : memref<32x576xbf16, #tpu.memory_space<vmem>>, vector<32x576xbf16>
    %c0_1 = arith.constant 0 : index
    %c0_2 = arith.constant 0 : index
    %1 = vector.load %arg2[%c0_1, %c0_2] : memref<576x128xbf16, #tpu.memory_space<vmem>>, vector<576x128xbf16>
    %cst = arith.constant dense<0.000000e+00> : vector<32x128xf32>
    %2 = tpu.matmul %0, %1, %cst {dimension_numbers = #tpu.dot_dimension_numbers<[1], [0], [0], [1], [0, 0, 1, 1], [], []>} : vector<32x576xbf16>, vector<576x128xbf16>, vector<32x128xf32> -> vector<32x128xf32>
    %c0_3 = arith.constant 0 : index
    %c0_4 = arith.constant 0 : index
    %3 = vector.load %arg3[%c0_3, %c0_4] : memref<1x128xf32, #tpu.memory_space<vmem>>, vector<1x128xf32>
    %4 = vector.broadcast %3 : vector<1x128xf32> to vector<32x128xf32>
    %5 = arith.addf %2, %4 : vector<32x128xf32>
    %c32_i32 = arith.constant 32 : i32
    %6 = arith.muli %arg0, %c32_i32 : i32
    %7 = tpu.assume_multiple %6, 8 : i32
    %8 = arith.index_cast %7 : i32 to index
    %c0_5 = arith.constant 0 : index
    %9 = vector.load %arg5[%8, %c0_5] : memref<32x128xf32, #tpu.memory_space<vmem>>, vector<32x128xf32>
    tpu.vector_store %arg5[%8, %c0_5], %5 {strides = array<i32>} : memref<32x128xf32, #tpu.memory_space<vmem>>, vector<32x128xf32>,
    %c0_i32 = arith.constant 0 : i32
    %10 = arith.cmpi eq, %arg0, %c0_i32 : i32
    %11 = arith.extui %10 : i1 to i32
    %c0_i32_6 = arith.constant 0 : i32
    %12 = arith.cmpi ne, %11, %c0_i32_6 : i32
    scf.if %12 {
      %c0_7 = arith.constant 0 : index
      %c0_8 = arith.constant 0 : index
      %13 = vector.load %arg5[%c0_7, %c0_8] : memref<32x128xf32, #tpu.memory_space<vmem>>, vector<32x128xf32>
      %cst_9 = arith.constant dense<0.000000e+00> : vector<128xf32>
      %14 = vector.multi_reduction <add>, %13, %cst_9 [0] : vector<32x128xf32> to vector<128xf32>
      %15 = vector.shape_cast %14 : vector<128xf32> to vector<1x128xf32>
      %16 = arith.mulf %13, %13 : vector<32x128xf32>
      %cst_10 = arith.constant dense<0.000000e+00> : vector<128xf32>
      %17 = vector.multi_reduction <add>, %16, %cst_10 [0] : vector<32x128xf32> to vector<128xf32>
      %18 = vector.shape_cast %17 : vector<128xf32> to vector<1x128xf32>
      %cst_11 = arith.constant 3.125000e-02 : f32
      %19 = vector.broadcast %cst_11 : f32 to vector<1x128xf32>
      %20 = arith.mulf %15, %19 : vector<1x128xf32>
      %cst_12 = arith.constant 3.125000e-02 : f32
      %21 = vector.broadcast %cst_12 : f32 to vector<1x128xf32>
      %22 = arith.mulf %18, %21 : vector<1x128xf32>
      %23 = arith.mulf %20, %20 : vector<1x128xf32>
      %24 = arith.subf %22, %23 : vector<1x128xf32>
      %cst_13 = arith.constant 0.000000e+00 : f32
      %25 = vector.broadcast %cst_13 : f32 to vector<1x128xf32>
      %26 = arith.maximumf %24, %25 : vector<1x128xf32>
      %27 = vector.broadcast %20 : vector<1x128xf32> to vector<32x128xf32>
      %28 = arith.subf %13, %27 : vector<32x128xf32>
      %cst_14 = arith.constant 9.99999974E-6 : f32
      %29 = vector.broadcast %cst_14 : f32 to vector<1x128xf32>
      %30 = arith.addf %26, %29 : vector<1x128xf32>
      %31 = math.rsqrt %30 : vector<1x128xf32>
      %32 = vector.broadcast %31 : vector<1x128xf32> to vector<32x128xf32>
      %33 = arith.mulf %28, %32 : vector<32x128xf32>
      %cst_15 = arith.constant 0.000000e+00 : f32
      %34 = vector.broadcast %cst_15 : f32 to vector<32x128xf32>
      %35 = arith.cmpf oge, %33, %34 : vector<32x128xf32>
      %cst_16 = arith.constant 0.00999999977 : f32
      %36 = vector.broadcast %cst_16 : f32 to vector<32x128xf32>
      %37 = arith.mulf %36, %33 : vector<32x128xf32>
      %38 = arith.select %35, %33, %37 : vector<32x128xi1>, vector<32x128xf32>
      %39 = arith.truncf %38 : vector<32x128xf32> to vector<32x128xbf16>
      %c0_17 = arith.constant 0 : index
      %c0_18 = arith.constant 0 : index
      %40 = vector.load %arg4[%c0_17, %c0_18] : memref<32x128xbf16, #tpu.memory_space<vmem>>, vector<32x128xbf16>
      tpu.vector_store %arg4[%c0_17, %c0_18], %39 {strides = array<i32>} : memref<32x128xbf16, #tpu.memory_space<vmem>>, vector<32x128xbf16>,
    } else {
    }
    return
  }
  func.func @transform_0(%arg0: i32) -> (i32, i32) {
    %c0_i32 = arith.constant 0 : i32
    %c0_i32_0 = arith.constant 0 : i32
    return %arg0, %c0_i32 : i32, i32
  }
  func.func @transform_1(%arg0: i32) -> (i32, i32) {
    %c0_i32 = arith.constant 0 : i32
    %c0_i32_0 = arith.constant 0 : i32
    %c0_i32_1 = arith.constant 0 : i32
    return %c0_i32, %c0_i32_0 : i32, i32
  }
  func.func @transform_2(%arg0: i32) -> (i32, i32) {
    %c0_i32 = arith.constant 0 : i32
    %c0_i32_0 = arith.constant 0 : i32
    %c0_i32_1 = arith.constant 0 : i32
    return %c0_i32, %c0_i32_0 : i32, i32
  }
  func.func @transform_3(%arg0: i32) -> (i32, i32) {
    %c0_i32 = arith.constant 0 : i32
    %c0_i32_0 = arith.constant 0 : i32
    %c0_i32_1 = arith.constant 0 : i32
    return %c0_i32, %c0_i32_0 : i32, i32
  }
}

module attributes {stable_mosaic.version = 11 : i64} {
  func.func @_fc_tail_kernel(%arg0: i32, %arg1: memref<2x1024xbf16, #tpu.memory_space<vmem>>, %arg2: memref<2x18xbf16, #tpu.memory_space<vmem>>, %arg3: memref<1024x256xbf16, #tpu.memory_space<vmem>>, %arg4: memref<1x256xf32, #tpu.memory_space<vmem>>, %arg5: memref<256x128xbf16, #tpu.memory_space<vmem>>, %arg6: memref<1x128xf32, #tpu.memory_space<vmem>>, %arg7: memref<18x128xbf16, #tpu.memory_space<vmem>>, %arg8: memref<1x128xf32, #tpu.memory_space<vmem>>, %arg9: memref<128x128xbf16, #tpu.memory_space<vmem>>, %arg10: memref<1x128xf32, #tpu.memory_space<vmem>>, %arg11: memref<128x256xbf16, #tpu.memory_space<vmem>>, %arg12: memref<128x256xbf16, #tpu.memory_space<vmem>>, %arg13: memref<1x256xf32, #tpu.memory_space<vmem>>, %arg14: memref<256x64xbf16, #tpu.memory_space<vmem>>, %arg15: memref<1x64xf32, #tpu.memory_space<vmem>>, %arg16: memref<64x2xbf16, #tpu.memory_space<vmem>>, %arg17: memref<1x2xf32, #tpu.memory_space<vmem>>, %arg18: memref<2x2xf32, #tpu.memory_space<vmem>>) attributes {dimension_semantics = [#tpu.dimension_semantics<arbitrary>], iteration_bounds = array<i64: 1>, scalar_prefetch = 0 : i64, scratch_operands = 0 : i64, tpu.core_type = #tpu.core_type<tc>, window_params = [{pipeline_mode = #tpu.pipeline_mode<synchronous>, transform_indices = @transform_0, window_bounds = array<i64: 2, 1024>}, {pipeline_mode = #tpu.pipeline_mode<synchronous>, transform_indices = @transform_1, window_bounds = array<i64: 2, 18>}, {pipeline_mode = #tpu.pipeline_mode<synchronous>, transform_indices = @transform_2, window_bounds = array<i64: 1024, 256>}, {pipeline_mode = #tpu.pipeline_mode<synchronous>, transform_indices = @transform_3, window_bounds = array<i64: 1, 256>}, {pipeline_mode = #tpu.pipeline_mode<synchronous>, transform_indices = @transform_4, window_bounds = array<i64: 256, 128>}, {pipeline_mode = #tpu.pipeline_mode<synchronous>, transform_indices = @transform_5, window_bounds = array<i64: 1, 128>}, {pipeline_mode = #tpu.pipeline_mode<synchronous>, transform_indices = @transform_6, window_bounds = array<i64: 18, 128>}, {pipeline_mode = #tpu.pipeline_mode<synchronous>, transform_indices = @transform_7, window_bounds = array<i64: 1, 128>}, {pipeline_mode = #tpu.pipeline_mode<synchronous>, transform_indices = @transform_8, window_bounds = array<i64: 128, 128>}, {pipeline_mode = #tpu.pipeline_mode<synchronous>, transform_indices = @transform_9, window_bounds = array<i64: 1, 128>}, {pipeline_mode = #tpu.pipeline_mode<synchronous>, transform_indices = @transform_10, window_bounds = array<i64: 128, 256>}, {pipeline_mode = #tpu.pipeline_mode<synchronous>, transform_indices = @transform_11, window_bounds = array<i64: 128, 256>}, {pipeline_mode = #tpu.pipeline_mode<synchronous>, transform_indices = @transform_12, window_bounds = array<i64: 1, 256>}, {pipeline_mode = #tpu.pipeline_mode<synchronous>, transform_indices = @transform_13, window_bounds = array<i64: 256, 64>}, {pipeline_mode = #tpu.pipeline_mode<synchronous>, transform_indices = @transform_14, window_bounds = array<i64: 1, 64>}, {pipeline_mode = #tpu.pipeline_mode<synchronous>, transform_indices = @transform_15, window_bounds = array<i64: 64, 2>}, {pipeline_mode = #tpu.pipeline_mode<synchronous>, transform_indices = @transform_16, window_bounds = array<i64: 1, 2>}, {pipeline_mode = #tpu.pipeline_mode<synchronous>, transform_indices = @transform_17, window_bounds = array<i64: 2, 2>}]} {
    %c0 = arith.constant 0 : index
    %c0_0 = arith.constant 0 : index
    %0 = vector.load %arg1[%c0, %c0_0] : memref<2x1024xbf16, #tpu.memory_space<vmem>>, vector<2x1024xbf16>
    %c0_1 = arith.constant 0 : index
    %c0_2 = arith.constant 0 : index
    %1 = vector.load %arg3[%c0_1, %c0_2] : memref<1024x256xbf16, #tpu.memory_space<vmem>>, vector<1024x256xbf16>
    %cst = arith.constant dense<0.000000e+00> : vector<2x256xf32>
    %2 = tpu.matmul %0, %1, %cst {dimension_numbers = #tpu.dot_dimension_numbers<[1], [0], [0], [1], [0, 0, 1, 1], [], []>} : vector<2x1024xbf16>, vector<1024x256xbf16>, vector<2x256xf32> -> vector<2x256xf32>
    %c0_3 = arith.constant 0 : index
    %c0_4 = arith.constant 0 : index
    %3 = vector.load %arg4[%c0_3, %c0_4] : memref<1x256xf32, #tpu.memory_space<vmem>>, vector<1x256xf32>
    %4 = vector.broadcast %3 : vector<1x256xf32> to vector<2x256xf32>
    %5 = arith.addf %2, %4 : vector<2x256xf32>
    %cst_5 = arith.constant 0.000000e+00 : f32
    %6 = vector.broadcast %cst_5 : f32 to vector<2x256xf32>
    %7 = arith.cmpf oge, %5, %6 : vector<2x256xf32>
    %cst_6 = arith.constant 0.00999999977 : f32
    %8 = vector.broadcast %cst_6 : f32 to vector<2x256xf32>
    %9 = arith.mulf %8, %5 : vector<2x256xf32>
    %10 = arith.select %7, %5, %9 : vector<2x256xi1>, vector<2x256xf32>
    %11 = arith.truncf %10 : vector<2x256xf32> to vector<2x256xbf16>
    %c0_7 = arith.constant 0 : index
    %c0_8 = arith.constant 0 : index
    %12 = vector.load %arg5[%c0_7, %c0_8] : memref<256x128xbf16, #tpu.memory_space<vmem>>, vector<256x128xbf16>
    %cst_9 = arith.constant dense<0.000000e+00> : vector<2x128xf32>
    %13 = tpu.matmul %11, %12, %cst_9 {dimension_numbers = #tpu.dot_dimension_numbers<[1], [0], [0], [1], [0, 0, 1, 1], [], []>} : vector<2x256xbf16>, vector<256x128xbf16>, vector<2x128xf32> -> vector<2x128xf32>
    %c0_10 = arith.constant 0 : index
    %c0_11 = arith.constant 0 : index
    %14 = vector.load %arg6[%c0_10, %c0_11] : memref<1x128xf32, #tpu.memory_space<vmem>>, vector<1x128xf32>
    %15 = vector.broadcast %14 : vector<1x128xf32> to vector<2x128xf32>
    %16 = arith.addf %13, %15 : vector<2x128xf32>
    %cst_12 = arith.constant 0.000000e+00 : f32
    %17 = vector.broadcast %cst_12 : f32 to vector<2x128xf32>
    %18 = arith.cmpf oge, %16, %17 : vector<2x128xf32>
    %cst_13 = arith.constant 0.00999999977 : f32
    %19 = vector.broadcast %cst_13 : f32 to vector<2x128xf32>
    %20 = arith.mulf %19, %16 : vector<2x128xf32>
    %21 = arith.select %18, %16, %20 : vector<2x128xi1>, vector<2x128xf32>
    %c0_14 = arith.constant 0 : index
    %c0_15 = arith.constant 0 : index
    %22 = vector.load %arg2[%c0_14, %c0_15] : memref<2x18xbf16, #tpu.memory_space<vmem>>, vector<2x18xbf16>
    %c0_16 = arith.constant 0 : index
    %c0_17 = arith.constant 0 : index
    %23 = vector.load %arg7[%c0_16, %c0_17] : memref<18x128xbf16, #tpu.memory_space<vmem>>, vector<18x128xbf16>
    %cst_18 = arith.constant dense<0.000000e+00> : vector<2x128xf32>
    %24 = tpu.matmul %22, %23, %cst_18 {dimension_numbers = #tpu.dot_dimension_numbers<[1], [0], [0], [1], [0, 0, 1, 1], [], []>} : vector<2x18xbf16>, vector<18x128xbf16>, vector<2x128xf32> -> vector<2x128xf32>
    %c0_19 = arith.constant 0 : index
    %c0_20 = arith.constant 0 : index
    %25 = vector.load %arg8[%c0_19, %c0_20] : memref<1x128xf32, #tpu.memory_space<vmem>>, vector<1x128xf32>
    %26 = vector.broadcast %25 : vector<1x128xf32> to vector<2x128xf32>
    %27 = arith.addf %24, %26 : vector<2x128xf32>
    %cst_21 = arith.constant 0.000000e+00 : f32
    %28 = vector.broadcast %cst_21 : f32 to vector<2x128xf32>
    %29 = arith.cmpf oge, %27, %28 : vector<2x128xf32>
    %cst_22 = arith.constant 0.00999999977 : f32
    %30 = vector.broadcast %cst_22 : f32 to vector<2x128xf32>
    %31 = arith.mulf %30, %27 : vector<2x128xf32>
    %32 = arith.select %29, %27, %31 : vector<2x128xi1>, vector<2x128xf32>
    %33 = arith.truncf %32 : vector<2x128xf32> to vector<2x128xbf16>
    %c0_23 = arith.constant 0 : index
    %c0_24 = arith.constant 0 : index
    %34 = vector.load %arg9[%c0_23, %c0_24] : memref<128x128xbf16, #tpu.memory_space<vmem>>, vector<128x128xbf16>
    %cst_25 = arith.constant dense<0.000000e+00> : vector<2x128xf32>
    %35 = tpu.matmul %33, %34, %cst_25 {dimension_numbers = #tpu.dot_dimension_numbers<[1], [0], [0], [1], [0, 0, 1, 1], [], []>} : vector<2x128xbf16>, vector<128x128xbf16>, vector<2x128xf32> -> vector<2x128xf32>
    %c0_26 = arith.constant 0 : index
    %c0_27 = arith.constant 0 : index
    %36 = vector.load %arg10[%c0_26, %c0_27] : memref<1x128xf32, #tpu.memory_space<vmem>>, vector<1x128xf32>
    %37 = vector.broadcast %36 : vector<1x128xf32> to vector<2x128xf32>
    %38 = arith.addf %35, %37 : vector<2x128xf32>
    %cst_28 = arith.constant 0.000000e+00 : f32
    %39 = vector.broadcast %cst_28 : f32 to vector<2x128xf32>
    %40 = arith.cmpf oge, %38, %39 : vector<2x128xf32>
    %cst_29 = arith.constant 0.00999999977 : f32
    %41 = vector.broadcast %cst_29 : f32 to vector<2x128xf32>
    %42 = arith.mulf %41, %38 : vector<2x128xf32>
    %43 = arith.select %40, %38, %42 : vector<2x128xi1>, vector<2x128xf32>
    %44 = arith.truncf %21 : vector<2x128xf32> to vector<2x128xbf16>
    %c0_30 = arith.constant 0 : index
    %c0_31 = arith.constant 0 : index
    %45 = vector.load %arg11[%c0_30, %c0_31] : memref<128x256xbf16, #tpu.memory_space<vmem>>, vector<128x256xbf16>
    %cst_32 = arith.constant dense<0.000000e+00> : vector<2x256xf32>
    %46 = tpu.matmul %44, %45, %cst_32 {dimension_numbers = #tpu.dot_dimension_numbers<[1], [0], [0], [1], [0, 0, 1, 1], [], []>} : vector<2x128xbf16>, vector<128x256xbf16>, vector<2x256xf32> -> vector<2x256xf32>
    %47 = arith.truncf %43 : vector<2x128xf32> to vector<2x128xbf16>
    %c0_33 = arith.constant 0 : index
    %c0_34 = arith.constant 0 : index
    %48 = vector.load %arg12[%c0_33, %c0_34] : memref<128x256xbf16, #tpu.memory_space<vmem>>, vector<128x256xbf16>
    %cst_35 = arith.constant dense<0.000000e+00> : vector<2x256xf32>
    %49 = tpu.matmul %47, %48, %cst_35 {dimension_numbers = #tpu.dot_dimension_numbers<[1], [0], [0], [1], [0, 0, 1, 1], [], []>} : vector<2x128xbf16>, vector<128x256xbf16>, vector<2x256xf32> -> vector<2x256xf32>
    %50 = arith.addf %46, %49 : vector<2x256xf32>
    %c0_36 = arith.constant 0 : index
    %c0_37 = arith.constant 0 : index
    %51 = vector.load %arg13[%c0_36, %c0_37] : memref<1x256xf32, #tpu.memory_space<vmem>>, vector<1x256xf32>
    %52 = vector.broadcast %51 : vector<1x256xf32> to vector<2x256xf32>
    %53 = arith.addf %50, %52 : vector<2x256xf32>
    %cst_38 = arith.constant 0.000000e+00 : f32
    %54 = vector.broadcast %cst_38 : f32 to vector<2x256xf32>
    %55 = arith.cmpf oge, %53, %54 : vector<2x256xf32>
    %cst_39 = arith.constant 0.00999999977 : f32
    %56 = vector.broadcast %cst_39 : f32 to vector<2x256xf32>
    %57 = arith.mulf %56, %53 : vector<2x256xf32>
    %58 = arith.select %55, %53, %57 : vector<2x256xi1>, vector<2x256xf32>
    %59 = arith.truncf %58 : vector<2x256xf32> to vector<2x256xbf16>
    %c0_40 = arith.constant 0 : index
    %c0_41 = arith.constant 0 : index
    %60 = vector.load %arg14[%c0_40, %c0_41] : memref<256x64xbf16, #tpu.memory_space<vmem>>, vector<256x64xbf16>
    %cst_42 = arith.constant dense<0.000000e+00> : vector<2x64xf32>
    %61 = tpu.matmul %59, %60, %cst_42 {dimension_numbers = #tpu.dot_dimension_numbers<[1], [0], [0], [1], [0, 0, 1, 1], [], []>} : vector<2x256xbf16>, vector<256x64xbf16>, vector<2x64xf32> -> vector<2x64xf32>
    %c0_43 = arith.constant 0 : index
    %c0_44 = arith.constant 0 : index
    %62 = vector.load %arg15[%c0_43, %c0_44] : memref<1x64xf32, #tpu.memory_space<vmem>>, vector<1x64xf32>
    %63 = vector.broadcast %62 : vector<1x64xf32> to vector<2x64xf32>
    %64 = arith.addf %61, %63 : vector<2x64xf32>
    %cst_45 = arith.constant 0.000000e+00 : f32
    %65 = vector.broadcast %cst_45 : f32 to vector<2x64xf32>
    %66 = arith.cmpf oge, %64, %65 : vector<2x64xf32>
    %cst_46 = arith.constant 0.00999999977 : f32
    %67 = vector.broadcast %cst_46 : f32 to vector<2x64xf32>
    %68 = arith.mulf %67, %64 : vector<2x64xf32>
    %69 = arith.select %66, %64, %68 : vector<2x64xi1>, vector<2x64xf32>
    %70 = arith.truncf %69 : vector<2x64xf32> to vector<2x64xbf16>
    %c0_47 = arith.constant 0 : index
    %c0_48 = arith.constant 0 : index
    %71 = vector.load %arg16[%c0_47, %c0_48] : memref<64x2xbf16, #tpu.memory_space<vmem>>, vector<64x2xbf16>
    %cst_49 = arith.constant dense<0.000000e+00> : vector<2x2xf32>
    %72 = tpu.matmul %70, %71, %cst_49 {dimension_numbers = #tpu.dot_dimension_numbers<[1], [0], [0], [1], [0, 0, 1, 1], [], []>} : vector<2x64xbf16>, vector<64x2xbf16>, vector<2x2xf32> -> vector<2x2xf32>
    %c0_50 = arith.constant 0 : index
    %c0_51 = arith.constant 0 : index
    %73 = vector.load %arg17[%c0_50, %c0_51] : memref<1x2xf32, #tpu.memory_space<vmem>>, vector<1x2xf32>
    %74 = vector.broadcast %73 : vector<1x2xf32> to vector<2x2xf32>
    %75 = arith.addf %72, %74 : vector<2x2xf32>
    %76 = math.tanh %75 : vector<2x2xf32>
    %c0_52 = arith.constant 0 : index
    %c0_53 = arith.constant 0 : index
    %77 = vector.load %arg18[%c0_52, %c0_53] : memref<2x2xf32, #tpu.memory_space<vmem>>, vector<2x2xf32>
    tpu.vector_store %arg18[%c0_52, %c0_53], %76 {strides = array<i32>} : memref<2x2xf32, #tpu.memory_space<vmem>>, vector<2x2xf32>,
    return
  }
  func.func @transform_0(%arg0: i32) -> (i32, i32) {
    %c0_i32 = arith.constant 0 : i32
    %c0_i32_0 = arith.constant 0 : i32
    %c0_i32_1 = arith.constant 0 : i32
    return %c0_i32, %c0_i32_0 : i32, i32
  }
  func.func @transform_1(%arg0: i32) -> (i32, i32) {
    %c0_i32 = arith.constant 0 : i32
    %c0_i32_0 = arith.constant 0 : i32
    %c0_i32_1 = arith.constant 0 : i32
    return %c0_i32, %c0_i32_0 : i32, i32
  }
  func.func @transform_2(%arg0: i32) -> (i32, i32) {
    %c0_i32 = arith.constant 0 : i32
    %c0_i32_0 = arith.constant 0 : i32
    %c0_i32_1 = arith.constant 0 : i32
    return %c0_i32, %c0_i32_0 : i32, i32
  }
  func.func @transform_3(%arg0: i32) -> (i32, i32) {
    %c0_i32 = arith.constant 0 : i32
    %c0_i32_0 = arith.constant 0 : i32
    %c0_i32_1 = arith.constant 0 : i32
    return %c0_i32, %c0_i32_0 : i32, i32
  }
  func.func @transform_4(%arg0: i32) -> (i32, i32) {
    %c0_i32 = arith.constant 0 : i32
    %c0_i32_0 = arith.constant 0 : i32
    %c0_i32_1 = arith.constant 0 : i32
    return %c0_i32, %c0_i32_0 : i32, i32
  }
  func.func @transform_5(%arg0: i32) -> (i32, i32) {
    %c0_i32 = arith.constant 0 : i32
    %c0_i32_0 = arith.constant 0 : i32
    %c0_i32_1 = arith.constant 0 : i32
    return %c0_i32, %c0_i32_0 : i32, i32
  }
  func.func @transform_6(%arg0: i32) -> (i32, i32) {
    %c0_i32 = arith.constant 0 : i32
    %c0_i32_0 = arith.constant 0 : i32
    %c0_i32_1 = arith.constant 0 : i32
    return %c0_i32, %c0_i32_0 : i32, i32
  }
  func.func @transform_7(%arg0: i32) -> (i32, i32) {
    %c0_i32 = arith.constant 0 : i32
    %c0_i32_0 = arith.constant 0 : i32
    %c0_i32_1 = arith.constant 0 : i32
    return %c0_i32, %c0_i32_0 : i32, i32
  }
  func.func @transform_8(%arg0: i32) -> (i32, i32) {
    %c0_i32 = arith.constant 0 : i32
    %c0_i32_0 = arith.constant 0 : i32
    %c0_i32_1 = arith.constant 0 : i32
    return %c0_i32, %c0_i32_0 : i32, i32
  }
  func.func @transform_9(%arg0: i32) -> (i32, i32) {
    %c0_i32 = arith.constant 0 : i32
    %c0_i32_0 = arith.constant 0 : i32
    %c0_i32_1 = arith.constant 0 : i32
    return %c0_i32, %c0_i32_0 : i32, i32
  }
  func.func @transform_10(%arg0: i32) -> (i32, i32) {
    %c0_i32 = arith.constant 0 : i32
    %c0_i32_0 = arith.constant 0 : i32
    %c0_i32_1 = arith.constant 0 : i32
    return %c0_i32, %c0_i32_0 : i32, i32
  }
  func.func @transform_11(%arg0: i32) -> (i32, i32) {
    %c0_i32 = arith.constant 0 : i32
    %c0_i32_0 = arith.constant 0 : i32
    %c0_i32_1 = arith.constant 0 : i32
    return %c0_i32, %c0_i32_0 : i32, i32
  }
  func.func @transform_12(%arg0: i32) -> (i32, i32) {
    %c0_i32 = arith.constant 0 : i32
    %c0_i32_0 = arith.constant 0 : i32
    %c0_i32_1 = arith.constant 0 : i32
    return %c0_i32, %c0_i32_0 : i32, i32
  }
  func.func @transform_13(%arg0: i32) -> (i32, i32) {
    %c0_i32 = arith.constant 0 : i32
    %c0_i32_0 = arith.constant 0 : i32
    %c0_i32_1 = arith.constant 0 : i32
    return %c0_i32, %c0_i32_0 : i32, i32
  }
  func.func @transform_14(%arg0: i32) -> (i32, i32) {
    %c0_i32 = arith.constant 0 : i32
    %c0_i32_0 = arith.constant 0 : i32
    %c0_i32_1 = arith.constant 0 : i32
    return %c0_i32, %c0_i32_0 : i32, i32
  }
  func.func @transform_15(%arg0: i32) -> (i32, i32) {
    %c0_i32 = arith.constant 0 : i32
    %c0_i32_0 = arith.constant 0 : i32
    %c0_i32_1 = arith.constant 0 : i32
    return %c0_i32, %c0_i32_0 : i32, i32
  }
  func.func @transform_16(%arg0: i32) -> (i32, i32) {
    %c0_i32 = arith.constant 0 : i32
    %c0_i32_0 = arith.constant 0 : i32
    %c0_i32_1 = arith.constant 0 : i32
    return %c0_i32, %c0_i32_0 : i32, i32
  }
  func.func @transform_17(%arg0: i32) -> (i32, i32) {
    %c0_i32 = arith.constant 0 : i32
    %c0_i32_0 = arith.constant 0 : i32
    %c0_i32_1 = arith.constant 0 : i32
    return %c0_i32, %c0_i32_0 : i32, i32
  }
}

</mosaic_0001>

<bundles_post_ra>
// kernel: actor_forward.4
= control target key start
LH: loop header
LB: loop body
LE: loop exit
PB: predicated region body
PF: predicated region fallthrough
CT: control target
= control target key end

     0   :  { %s4933_s12 = smov 0   ;;  %s6583_s0 = inlined_call_operand.vmem [shape: bf16[800,768], index: 0, kind: input, shape index: {}]   ;;  %s6584_s1 = inlined_call_operand.vmem [shape: bf16[768,128], index: 1, kind: input, shape index: {}]   ;;  %s6585_s2 = inlined_call_operand.vmem [shape: f32[1,128], index: 2, kind: input, shape index: {}]   ;;  %s6586_s3 = inlined_call_operand.vmem [shape: bf16[800,128], index: 3, kind: output, shape index: {}]  }
   0x1 LB: > { %s4939_s13 = sadd.s32 4294967295, %s4910_s12   ;;  %p3658_p0 = scmp.ge.s32.totalorder %s4910_s12, 1  ;;  %s4910_s12 = sphi %s4933_s12, %s13_s12  }
   0x2   : > { %p134_p1 = scmp.lt.s32.totalorder %s4910_s12, 3 }
   0x4   : > { %p135_p2 = pnand %p3658_p0, %p134_p1 }
   0x5   : > { %v4603_v0 = vld [vmem:[%s6584_s1] sm:$0xff] (!%p135_p2)   ;;  %v4912_v1 = vmov (!%p135_p2), 0   ;;  %v4605_v3 = vld [vmem:[%s6584_s1 + $0x8] sm:$0xff] (!%p135_p2)   ;;  %v4607_v5 = vld [vmem:[%s6584_s1 + $0x10] sm:$0xff] (!%p135_p2)   ;;  %s154_s5 = smul.u32 (!%p135_p2), 50, %s4939_s13  ;;  %p3859_p4 = scmp.ne.s32.totalorder (!%p135_p2), %s4939_s13, 1 }
   0x6   : > { %138 = sbr.rel (%p135_p2) target bundleno = 964 (0x3c4), region = 32  ;;  %1453 = vmatprep.subr.bf16.mxu1 (!%p135_p2), %v4912_v1  ;;  %1686 = vmatprep.subr.bf16.mxu0 (!%p135_p2), %v4912_v1  ;;  %v4951_v2 = vld [vmem:[%s6584_s1 + $0x80] sm:$0xff] (!%p135_p2)   ;;  %v4961_v4 = vld [vmem:[%s6584_s1 + $0x88] sm:$0xff] (!%p135_p2)   ;;  %v4972_v6 = vld [vmem:[%s6584_s1 + $0x90] sm:$0xff] (!%p135_p2)  }
   0x7   : > { %1454 = vmatpush1.bf16.msra.mxu1 (!%p135_p2), %v4603_v0  ;;  %1687 = vmatpush1.bf16.msra.mxu0 (!%p135_p2), %v4951_v2  ;;  %v4609_v7 = vld [vmem:[%s6584_s1 + $0x18] sm:$0xff] (!%p135_p2)   ;;  %v4611_v9 = vld [vmem:[%s6584_s1 + $0x20] sm:$0xff] (!%p135_p2)   ;;  %v4613_v11 = vld [vmem:[%s6584_s1 + $0x28] sm:$0xff] (!%p135_p2)   ;;  %p155_p3 = scmp.lt.s32.totalorder (!%p135_p2), %s154_s5, 99 }
   0x8   : > { %1455 = vmatprep.subr.bf16.mxu1 (!%p135_p2), %v4912_v1  ;;  %1688 = vmatprep.subr.bf16.mxu0 (!%p135_p2), %v4912_v1  ;;  %v4983_v8 = vld [vmem:[%s6584_s1 + $0x98] sm:$0xff] (!%p135_p2)   ;;  %v4995_v10 = vld [vmem:[%s6584_s1 + $0xa0] sm:$0xff] (!%p135_p2)   ;;  %v5006_v12 = vld [vmem:[%s6584_s1 + $0xa8] sm:$0xff] (!%p135_p2)  }
   0x9   : > { %v4615_v13 = vld [vmem:[%s6584_s1 + $0x30] sm:$0xff] (!%p135_p2)   ;;  %v4617_v15 = vld [vmem:[%s6584_s1 + $0x38] sm:$0xff] (!%p135_p2)   ;;  %v4619_v17 = vld [vmem:[%s6584_s1 + $0x40] sm:$0xff] (!%p135_p2)  }
   0xa   : > { %v5017_v14 = vld [vmem:[%s6584_s1 + $0xb0] sm:$0xff] (!%p135_p2)   ;;  %v5028_v16 = vld [vmem:[%s6584_s1 + $0xb8] sm:$0xff] (!%p135_p2)   ;;  %v5044_v18 = vld [vmem:[%s6584_s1 + $0xc0] sm:$0xff] (!%p135_p2)  }
   0xb   : > { %1456 = vmatpush1.bf16.msra.mxu1 (!%p135_p2), %v4605_v3  ;;  %1689 = vmatpush1.bf16.msra.mxu0 (!%p135_p2), %v4961_v4  ;;  %v4621_v20 = vld [vmem:[%s6584_s1 + $0x48] sm:$0xff] (!%p135_p2)   ;;  %v4623_v23 = vld [vmem:[%s6584_s1 + $0x50] sm:$0xff] (!%p135_p2)   ;;  %v4625_v25 = vld [vmem:[%s6584_s1 + $0x58] sm:$0xff] (!%p135_p2)  }
   0xc   : > { %1457 = vmatprep.subr.bf16.mxu1 (!%p135_p2), %v4912_v1  ;;  %1690 = vmatprep.subr.bf16.mxu0 (!%p135_p2), %v4912_v1  ;;  %v5057_v22 = vld [vmem:[%s6584_s1 + $0xc8] sm:$0xff] (!%p135_p2)   ;;  %v5068_v24 = vld [vmem:[%s6584_s1 + $0xd0] sm:$0xff] (!%p135_p2)   ;;  %v5079_v26 = vld [vmem:[%s6584_s1 + $0xd8] sm:$0xff] (!%p135_p2)  }
   0xd   : > { %s6837_s5 = smov (!%p155_p3, %s154_s5), 99  ;;  %v4627_v27 = vld [vmem:[%s6584_s1 + $0x60] sm:$0xff]   ;;  %v4629_v29 = vld [vmem:[%s6584_s1 + $0x68] sm:$0xff]   ;;  %v4631_v31 = vld [vmem:[%s6584_s1 + $0x70] sm:$0xff]  }
   0xe   : > { %s4593_s20 = smul.u32 24, %s6837_s5  ;;  %v5090_v28 = vld [vmem:[%s6584_s1 + $0xe0] sm:$0xff]   ;;  %v5101_v30 = vld [vmem:[%s6584_s1 + $0xe8] sm:$0xff]   ;;  %v5112_v32 = vld [vmem:[%s6584_s1 + $0xf0] sm:$0xff]  }
   0xf   : > { %1458 = vmatpush1.bf16.msra.mxu1 %v4607_v5  ;;  %1691 = vmatpush1.bf16.msra.mxu0 %v4972_v6  ;;  %v4633_v33 = vld [vmem:[%s6584_s1 + $0x78] sm:$0xff]   ;;  %v4641_v38 = vld [vmem:[%s6584_s1 + $0x100] sm:$0xff]   ;;  %v4648_v40 = vld [vmem:[%s6584_s1 + $0x108] sm:$0xff]  }
  0x10   : > { %1459 = vmatprep.subr.bf16.mxu1 %v4912_v1  ;;  %1692 = vmatprep.subr.bf16.mxu0 %v4912_v1  ;;  %s5037_s27 = scalar_lea.vmem %s6583_s0, %s4593_s20  ;;  %v5123_v34 = vld [vmem:[%s6584_s1 + $0xf8] sm:$0xff]   ;;  %v4649_v43 = vld [vmem:[%s6584_s1 + $0x110] sm:$0xff]   ;;  %v4663_v51 = vld [vmem:[%s6584_s1 + $0x120] sm:$0xff]  }
  0x11   : > { %v4637_v19 = vld [vmem:[%s5037_s27 + $0x4] ss:$24 sps:$4 sm:$0xff]   ;;  %v4635_v35 = vld [vmem:[%s5037_s27] ss:$24 sps:$4 sm:$0xff]   ;;  %v4642_v37 = vld [vmem:[%s5037_s27 + $0x34] ss:$24 sps:$4 sm:$0xff]  }
  0x12   : > { %v4640_v21 = vld [vmem:[%s5037_s27 + $0xc] ss:$24 sps:$4 sm:$0xff]   ;;  %1485 = vmatprep.mubr.bf16.mxu1 %v4637_v19  ;;  %v4638_v36 = vld [vmem:[%s5037_s27 + $0x8] ss:$24 sps:$4 sm:$0xff]   ;;  %v4644_v39 = vld [vmem:[%s5037_s27 + $0x3c] ss:$24 sps:$4 sm:$0xff]  }
  0x13   : > { %1460 = vmatpush1.bf16.msra.mxu1 %v4609_v7  ;;  %1693 = vmatpush1.bf16.msra.mxu0 %v4983_v8  ;;  %v4646_v41 = vld [vmem:[%s5037_s27 + $0x30] ss:$24 sps:$4 sm:$0xff]   ;;  %v4650_v44 = vld [vmem:[%s5037_s27 + $0x64] ss:$24 sps:$4 sm:$0xff]   ;;  %v4654_v47 = vld [vmem:[%s5037_s27 + $0x60] ss:$24 sps:$4 sm:$0xff]  }
  0x14   : > { %1461 = vmatprep.subr.bf16.mxu1 %v4912_v1  ;;  %1694 = vmatprep.subr.bf16.mxu0 %v4912_v1  ;;  %v4647_v42 = vld [vmem:[%s5037_s27 + $0x38] ss:$24 sps:$4 sm:$0xff]   ;;  %v4652_v45 = vld [vmem:[%s5037_s27 + $0x6c] ss:$24 sps:$4 sm:$0xff]   ;;  %v4655_v48 = vld [vmem:[%s5037_s27 + $0x68] ss:$24 sps:$4 sm:$0xff]  }
  0x15   : > { %1718 = vmatprep.mubr.bf16.mxu0 %v4640_v21  ;;  %v4656_v46 = vld [vmem:[%s6584_s1 + $0x118] sm:$0xff]   ;;  %v4657_v49 = vld [vmem:[%s5037_s27 + $0x94] ss:$24 sps:$4 sm:$0xff]   ;;  %v4661_v53 = vld [vmem:[%s5037_s27 + $0x90] ss:$24 sps:$4 sm:$0xff]  }
  0x16   : > { %v4659_v50 = vld [vmem:[%s5037_s27 + $0x9c] ss:$24 sps:$4 sm:$0xff]   ;;  %v4670_v52 = vld [vmem:[%s6584_s1 + $0x128] sm:$0xff]   ;;  %v4662_v54 = vld [vmem:[%s5037_s27 + $0x98] ss:$24 sps:$4 sm:$0xff]  }
  0x17   : > { %1462 = vmatpush1.bf16.msra.mxu1 %v4611_v9  ;;  %1695 = vmatpush1.bf16.msra.mxu0 %v4995_v10  ;;  %v4664_v55 = vld [vmem:[%s5037_s27 + $0xc4] ss:$24 sps:$4 sm:$0xff]   ;;  %v4677_v57 = vld [vmem:[%s6584_s1 + $0x130] sm:$0xff]   ;;  %v4668_v59 = vld [vmem:[%s5037_s27 + $0xc0] ss:$24 sps:$4 sm:$0xff]  }
  0x18   : > { %1463 = vmatprep.subr.bf16.mxu1 %v4912_v1  ;;  %1696 = vmatprep.subr.bf16.mxu0 %v4912_v1  ;;  %v4666_v56 = vld [vmem:[%s5037_s27 + $0xcc] ss:$24 sps:$4 sm:$0xff]   ;;  %v4682_v58 = vld [vmem:[%s6584_s1 + $0x138] sm:$0xff]   ;;  %v4669_v60 = vld [vmem:[%s5037_s27 + $0xc8] ss:$24 sps:$4 sm:$0xff]  }
  0x19   : > { %v4671_v61 = vld [vmem:[%s5037_s27 + $0xf4] ss:$24 sps:$4 sm:$0xff]   ;;  %v4685_v63 = vld [vmem:[%s6584_s1 + $0x140] sm:$0xff]   ;;  %v4676_v3 = vld [vmem:[%s5037_s27 + $0xf8] ss:$24 sps:$4 sm:$0xff]  }
  0x1a   : > { %v4673_v62 = vld [vmem:[%s5037_s27 + $0xfc] ss:$24 sps:$4 sm:$0xff]   ;;  %v4692_v0 = vld [vmem:[%s6584_s1 + $0x148] sm:$0xff]   ;;  %v4683_v7 = vld [vmem:[%s5037_s27 + $0x120] ss:$24 sps:$4 sm:$0xff]  }
  0x1b   : > { %1464 = vmatpush1.bf16.msra.mxu1 %v4613_v11  ;;  %1697 = vmatpush1.bf16.msra.mxu0 %v5006_v12  ;;  %v4680_v5 = vld [vmem:[%s5037_s27 + $0x12c] ss:$24 sps:$4 sm:$0xff]   ;;  %v4684_v9 = vld [vmem:[%s5037_s27 + $0x128] ss:$24 sps:$4 sm:$0xff]   ;;  %v4688_v11 = vld [vmem:[%s5037_s27 + $0x15c] ss:$24 sps:$4 sm:$0xff]  }
  0x1c   : > { %1465 = vmatprep.subr.bf16.mxu1 %v4912_v1  ;;  %1698 = vmatprep.subr.bf16.mxu0 %v4912_v1  ;;  %v4697_v19 = vld [vmem:[%s5037_s27 + $0x180] ss:$24 sps:$4 sm:$0xff]  }
  0x1d   : > { %v4698_v21 = vld [vmem:[%s5037_s27 + $0x188] ss:$24 sps:$4 sm:$0xff]  }
  0x1f   : > { %1466 = vmatpush1.bf16.msra.mxu1 %v4615_v13  ;;  %1699 = vmatpush1.bf16.msra.mxu0 %v5017_v14  ;;  %v4690_v13 = vld [vmem:[%s5037_s27 + $0x150] ss:$24 sps:$4 sm:$0xff]  }
  0x20   : > { %1467 = vmatprep.subr.bf16.mxu1 %v4912_v1  ;;  %1700 = vmatprep.subr.bf16.mxu0 %v4912_v1 }
  0x23   : > { %1468 = vmatpush1.bf16.msra.mxu1 %v4617_v15  ;;  %1701 = vmatpush1.bf16.msra.mxu0 %v5028_v16  ;;  %v4691_v15 = vld [vmem:[%s5037_s27 + $0x158] ss:$24 sps:$4 sm:$0xff]  }
  0x24   : > { %1469 = vmatprep.subr.bf16.mxu1 %v4912_v1  ;;  %1702 = vmatprep.subr.bf16.mxu0 %v4912_v1 }
  0x27   : > { %1470 = vmatpush1.bf16.msra.mxu1 %v4619_v17  ;;  %1703 = vmatpush1.bf16.msra.mxu0 %v5044_v18  ;;  %v4695_v17 = vld [vmem:[%s5037_s27 + $0x18c] ss:$24 sps:$4 sm:$0xff]  }
  0x28   : > { %1471 = vmatprep.subr.bf16.mxu1 %v4912_v1  ;;  %1704 = vmatprep.subr.bf16.mxu0 %v4912_v1 }
  0x2b   : > { %1472 = vmatpush1.bf16.msra.mxu1 %v4621_v20  ;;  %1705 = vmatpush1.bf16.msra.mxu0 %v5057_v22  ;;  %v4728_v20 = vld [vmem:[%s6584_s1 + $0x178] sm:$0xff]  }
  0x2c   : > { %1473 = vmatprep.subr.bf16.mxu1 %v4912_v1  ;;  %1706 = vmatprep.subr.bf16.mxu0 %v4912_v1 }
  0x2f   : > { %1474 = vmatpush1.bf16.msra.mxu1 %v4623_v23  ;;  %1707 = vmatpush1.bf16.msra.mxu0 %v5068_v24  ;;  %v4702_v23 = vld [vmem:[%s5037_s27 + $0x1bc] ss:$24 sps:$4 sm:$0xff]  }
  0x30   : > { %1475 = vmatprep.subr.bf16.mxu1 %v4912_v1  ;;  %1708 = vmatprep.subr.bf16.mxu0 %v4912_v1 }
  0x33   : > { %1476 = vmatpush1.bf16.msra.mxu1 %v4625_v25  ;;  %1709 = vmatpush1.bf16.msra.mxu0 %v5079_v26  ;;  %v4705_v25 = vld [vmem:[%s5037_s27 + $0x1b8] ss:$24 sps:$4 sm:$0xff]  }
  0x34   : > { %1477 = vmatprep.subr.bf16.mxu1 %v4912_v1  ;;  %1710 = vmatprep.subr.bf16.mxu0 %v4912_v1 }
  0x37   : > { %1478 = vmatpush1.bf16.msra.mxu1 %v4627_v27  ;;  %1711 = vmatpush1.bf16.msra.mxu0 %v5090_v28  ;;  %v4709_v27 = vld [vmem:[%s5037_s27 + $0x1ec] ss:$24 sps:$4 sm:$0xff]  }
  0x38   : > { %1479 = vmatprep.subr.bf16.mxu1 %v4912_v1  ;;  %1712 = vmatprep.subr.bf16.mxu0 %v4912_v1 }
  0x3b   : > { %1480 = vmatpush1.bf16.msra.mxu1 %v4629_v29  ;;  %1713 = vmatpush1.bf16.msra.mxu0 %v5101_v30  ;;  %v4715_v29 = vld [vmem:[%s5037_s27 + $0x214] ss:$24 sps:$4 sm:$0xff]  }
  0x3c   : > { %1481 = vmatprep.subr.bf16.mxu1 %v4912_v1  ;;  %1714 = vmatprep.subr.bf16.mxu0 %v4912_v1 }
  0x3f   : > { %1482 = vmatpush1.bf16.msra.mxu1 %v4631_v31  ;;  %1715 = vmatpush1.bf16.msra.mxu0 %v5112_v32  ;;  %v4719_v31 = vld [vmem:[%s5037_s27 + $0x210] ss:$24 sps:$4 sm:$0xff]  }
  0x40   : > { %1483 = vmatprep.subr.bf16.mxu1 %v4912_v1  ;;  %1716 = vmatprep.subr.bf16.mxu0 %v4912_v1 }
  0x43   : > { %1484 = vmatpush1.bf16.msra.mxu1 %v4633_v33  ;;  %1717 = vmatpush1.bf16.msra.mxu0 %v5123_v34  ;;  %v4722_v33 = vld [vmem:[%s5037_s27 + $0x244] ss:$24 sps:$4 sm:$0xff]  }
  0x44   : > { %4361 = vmatprep.subr.bf16.mxu1 %v4912_v1  ;;  %1919 = vmatprep.subr.bf16.mxu0 %v4912_v1 }
  0x46   : > { %1486 = vmatmul.mubr.bf16.vlgmr.msra.gmra.mrb[0].mxu1 %v4635_v35  ;;  %1719 = vmatmul.mubr.bf16.vlgmr.msra.gmra.mrb[0].mxu0 %v4638_v36  ;;  %v4726_v35 = vld [vmem:[%s5037_s27 + $0x240] ss:$24 sps:$4 sm:$0xff]  }
  0x47   : > { %1493 = vmatprep.mubr.bf16.mxu1 %v4642_v37  ;;  %1920 = vmatpush1.bf16.msra.mxu0 %v4641_v38  ;;  %v4727_v36 = vld [vmem:[%s5037_s27 + $0x248] ss:$24 sps:$4 sm:$0xff]   ;;  %v4729_v37 = vld [vmem:[%s5037_s27 + $0x274] ss:$24 sps:$4 sm:$0xff]  }
  0x48   : > { %4377 = vmatpush1.bf16.msra.mxu1 %v4951_v2  ;;  %1726 = vmatprep.mubr.bf16.mxu0 %v4644_v39  ;;  %v4675_v2 = vld [vmem:[%s5037_s27 + $0xf0] ss:$24 sps:$4 sm:$0xff]   ;;  %v4733_v38 = vld [vmem:[%s5037_s27 + $0x14] ss:$24 sps:$4 sm:$0xff]  }
  0x49   : > { %1921 = vmatprep.subr.bf16.mxu0 %v4912_v1  ;;  %4362 = vmatprep.subr.bf16.mxu1 %v4912_v1  ;;  %v4734_v39 = vld [vmem:[%s5037_s27 + $0x270] ss:$24 sps:$4 sm:$0xff]  }
  0x4b   : > { %1922 = vmatpush1.bf16.msra.mxu0 %v4648_v40  ;;  %v4731_v40 = vld [vmem:[%s5037_s27 + $0x10] ss:$24 sps:$4 sm:$0xff]  }
  0x4c   : > { %4378 = vmatpush1.bf16.msra.mxu1 %v4961_v4  ;;  %1923 = vmatprep.subr.bf16.mxu0 %v4912_v1  ;;  %v4678_v4 = vld [vmem:[%s5037_s27 + $0x124] ss:$24 sps:$4 sm:$0xff]  }
  0x4d   : > { %4363 = vmatprep.subr.bf16.mxu1 %v4912_v1 }
  0x4e   : > { %1494 = vmatmul.mubr.bf16.gmra.mrb[4].mxu1 %v4646_v41  ;;  %1727 = vmatmul.mubr.bf16.gmra.mrb[4].mxu0 %v4647_v42  ;;  %v4735_v41 = vld [vmem:[%s5037_s27 + $0x2a4] ss:$24 sps:$4 sm:$0xff]  }
  0x4f   : > { %1501 = vmatprep.mubr.bf16.mxu1 %v4650_v44  ;;  %1924 = vmatpush1.bf16.msra.mxu0 %v4649_v43  ;;  %v4737_v42 = vld [vmem:[%s5037_s27 + $0x44] ss:$24 sps:$4 sm:$0xff]   ;;  %v4739_v43 = vld [vmem:[%s5037_s27 + $0x2a0] ss:$24 sps:$4 sm:$0xff]  }
  0x50   : > { %1734 = vmatprep.mubr.bf16.mxu0 %v4652_v45  ;;  %1925 = vmatprep.subr.bf16.mxu0 %v4912_v1  ;;  %v4740_v44 = vld [vmem:[%s5037_s27 + $0x40] ss:$24 sps:$4 sm:$0xff]   ;;  %v4741_v45 = vld [vmem:[%s5037_s27 + $0x2d4] ss:$24 sps:$4 sm:$0xff]  }
  0x51   : > { %4379 = vmatpush1.bf16.msra.mxu1 %v4972_v6  ;;  %v4699_v6 = vld [vmem:[%s6584_s1 + $0x150] sm:$0xff]  }
  0x52   : > { %4364 = vmatprep.subr.bf16.mxu1 %v4912_v1 }
  0x53   : > { %1926 = vmatpush1.bf16.msra.mxu0 %v4656_v46  ;;  %v4743_v46 = vld [vmem:[%s5037_s27 + $0x74] ss:$24 sps:$4 sm:$0xff]  }
  0x54   : > { %1927 = vmatprep.subr.bf16.mxu0 %v4912_v1 }
  0x55   : > { %4380 = vmatpush1.bf16.msra.mxu1 %v4983_v8  ;;  %v4706_v8 = vld [vmem:[%s6584_s1 + $0x158] sm:$0xff]  }
  0x56   : > { %1502 = vmatmul.mubr.bf16.gmra.mrb[8].mxu1 %v4654_v47  ;;  %4365 = vmatprep.subr.bf16.mxu1 %v4912_v1  ;;  %v4745_v47 = vld [vmem:[%s5037_s27 + $0x2d0] ss:$24 sps:$4 sm:$0xff]  }
  0x57   : > { %1735 = vmatmul.mubr.bf16.gmra.mrb[8].mxu0 %v4655_v48  ;;  %1509 = vmatprep.mubr.bf16.mxu1 %v4657_v49  ;;  %v4746_v48 = vld [vmem:[%s5037_s27 + $0x70] ss:$24 sps:$4 sm:$0xff]   ;;  %v4747_v49 = vld [vmem:[%s5037_s27 + $0x304] ss:$24 sps:$4 sm:$0xff]  }
  0x58   : > { %1742 = vmatprep.mubr.bf16.mxu0 %v4659_v50  ;;  %1928 = vmatpush1.bf16.msra.mxu0 %v4663_v51  ;;  %v4749_v50 = vld [vmem:[%s5037_s27 + $0xa4] ss:$24 sps:$4 sm:$0xff]   ;;  %v4751_v51 = vld [vmem:[%s5037_s27 + $0x300] ss:$24 sps:$4 sm:$0xff]  }
  0x59   : > { %1929 = vmatprep.subr.bf16.mxu0 %v4912_v1  ;;  %4381 = vmatpush1.bf16.msra.mxu1 %v4995_v10  ;;  %v4686_v10 = vld [vmem:[%s5037_s27 + $0x154] ss:$24 sps:$4 sm:$0xff]  }
  0x5a   : > { %4366 = vmatprep.subr.bf16.mxu1 %v4912_v1 }
  0x5c   : > { %1930 = vmatpush1.bf16.msra.mxu0 %v4670_v52  ;;  %v4752_v52 = vld [vmem:[%s5037_s27 + $0xa0] ss:$24 sps:$4 sm:$0xff]  }
  0x5d   : > { %1931 = vmatprep.subr.bf16.mxu0 %v4912_v1  ;;  %4382 = vmatpush1.bf16.msra.mxu1 %v5006_v12  ;;  %v4711_v12 = vld [vmem:[%s6584_s1 + $0x160] sm:$0xff]  }
  0x5e   : > { %1510 = vmatmul.mubr.bf16.gmra.mrb[12].mxu1 %v4661_v53  ;;  %4367 = vmatprep.subr.bf16.mxu1 %v4912_v1  ;;  %v4753_v53 = vld [vmem:[%s5037_s27 + $0x334] ss:$24 sps:$4 sm:$0xff]  }
  0x5f   : > { %1743 = vmatmul.mubr.bf16.gmra.mrb[12].mxu0 %v4662_v54  ;;  %1517 = vmatprep.mubr.bf16.mxu1 %v4664_v55  ;;  %v4755_v54 = vld [vmem:[%s5037_s27 + $0xd4] ss:$24 sps:$4 sm:$0xff]   ;;  %v4757_v55 = vld [vmem:[%s5037_s27 + $0x330] ss:$24 sps:$4 sm:$0xff]  }
  0x60   : > { %1750 = vmatprep.mubr.bf16.mxu0 %v4666_v56  ;;  %1932 = vmatpush1.bf16.msra.mxu0 %v4677_v57  ;;  %v4758_v56 = vld [vmem:[%s5037_s27 + $0xd0] ss:$24 sps:$4 sm:$0xff]   ;;  %v4759_v57 = vld [vmem:[%s5037_s27 + $0x364] ss:$24 sps:$4 sm:$0xff]  }
  0x61   : > { %1933 = vmatprep.subr.bf16.mxu0 %v4912_v1  ;;  %4383 = vmatpush1.bf16.msra.mxu1 %v5017_v14  ;;  %v4714_v14 = vld [vmem:[%s6584_s1 + $0x168] sm:$0xff]  }
  0x62   : > { %4368 = vmatprep.subr.bf16.mxu1 %v4912_v1 }
  0x64   : > { %1934 = vmatpush1.bf16.msra.mxu0 %v4682_v58  ;;  %v4761_v58 = vld [vmem:[%s5037_s27 + $0x104] ss:$24 sps:$4 sm:$0xff]  }
  0x65   : > { %1935 = vmatprep.subr.bf16.mxu0 %v4912_v1  ;;  %4384 = vmatpush1.bf16.msra.mxu1 %v5028_v16  ;;  %v4693_v16 = vld [vmem:[%s5037_s27 + $0x184] ss:$24 sps:$4 sm:$0xff]  }
  0x66   : > { %1518 = vmatmul.mubr.bf16.gmra.mrb[16].mxu1 %v4668_v59  ;;  %4369 = vmatprep.subr.bf16.mxu1 %v4912_v1  ;;  %v4763_v59 = vld [vmem:[%s5037_s27 + $0x360] ss:$24 sps:$4 sm:$0xff]  }
  0x67   : > { %1751 = vmatmul.mubr.bf16.gmra.mrb[16].mxu0 %v4669_v60  ;;  %1525 = vmatprep.mubr.bf16.mxu1 %v4671_v61  ;;  %v4764_v60 = vld [vmem:[%s5037_s27 + $0x100] ss:$24 sps:$4 sm:$0xff]   ;;  %v4765_v61 = vld [vmem:[%s5037_s27 + $0x394] ss:$24 sps:$4 sm:$0xff]  }
  0x68   : > { %1758 = vmatprep.mubr.bf16.mxu0 %v4673_v62  ;;  %1936 = vmatpush1.bf16.msra.mxu0 %v4685_v63  ;;  %v4767_v62 = vld [vmem:[%s5037_s27 + $0x134] ss:$24 sps:$4 sm:$0xff]   ;;  %v4769_v63 = vld [vmem:[%s5037_s27 + $0x390] ss:$24 sps:$4 sm:$0xff]  }
  0x69   : > { %1937 = vmatprep.subr.bf16.mxu0 %v4912_v1  ;;  %4385 = vmatpush1.bf16.msra.mxu1 %v5044_v18  ;;  %v4721_v18 = vld [vmem:[%s6584_s1 + $0x170] sm:$0xff]  }
  0x6a   : > { %4370 = vmatprep.subr.bf16.mxu1 %v4912_v1 }
  0x6c   : > { %1938 = vmatpush1.bf16.msra.mxu0 %v4692_v0  ;;  %v4770_v0 = vld [vmem:[%s5037_s27 + $0x130] ss:$24 sps:$4 sm:$0xff]  }
  0x6d   : > { %1939 = vmatprep.subr.bf16.mxu0 %v4912_v1  ;;  %4386 = vmatpush1.bf16.msra.mxu1 %v5057_v22  ;;  %v4700_v22 = vld [vmem:[%s5037_s27 + $0x1b4] ss:$24 sps:$4 sm:$0xff]  }
  0x6e   : > { %1526 = vmatmul.mubr.bf16.gmra.mrb[20].mxu1 %v4675_v2  ;;  %4371 = vmatprep.subr.bf16.mxu1 %v4912_v1  ;;  %v4771_v2 = vld [vmem:[%s5037_s27 + $0x3c4] ss:$24 sps:$4 sm:$0xff]  }
  0x6f   : > { %1759 = vmatmul.mubr.bf16.gmra.mrb[20].mxu0 %v4676_v3  ;;  %1533 = vmatprep.mubr.bf16.mxu1 %v4678_v4  ;;  %v4773_v3 = vld [vmem:[%s5037_s27 + $0x164] ss:$24 sps:$4 sm:$0xff]   ;;  %v4775_v4 = vld [vmem:[%s5037_s27 + $0x3c0] ss:$24 sps:$4 sm:$0xff]  }
  0x70   : > { %1766 = vmatprep.mubr.bf16.mxu0 %v4680_v5  ;;  %1940 = vmatpush1.bf16.msra.mxu0 %v4699_v6  ;;  %v4776_v5 = vld [vmem:[%s5037_s27 + $0x160] ss:$24 sps:$4 sm:$0xff]   ;;  %v4777_v6 = vld [vmem:[%s5037_s27 + $0x3f4] ss:$24 sps:$4 sm:$0xff]  }
  0x71   : > { %1941 = vmatprep.subr.bf16.mxu0 %v4912_v1  ;;  %4387 = vmatpush1.bf16.msra.mxu1 %v5068_v24  ;;  %v4704_v24 = vld [vmem:[%s5037_s27 + $0x1b0] ss:$24 sps:$4 sm:$0xff]  }
  0x72   : > { %4372 = vmatprep.subr.bf16.mxu1 %v4912_v1 }
  0x74   : > { %1942 = vmatpush1.bf16.msra.mxu0 %v4706_v8  ;;  %v4781_v8 = vld [vmem:[%s5037_s27 + $0x3f0] ss:$24 sps:$4 sm:$0xff]  }
  0x75   : > { %1943 = vmatprep.subr.bf16.mxu0 %v4912_v1  ;;  %4388 = vmatpush1.bf16.msra.mxu1 %v5079_v26  ;;  %v4707_v26 = vld [vmem:[%s5037_s27 + $0x1e4] ss:$24 sps:$4 sm:$0xff]  }
  0x76   : > { %1534 = vmatmul.mubr.bf16.gmra.mrb[24].mxu1 %v4683_v7  ;;  %4373 = vmatprep.subr.bf16.mxu1 %v4912_v1  ;;  %v4779_v7 = vld [vmem:[%s5037_s27 + $0x194] ss:$24 sps:$4 sm:$0xff]  }
  0x77   : > { %1767 = vmatmul.mubr.bf16.gmra.mrb[24].mxu0 %v4684_v9  ;;  %1541 = vmatprep.mubr.bf16.mxu1 %v4686_v10  ;;  %v4782_v9 = vld [vmem:[%s5037_s27 + $0x190] ss:$24 sps:$4 sm:$0xff]   ;;  %v4783_v10 = vld [vmem:[%s5037_s27 + $0x424] ss:$24 sps:$4 sm:$0xff]  }
  0x78   : > { %1774 = vmatprep.mubr.bf16.mxu0 %v4688_v11  ;;  %1944 = vmatpush1.bf16.msra.mxu0 %v4711_v12  ;;  %v4785_v11 = vld [vmem:[%s5037_s27 + $0x1c4] ss:$24 sps:$4 sm:$0xff]   ;;  %v4787_v12 = vld [vmem:[%s5037_s27 + $0x420] ss:$24 sps:$4 sm:$0xff]  }
  0x79   : > { %1945 = vmatprep.subr.bf16.mxu0 %v4912_v1  ;;  %4389 = vmatpush1.bf16.msra.mxu1 %v5090_v28  ;;  %v4713_v28 = vld [vmem:[%s5037_s27 + $0x1e8] ss:$24 sps:$4 sm:$0xff]  }
  0x7a   : > { %4374 = vmatprep.subr.bf16.mxu1 %v4912_v1 }
  0x7c   : > { %1946 = vmatpush1.bf16.msra.mxu0 %v4714_v14  ;;  %v4789_v14 = vld [vmem:[%s5037_s27 + $0x454] ss:$24 sps:$4 sm:$0xff]  }
  0x7d   : > { %1947 = vmatprep.subr.bf16.mxu0 %v4912_v1  ;;  %4390 = vmatpush1.bf16.msra.mxu1 %v5101_v30  ;;  %v4717_v30 = vld [vmem:[%s5037_s27 + $0x21c] ss:$24 sps:$4 sm:$0xff]  }
  0x7e   : > { %1542 = vmatmul.mubr.bf16.gmra.mrb[28].mxu1 %v4690_v13  ;;  %4375 = vmatprep.subr.bf16.mxu1 %v4912_v1  ;;  %v4788_v13 = vld [vmem:[%s5037_s27 + $0x1c0] ss:$24 sps:$4 sm:$0xff]  }
  0x7f   : > { %1775 = vmatmul.mubr.bf16.gmra.mrb[28].mxu0 %v4691_v15  ;;  %1549 = vmatprep.mubr.bf16.mxu1 %v4693_v16  ;;  %v4791_v15 = vld [vmem:[%s5037_s27 + $0x1f4] ss:$24 sps:$4 sm:$0xff]   ;;  %v4793_v16 = vld [vmem:[%s5037_s27 + $0x450] ss:$24 sps:$4 sm:$0xff]  }
  0x80   : > { %1782 = vmatprep.mubr.bf16.mxu0 %v4695_v17  ;;  %1948 = vmatpush1.bf16.msra.mxu0 %v4721_v18  ;;  %v4794_v17 = vld [vmem:[%s5037_s27 + $0x1f0] ss:$24 sps:$4 sm:$0xff]   ;;  %v4795_v18 = vld [vmem:[%s5037_s27 + $0x484] ss:$24 sps:$4 sm:$0xff]  }
  0x81   : > { %1949 = vmatprep.subr.bf16.mxu0 %v4912_v1  ;;  %4391 = vmatpush1.bf16.msra.mxu1 %v5112_v32  ;;  %v4720_v32 = vld [vmem:[%s5037_s27 + $0x218] ss:$24 sps:$4 sm:$0xff]  }
  0x82   : > { %4376 = vmatprep.subr.bf16.mxu1 %v4912_v1  ;;  %v4712_v1 = vld [vmem:[%s5037_s27 + $0x1e0] ss:$24 sps:$4 sm:$0xff]  }
  0x84   : > { %1950 = vmatpush1.bf16.msra.mxu0 %v4728_v20  ;;  %v4799_v20 = vld [vmem:[%s5037_s27 + $0x480] ss:$24 sps:$4 sm:$0xff]  }
  0x85   : > { %4392 = vmatpush1.bf16.msra.mxu1 %v5123_v34  ;;  %v4724_v34 = vld [vmem:[%s5037_s27 + $0x24c] ss:$24 sps:$4 sm:$0xff]  }
  0x86   : > { %1550 = vmatmul.mubr.bf16.gmra.mrb[32].mxu1 %v4697_v19  ;;  %v4797_v19 = vld [vmem:[%s5037_s27 + $0x224] ss:$24 sps:$4 sm:$0xff]  }
  0x87   : > { %1783 = vmatmul.mubr.bf16.gmra.mrb[32].mxu0 %v4698_v21  ;;  %1557 = vmatprep.mubr.bf16.mxu1 %v4700_v22  ;;  %v4800_v21 = vld [vmem:[%s5037_s27 + $0x220] ss:$24 sps:$4 sm:$0xff]   ;;  %v4803_v22 = vld [vmem:[%s5037_s27 + $0x27c] ss:$24 sps:$4 sm:$0xff]  }
  0x88   : > { %1790 = vmatprep.mubr.bf16.mxu0 %v4702_v23  ;;  %v4804_v23 = vld [vmem:[%s5037_s27 + $0x254] ss:$24 sps:$4 sm:$0xff]  }
  0x8e   : > { %1558 = vmatmul.mubr.bf16.gmra.mrb[36].mxu1 %v4704_v24  ;;  %v4801_v24 = vld [vmem:[%s5037_s27 + $0x278] ss:$24 sps:$4 sm:$0xff]  }
  0x8f   : > { %1791 = vmatmul.mubr.bf16.gmra.mrb[36].mxu0 %v4705_v25  ;;  %1565 = vmatprep.mubr.bf16.mxu1 %v4707_v26  ;;  %v4806_v25 = vld [vmem:[%s5037_s27 + $0x250] ss:$24 sps:$4 sm:$0xff]   ;;  %v4807_v26 = vld [vmem:[%s5037_s27 + $0x2ac] ss:$24 sps:$4 sm:$0xff]  }
  0x90   : > { %1798 = vmatprep.mubr.bf16.mxu0 %v4709_v27  ;;  %v4809_v27 = vld [vmem:[%s5037_s27 + $0x284] ss:$24 sps:$4 sm:$0xff]  }
  0x96   : > { %1566 = vmatmul.mubr.bf16.gmra.mrb[40].mxu1 %v4712_v1  ;;  %v4811_v1 = vld [vmem:[%s5037_s27 + $0x2a8] ss:$24 sps:$4 sm:$0xff]  }
  0x97   : > { %1799 = vmatmul.mubr.bf16.gmra.mrb[40].mxu0 %v4713_v28  ;;  %1573 = vmatprep.mubr.bf16.mxu1 %v4715_v29  ;;  %v4812_v28 = vld [vmem:[%s5037_s27 + $0x280] ss:$24 sps:$4 sm:$0xff]   ;;  %v4813_v29 = vld [vmem:[%s5037_s27 + $0x2dc] ss:$24 sps:$4 sm:$0xff]  }
  0x98   : > { %1806 = vmatprep.mubr.bf16.mxu0 %v4717_v30  ;;  %v4815_v30 = vld [vmem:[%s5037_s27 + $0x2b4] ss:$24 sps:$4 sm:$0xff]  }
  0x9e   : > { %1574 = vmatmul.mubr.bf16.gmra.mrb[44].mxu1 %v4719_v31 }
  0x9f   : > { %1807 = vmatmul.mubr.bf16.gmra.mrb[44].mxu0 %v4720_v32  ;;  %1581 = vmatprep.mubr.bf16.mxu1 %v4722_v33  ;;  %v4817_v33 = vld [vmem:[%s5037_s27 + $0x2d8] ss:$24 sps:$4 sm:$0xff]  }
  0xa0   : > { %1814 = vmatprep.mubr.bf16.mxu0 %v4724_v34  ;;  %v4818_v34 = vld [vmem:[%s5037_s27 + $0x2b0] ss:$24 sps:$4 sm:$0xff]  }
  0xa6   : > { %1582 = vmatmul.mubr.bf16.gmra.mrb[48].mxu1 %v4726_v35 }
  0xa7   : > { %1815 = vmatmul.mubr.bf16.gmra.mrb[48].mxu0 %v4727_v36  ;;  %1589 = vmatprep.mubr.bf16.mxu1 %v4729_v37  ;;  %v4819_v36 = vld [vmem:[%s5037_s27 + $0x30c] ss:$24 sps:$4 sm:$0xff]  }
  0xa8   : > { %1951 = vmatprep.mubr.bf16.mxu0 %v4733_v38  ;;  %v4821_v38 = vld [vmem:[%s5037_s27 + $0x2e4] ss:$24 sps:$4 sm:$0xff]  }
  0xae   : > { %1590 = vmatmul.mubr.bf16.gmra.mrb[52].mxu1 %v4734_v39 }
  0xaf   : > { %1952 = vmatmul.mubr.bf16.vlgmr.msra.gmra.mrb[0].mxu0 %v4731_v40  ;;  %1597 = vmatprep.mubr.bf16.mxu1 %v4735_v41  ;;  %v4823_v41 = vld [vmem:[%s5037_s27 + $0x308] ss:$24 sps:$4 sm:$0xff]  }
  0xb0   : > { %1959 = vmatprep.mubr.bf16.mxu0 %v4737_v42  ;;  %v4824_v42 = vld [vmem:[%s5037_s27 + $0x2e0] ss:$24 sps:$4 sm:$0xff]  }
  0xb6   : > { %1598 = vmatmul.mubr.bf16.gmra.mrb[56].mxu1 %v4739_v43 }
  0xb7   : > { %1960 = vmatmul.mubr.bf16.gmra.mrb[4].mxu0 %v4740_v44  ;;  %1605 = vmatprep.mubr.bf16.mxu1 %v4741_v45  ;;  %v4825_v44 = vld [vmem:[%s5037_s27 + $0x33c] ss:$24 sps:$4 sm:$0xff]  }
  0xb8   : > { %1967 = vmatprep.mubr.bf16.mxu0 %v4743_v46  ;;  %v4827_v46 = vld [vmem:[%s5037_s27 + $0x314] ss:$24 sps:$4 sm:$0xff]  }
  0xbe   : > { %1606 = vmatmul.mubr.bf16.gmra.mrb[60].mxu1 %v4745_v47 }
  0xbf   : > { %1968 = vmatmul.mubr.bf16.gmra.mrb[8].mxu0 %v4746_v48  ;;  %1613 = vmatprep.mubr.bf16.mxu1 %v4747_v49  ;;  %v4829_v49 = vld [vmem:[%s5037_s27 + $0x338] ss:$24 sps:$4 sm:$0xff]  }
  0xc0   : > { %1975 = vmatprep.mubr.bf16.mxu0 %v4749_v50  ;;  %v4830_v50 = vld [vmem:[%s5037_s27 + $0x310] ss:$24 sps:$4 sm:$0xff]  }
  0xc6   : > { %1614 = vmatmul.mubr.bf16.gmra.mrb[64].mxu1 %v4751_v51 }
  0xc7   : > { %1976 = vmatmul.mubr.bf16.gmra.mrb[12].mxu0 %v4752_v52  ;;  %1621 = vmatprep.mubr.bf16.mxu1 %v4753_v53  ;;  %v4831_v52 = vld [vmem:[%s5037_s27 + $0x36c] ss:$24 sps:$4 sm:$0xff]  }
  0xc8   : > { %1983 = vmatprep.mubr.bf16.mxu0 %v4755_v54  ;;  %v4833_v54 = vld [vmem:[%s5037_s27 + $0x344] ss:$24 sps:$4 sm:$0xff]  }
  0xce   : > { %1622 = vmatmul.mubr.bf16.gmra.mrb[68].mxu1 %v4757_v55 }
  0xcf   : > { %1984 = vmatmul.mubr.bf16.gmra.mrb[16].mxu0 %v4758_v56  ;;  %1629 = vmatprep.mubr.bf16.mxu1 %v4759_v57  ;;  %v4835_v57 = vld [vmem:[%s5037_s27 + $0x368] ss:$24 sps:$4 sm:$0xff]  }
  0xd0   : > { %1991 = vmatprep.mubr.bf16.mxu0 %v4761_v58  ;;  %v4836_v58 = vld [vmem:[%s5037_s27 + $0x340] ss:$24 sps:$4 sm:$0xff]  }
  0xd6   : > { %1630 = vmatmul.mubr.bf16.gmra.mrb[72].mxu1 %v4763_v59 }
  0xd7   : > { %1992 = vmatmul.mubr.bf16.gmra.mrb[20].mxu0 %v4764_v60  ;;  %1637 = vmatprep.mubr.bf16.mxu1 %v4765_v61  ;;  %v4837_v60 = vld [vmem:[%s5037_s27 + $0x39c] ss:$24 sps:$4 sm:$0xff]  }
  0xd8   : > { %1999 = vmatprep.mubr.bf16.mxu0 %v4767_v62  ;;  %v4839_v62 = vld [vmem:[%s5037_s27 + $0x374] ss:$24 sps:$4 sm:$0xff]  }
  0xde   : > { %1638 = vmatmul.mubr.bf16.gmra.mrb[76].mxu1 %v4769_v63 }
  0xdf   : > { %2000 = vmatmul.mubr.bf16.gmra.mrb[24].mxu0 %v4770_v0  ;;  %1645 = vmatprep.mubr.bf16.mxu1 %v4771_v2  ;;  %v4841_v2 = vld [vmem:[%s5037_s27 + $0x398] ss:$24 sps:$4 sm:$0xff]  }
  0xe0   : > { %2007 = vmatprep.mubr.bf16.mxu0 %v4773_v3  ;;  %v4842_v3 = vld [vmem:[%s5037_s27 + $0x370] ss:$24 sps:$4 sm:$0xff]  }
  0xe6   : > { %1646 = vmatmul.mubr.bf16.gmra.mrb[80].mxu1 %v4775_v4 }
  0xe7   : > { %2008 = vmatmul.mubr.bf16.gmra.mrb[28].mxu0 %v4776_v5  ;;  %1653 = vmatprep.mubr.bf16.mxu1 %v4777_v6  ;;  %v4843_v5 = vld [vmem:[%s5037_s27 + $0x3cc] ss:$24 sps:$4 sm:$0xff]  }
  0xe8   : > { %2015 = vmatprep.mubr.bf16.mxu0 %v4779_v7  ;;  %v4845_v7 = vld [vmem:[%s5037_s27 + $0x3a4] ss:$24 sps:$4 sm:$0xff]  }
  0xee   : > { %1654 = vmatmul.mubr.bf16.gmra.mrb[84].mxu1 %v4781_v8 }
  0xef   : > { %2016 = vmatmul.mubr.bf16.gmra.mrb[32].mxu0 %v4782_v9  ;;  %1661 = vmatprep.mubr.bf16.mxu1 %v4783_v10  ;;  %v4847_v10 = vld [vmem:[%s5037_s27 + $0x3c8] ss:$24 sps:$4 sm:$0xff]  }
  0xf0   : > { %2023 = vmatprep.mubr.bf16.mxu0 %v4785_v11  ;;  %v4848_v11 = vld [vmem:[%s5037_s27 + $0x3a0] ss:$24 sps:$4 sm:$0xff]  }
  0xf6   : > { %1662 = vmatmul.mubr.bf16.gmra.mrb[88].mxu1 %v4787_v12 }
  0xf7   : > { %2024 = vmatmul.mubr.bf16.gmra.mrb[36].mxu0 %v4788_v13  ;;  %1669 = vmatprep.mubr.bf16.mxu1 %v4789_v14  ;;  %v4849_v13 = vld [vmem:[%s5037_s27 + $0x3fc] ss:$24 sps:$4 sm:$0xff]  }
  0xf8   : > { %2031 = vmatprep.mubr.bf16.mxu0 %v4791_v15  ;;  %v4851_v15 = vld [vmem:[%s5037_s27 + $0x3d4] ss:$24 sps:$4 sm:$0xff]  }
  0xfe   : > { %1670 = vmatmul.mubr.bf16.gmra.mrb[92].mxu1 %v4793_v16 }
  0xff   : > { %2032 = vmatmul.mubr.bf16.gmra.mrb[40].mxu0 %v4794_v17  ;;  %1677 = vmatprep.mubr.bf16.mxu1 %v4795_v18  ;;  %v4853_v18 = vld [vmem:[%s5037_s27 + $0x3f8] ss:$24 sps:$4 sm:$0xff]  }
 0x100   : > { %2039 = vmatprep.mubr.bf16.mxu0 %v4797_v19  ;;  %v4854_v19 = vld [vmem:[%s5037_s27 + $0x3d0] ss:$24 sps:$4 sm:$0xff]  }
 0x106   : > { %1678 = vmatmul.mubr.bf16.gmra.mrb[96].mxu1 %v4799_v20 }
 0x107   : > { %2040 = vmatmul.mubr.bf16.gmra.mrb[44].mxu0 %v4800_v21  ;;  %1822 = vmatprep.mubr.bf16.mxu1 %v4803_v22  ;;  %v4855_v21 = vld [vmem:[%s5037_s27 + $0x42c] ss:$24 sps:$4 sm:$0xff]  }
 0x108   : > { %2047 = vmatprep.mubr.bf16.mxu0 %v4804_v23  ;;  %v4857_v23 = vld [vmem:[%s5037_s27 + $0x404] ss:$24 sps:$4 sm:$0xff]  }
 0x10e   : > { %1823 = vmatmul.mubr.bf16.vlgmr.msra.gmra.mrb[52].mxu1 %v4801_v24 }
 0x10f   : > { %2048 = vmatmul.mubr.bf16.gmra.mrb[48].mxu0 %v4806_v25  ;;  %1830 = vmatprep.mubr.bf16.mxu1 %v4807_v26  ;;  %v4859_v26 = vld [vmem:[%s5037_s27 + $0x428] ss:$24 sps:$4 sm:$0xff]  }
 0x110   : > { %2055 = vmatprep.mubr.bf16.mxu0 %v4809_v27  ;;  %v4860_v27 = vld [vmem:[%s5037_s27 + $0x400] ss:$24 sps:$4 sm:$0xff]  }
 0x116   : > { %1831 = vmatmul.mubr.bf16.gmra.mrb[56].mxu1 %v4811_v1 }
 0x117   : > { %2056 = vmatmul.mubr.bf16.gmra.mrb[52].mxu0 %v4812_v28  ;;  %1838 = vmatprep.mubr.bf16.mxu1 %v4813_v29  ;;  %v4861_v28 = vld [vmem:[%s5037_s27 + $0x45c] ss:$24 sps:$4 sm:$0xff]  }
 0x118   : > { %2063 = vmatprep.mubr.bf16.mxu0 %v4815_v30  ;;  %v4863_v30 = vld [vmem:[%s5037_s27 + $0x434] ss:$24 sps:$4 sm:$0xff]  }
 0x119   : > { %v5331_v31 = vpop.f32.mrb[0].mxu1 }
 0x11a   : > { %v1489_v32 = vpop.f32.mrb[1].mxu1 }
 0x11b   : > { %v5335_v35 = vpop.f32.mrb[2].mxu1 }
 0x11c   : > { %v1492_v37 = vpop.f32.mrb[3].mxu1 }
 0x11e   : > { %1839 = vmatmul.mubr.bf16.gmra.mrb[60].mxu1 %v4817_v33 }
 0x11f   : > { %2064 = vmatmul.mubr.bf16.gmra.mrb[56].mxu0 %v4818_v34  ;;  %1846 = vmatprep.mubr.bf16.mxu1 %v4819_v36  ;;  %v4865_v34 = vld [vmem:[%s5037_s27 + $0x458] ss:$24 sps:$4 sm:$0xff]  }
 0x120   : > { %2071 = vmatprep.mubr.bf16.mxu0 %v4821_v38  ;;  %v4866_v36 = vld [vmem:[%s5037_s27 + $0x430] ss:$24 sps:$4 sm:$0xff]   ;;  %v4867_v38 = vld [vmem:[%s5037_s27 + $0x48c] ss:$24 sps:$4 sm:$0xff]  }
 0x121   : > { %v5339_v39 = vpop.f32.mrb[4].mxu1 }
 0x122   : > { %v1497_v40 = vpop.f32.mrb[5].mxu1 }
 0x123   : > { %v5343_v43 = vpop.f32.mrb[6].mxu1 }
 0x124   : > { %v1500_v45 = vpop.f32.mrb[7].mxu1 }
 0x125   : > { %v4871_v45 = vld [vmem:[%s5037_s27 + $0x488] ss:$24 sps:$4 sm:$0xff]  }
 0x126   : > { %1847 = vmatmul.mubr.bf16.gmra.mrb[64].mxu1 %v4823_v41  ;;  %v4869_v41 = vld [vmem:[%s5037_s27 + $0x464] ss:$24 sps:$4 sm:$0xff]  }
 0x127   : > { %2072 = vmatmul.mubr.bf16.gmra.mrb[60].mxu0 %v4824_v42  ;;  %1854 = vmatprep.mubr.bf16.mxu1 %v4825_v44 }
 0x128   : > { %2079 = vmatprep.mubr.bf16.mxu0 %v4827_v46  ;;  %v4872_v46 = vld [vmem:[%s5037_s27 + $0x460] ss:$24 sps:$4 sm:$0xff]  }
 0x129   : > { %v5347_v47 = vpop.f32.mrb[8].mxu1 }
 0x12a   : > { %v1505_v48 = vpop.f32.mrb[9].mxu1 }
 0x12b   : > { %v5351_v51 = vpop.f32.mrb[10].mxu1 }
 0x12c   : > { %v1508_v53 = vpop.f32.mrb[11].mxu1 }
 0x12e   : > { %1855 = vmatmul.mubr.bf16.gmra.mrb[68].mxu1 %v4829_v49 }
 0x12f   : > { %2080 = vmatmul.mubr.bf16.gmra.mrb[64].mxu0 %v4830_v50  ;;  %1862 = vmatprep.mubr.bf16.mxu1 %v4831_v52  ;;  %v4873_v50 = vld [vmem:[%s5037_s27 + $0x494] ss:$24 sps:$4 sm:$0xff]  }
 0x130   : > { %2087 = vmatprep.mubr.bf16.mxu0 %v4833_v54  ;;  %v4875_v54 = vld [vmem:[%s5037_s27 + $0x490] ss:$24 sps:$4 sm:$0xff]   ;;  %s2152_s27 = smul.u32 400, %s4939_s13 }
 0x131   : > { %v5355_v55 = vpop.f32.mrb[12].mxu1 }
 0x132   : > { %v1513_v56 = vpop.f32.mrb[13].mxu1  ;;  %s5433_s19 = scalar_lea.vmem [#allocation2], %s2152_s27 }
 0x133   : > { %v5359_v59 = vpop.f32.mrb[14].mxu1 }
 0x134   : > { %v1516_v61 = vpop.f32.mrb[15].mxu1 }
 0x136   : > { %1863 = vmatmul.mubr.bf16.gmra.mrb[72].mxu1 %v4835_v57 }
 0x137   : > { %2088 = vmatmul.mubr.bf16.gmra.mrb[68].mxu0 %v4836_v58  ;;  %1870 = vmatprep.mubr.bf16.mxu1 %v4837_v60 }
 0x138   : > { %2095 = vmatprep.mubr.bf16.mxu0 %v4839_v62 }
 0x139   : > { %v5363_v63 = vpop.f32.mrb[16].mxu1 }
 0x13a   : > { %v1521_v0 = vpop.f32.mrb[17].mxu1 }
 0x13b   : > { %v5367_v4 = vpop.f32.mrb[18].mxu1 }
 0x13c   : > { %v1524_v6 = vpop.f32.mrb[19].mxu1 }
 0x13d   : > { %v5426_v6 = vld [vmem:[%s6585_s2] ss:$0 sm:$0xff] }
 0x13e   : > { %1871 = vmatmul.mubr.bf16.gmra.mrb[76].mxu1 %v4841_v2 }
 0x13f   : > { %2096 = vmatmul.mubr.bf16.gmra.mrb[72].mxu0 %v4842_v3  ;;  %1878 = vmatprep.mubr.bf16.mxu1 %v4843_v5 }
 0x140   : > { %2103 = vmatprep.mubr.bf16.mxu0 %v4845_v7  ;;  %v1488_v7 = vadd.f32 %v5426_v6, %v5331_v31  ;;  %v1496_v31 = vadd.f32 %v5426_v6, %v5339_v39  ;;  %v1507_v39 = vadd.f32 %v5426_v6, %v5351_v51 }
 0x141   : > { %v5371_v8 = vpop.f32.mrb[20].mxu1 }
 0x142   : > { %v1529_v9 = vpop.f32.mrb[21].mxu1 }
 0x143   : > { %v5375_v12 = vpop.f32.mrb[22].mxu1 }
 0x144   : > { %v1532_v14 = vpop.f32.mrb[23].mxu1 }
 0x146   : > { %1879 = vmatmul.mubr.bf16.gmra.mrb[80].mxu1 %v4847_v10  ;;  %v1491_v10 = vadd.f32 %v5426_v6, %v5335_v35  ;;  %v1499_v35 = vadd.f32 %v5426_v6, %v5343_v43 }
 0x147   : > { %2104 = vmatmul.mubr.bf16.gmra.mrb[76].mxu0 %v4848_v11  ;;  %1886 = vmatprep.mubr.bf16.mxu1 %v4849_v13 }
 0x148   : > { %2111 = vmatprep.mubr.bf16.mxu0 %v4851_v15 }
 0x149   : > { %v5379_v16 = vpop.f32.mrb[24].mxu1 }
 0x14a   : > { %v1537_v17 = vpop.f32.mrb[25].mxu1 }
 0x14b   : > { %v5383_v20 = vpop.f32.mrb[26].mxu1 }
 0x14c   : > { %v1540_v22 = vpop.f32.mrb[27].mxu1 }
 0x14e   : > { %1887 = vmatmul.mubr.bf16.gmra.mrb[84].mxu1 %v4853_v18 }
 0x14f   : > { %2112 = vmatmul.mubr.bf16.gmra.mrb[80].mxu0 %v4854_v19  ;;  %1894 = vmatprep.mubr.bf16.mxu1 %v4855_v21 }
 0x150   : > { %2119 = vmatprep.mubr.bf16.mxu0 %v4857_v23 }
 0x151   : > { %v5387_v24 = vpop.f32.mrb[28].mxu1 }
 0x152   : > { %v1545_v25 = vpop.f32.mrb[29].mxu1 }
 0x153   : > { %v5391_v1 = vpop.f32.mrb[30].mxu1 }
 0x154   : > { %v1548_v29 = vpop.f32.mrb[31].mxu1 }
 0x156   : > { %1895 = vmatmul.mubr.bf16.gmra.mrb[88].mxu1 %v4859_v26  ;;  %v1504_v26 = vadd.f32 %v5426_v6, %v5347_v47  ;;  %v1515_v47 = vadd.f32 %v5426_v6, %v5359_v59 }
 0x157   : > { %2120 = vmatmul.mubr.bf16.gmra.mrb[84].mxu0 %v4860_v27  ;;  %1902 = vmatprep.mubr.bf16.mxu1 %v4861_v28 }
 0x158   : > { %2127 = vmatprep.mubr.bf16.mxu0 %v4863_v30 }
 0x159   : > { %v5395_v32 = vpop.f32.mrb[32].mxu1 }
 0x15a   : > { %v1553_v33 = vpop.f32.mrb[33].mxu1 }
 0x15b   : > { %v5399_v37 = vpop.f32.mrb[34].mxu1 }
 0x15c   : > { %v1556_v40 = vpop.f32.mrb[35].mxu1 }
 0x15e   : > { %1903 = vmatmul.mubr.bf16.gmra.mrb[92].mxu1 %v4865_v34  ;;  %v1512_v34 = vadd.f32 %v5426_v6, %v5355_v55  ;;  %v1523_v55 = vadd.f32 %v5426_v6, %v5367_v4 }
 0x15f   : > { %2128 = vmatmul.mubr.bf16.gmra.mrb[88].mxu0 %v4866_v36  ;;  %1910 = vmatprep.mubr.bf16.mxu1 %v4867_v38 }
 0x160   : > { %2135 = vmatprep.mubr.bf16.mxu0 %v4869_v41 }
 0x161   : > { %v5403_v42 = vpop.f32.mrb[36].mxu1 }
 0x162   : > { %v1561_v44 = vpop.f32.mrb[37].mxu1 }
 0x163   : > { %v5407_v48 = vpop.f32.mrb[38].mxu1 }
 0x164   : > { %v1564_v49 = vpop.f32.mrb[39].mxu1 }
 0x166   : > { %1911 = vmatmul.mubr.bf16.gmra.mrb[96].mxu1 %v4871_v45  ;;  %v1520_v45 = vadd.f32 %v5426_v6, %v5363_v63  ;;  %v1531_v63 = vadd.f32 %v5426_v6, %v5375_v12 }
 0x167   : > { %2136 = vmatmul.mubr.bf16.gmra.mrb[92].mxu0 %v4872_v46 }
 0x168   : > { %2143 = vmatprep.mubr.bf16.mxu0 %v4873_v50 }
 0x169   : > { %v5410_v52 = vpop.f32.mrb[40].mxu1 }
 0x16a   : > { %v1569_v53 = vpop.f32.mrb[41].mxu1 }
 0x16b   : > { %v5413_v56 = vpop.f32.mrb[42].mxu1 }
 0x16c   : > { %v1572_v57 = vpop.f32.mrb[43].mxu1 }
 0x16d   : > { %v1528_v57 = vadd.f32 %v5426_v6, %v5371_v8  ;;  %v1539_v8 = vadd.f32 %v5426_v6, %v5383_v20 }
 0x16f   : > { %2144 = vmatmul.mubr.bf16.gmra.mrb[96].mxu0 %v4875_v54 }
 0x171   : > { %v5415_v58 = vpop.f32.mrb[44].mxu1 }
 0x172   : > { %v1577_v60 = vpop.f32.mrb[45].mxu1 }
 0x173   : > { %v5417_v61 = vpop.f32.mrb[46].mxu1 }
 0x174   : > { %v1580_v62 = vpop.f32.mrb[47].mxu1 }
 0x179   : > { %v5419_v0 = vpop.f32.mrb[48].mxu1 }
 0x17a   : > { %v1585_v2 = vpop.f32.mrb[49].mxu1 }
 0x17b   : > { %v5421_v3 = vpop.f32.mrb[50].mxu1 }
 0x17c   : > { %v1588_v5 = vpop.f32.mrb[51].mxu1 }
 0x182   : > { %v1953_v9 = vpop.f32.mrb[0].mxu0 }
 0x183   : > { %v4394_v11 = vadd.f32 %v1953_v9, %v1488_v7  ;;  %v1955_v13 = vpop.f32.mrb[1].mxu0  ;;  %v1536_v9 = vadd.f32 %v5426_v6, %v5379_v16  ;;  %v1547_v16 = vadd.f32 %v5426_v6, %v5391_v1 }
 0x184   : > { %v1956_v14 = vpop.f32.mrb[2].mxu0 }
 0x185   : > { %2154 = vst [vmem:[%s5433_s19] sm:$0xff] %v4394_v11  ;;  %v4396_v15 = vadd.f32 %v1956_v14, %v1491_v10  ;;  %v1958_v17 = vpop.f32.mrb[3].mxu0 }
 0x186   : > { %v1544_v17 = vadd.f32 %v5426_v6, %v5387_v24  ;;  %v1555_v24 = vadd.f32 %v5426_v6, %v5399_v37 }
 0x187   : > { %2155 = vst [vmem:[%s5433_s19 + $0x8] sm:$0xff] %v4396_v15 }
 0x18a   : > { %v1961_v18 = vpop.f32.mrb[4].mxu0 }
 0x18b   : > { %v4398_v19 = vadd.f32 %v1961_v18, %v1496_v31  ;;  %v1963_v21 = vpop.f32.mrb[5].mxu0 }
 0x18c   : > { %v1964_v22 = vpop.f32.mrb[6].mxu0 }
 0x18d   : > { %2156 = vst [vmem:[%s5433_s19 + $0x10] sm:$0xff] %v4398_v19  ;;  %v4400_v23 = vadd.f32 %v1964_v22, %v1499_v35  ;;  %v1966_v25 = vpop.f32.mrb[7].mxu0  ;;  %v1552_v22 = vadd.f32 %v5426_v6, %v5395_v32  ;;  %v1563_v32 = vadd.f32 %v5426_v6, %v5407_v48 }
 0x18f   : > { %2157 = vst [vmem:[%s5433_s19 + $0x18] sm:$0xff] %v4400_v23 }
 0x192   : > { %v1969_v27 = vpop.f32.mrb[8].mxu0 }
 0x193   : > { %v4402_v28 = vadd.f32 %v1969_v27, %v1504_v26  ;;  %v1971_v29 = vpop.f32.mrb[9].mxu0 }
 0x194   : > { %v1972_v43 = vpop.f32.mrb[10].mxu0 }
 0x195   : > { %2158 = vst [vmem:[%s5433_s19 + $0x20] sm:$0xff] %v4402_v28  ;;  %v4404_v30 = vadd.f32 %v1972_v43, %v1507_v39  ;;  %v1974_v33 = vpop.f32.mrb[11].mxu0  ;;  %v1560_v28 = vadd.f32 %v5426_v6, %v5403_v42  ;;  %v1571_v42 = vadd.f32 %v5426_v6, %v5413_v56 }
 0x197   : > { %2159 = vst [vmem:[%s5433_s19 + $0x28] sm:$0xff] %v4404_v30 }
 0x19a   : > { %v1977_v36 = vpop.f32.mrb[12].mxu0 }
 0x19b   : > { %v4406_v38 = vadd.f32 %v1977_v36, %v1512_v34  ;;  %v1979_v40 = vpop.f32.mrb[13].mxu0  ;;  %v1568_v36 = vadd.f32 %v5426_v6, %v5410_v52  ;;  %v1579_v52 = vadd.f32 %v5426_v6, %v5417_v61 }
 0x19c   : > { %v1980_v51 = vpop.f32.mrb[14].mxu0 }
 0x19d   : > { %2160 = vst [vmem:[%s5433_s19 + $0x30] sm:$0xff] %v4406_v38  ;;  %v4408_v41 = vadd.f32 %v1980_v51, %v1515_v47  ;;  %v1982_v44 = vpop.f32.mrb[15].mxu0 }
 0x19e   : > { %v1576_v44 = vadd.f32 %v5426_v6, %v5415_v58  ;;  %v1587_v58 = vadd.f32 %v5426_v6, %v5421_v3 }
 0x19f   : > { %2161 = vst [vmem:[%s5433_s19 + $0x38] sm:$0xff] %v4408_v41 }
 0x1a2   : > { %v1985_v46 = vpop.f32.mrb[16].mxu0 }
 0x1a3   : > { %v4410_v49 = vadd.f32 %v1985_v46, %v1520_v45  ;;  %v1987_v50 = vpop.f32.mrb[17].mxu0 }
 0x1a4   : > { %v1988_v59 = vpop.f32.mrb[18].mxu0 }
 0x1a5   : > { %2162 = vst [vmem:[%s5433_s19 + $0x40] sm:$0xff] %v4410_v49  ;;  %v4412_v53 = vadd.f32 %v1988_v59, %v1523_v55  ;;  %v1990_v54 = vpop.f32.mrb[19].mxu0  ;;  %v1584_v59 = vadd.f32 %v5426_v6, %v5419_v0 }
 0x1a7   : > { %2163 = vst [vmem:[%s5433_s19 + $0x48] sm:$0xff] %v4412_v53 }
 0x1aa   : > { %v1993_v60 = vpop.f32.mrb[20].mxu0 }
 0x1ab   : > { %v4414_v62 = vadd.f32 %v1993_v60, %v1528_v57  ;;  %v1995_v2 = vpop.f32.mrb[21].mxu0 }
 0x1ac   : > { %v1996_v4 = vpop.f32.mrb[22].mxu0 }
 0x1ad   : > { %2164 = vst [vmem:[%s5433_s19 + $0x50] sm:$0xff] %v4414_v62  ;;  %v4416_v5 = vadd.f32 %v1996_v4, %v1531_v63  ;;  %v1998_v7 = vpop.f32.mrb[23].mxu0 }
 0x1af   : > { %2165 = vst [vmem:[%s5433_s19 + $0x58] sm:$0xff] %v4416_v5 }
 0x1b2   : > { %v2001_v10 = vpop.f32.mrb[24].mxu0 }
 0x1b3   : > { %v4418_v11 = vadd.f32 %v2001_v10, %v1536_v9  ;;  %v2003_v13 = vpop.f32.mrb[25].mxu0 }
 0x1b4   : > { %v2004_v12 = vpop.f32.mrb[26].mxu0 }
 0x1b5   : > { %2166 = vst [vmem:[%s5433_s19 + $0x60] sm:$0xff] %v4418_v11  ;;  %v4420_v14 = vadd.f32 %v2004_v12, %v1539_v8  ;;  %v2006_v15 = vpop.f32.mrb[27].mxu0 }
 0x1b7   : > { %2167 = vst [vmem:[%s5433_s19 + $0x68] sm:$0xff] %v4420_v14 }
 0x1ba   : > { %v2009_v31 = vpop.f32.mrb[28].mxu0 }
 0x1bb   : > { %v4422_v18 = vadd.f32 %v2009_v31, %v1544_v17  ;;  %v2011_v35 = vpop.f32.mrb[29].mxu0 }
 0x1bc   : > { %v2012_v20 = vpop.f32.mrb[30].mxu0 }
 0x1bd   : > { %2168 = vst [vmem:[%s5433_s19 + $0x70] sm:$0xff] %v4422_v18  ;;  %v4424_v19 = vadd.f32 %v2012_v20, %v1547_v16  ;;  %v2014_v21 = vpop.f32.mrb[31].mxu0 }
 0x1bf   : > { %2169 = vst [vmem:[%s5433_s19 + $0x78] sm:$0xff] %v4424_v19 }
 0x1c2   : > { %v2017_v23 = vpop.f32.mrb[32].mxu0 }
 0x1c3   : > { %v4426_v25 = vadd.f32 %v2017_v23, %v1552_v22  ;;  %v2019_v26 = vpop.f32.mrb[33].mxu0 }
 0x1c4   : > { %v2020_v1 = vpop.f32.mrb[34].mxu0 }
 0x1c5   : > { %2170 = vst [vmem:[%s5433_s19 + $0x80] sm:$0xff] %v4426_v25  ;;  %v4428_v27 = vadd.f32 %v2020_v1, %v1555_v24  ;;  %v2022_v39 = vpop.f32.mrb[35].mxu0 }
 0x1c7   : > { %2171 = vst [vmem:[%s5433_s19 + $0x88] sm:$0xff] %v4428_v27 }
 0x1ca   : > { %v2025_v29 = vpop.f32.mrb[36].mxu0 }
 0x1cb   : > { %v4430_v43 = vadd.f32 %v2025_v29, %v1560_v28  ;;  %v2027_v30 = vpop.f32.mrb[37].mxu0 }
 0x1cc   : > { %v2028_v37 = vpop.f32.mrb[38].mxu0 }
 0x1cd   : > { %2172 = vst [vmem:[%s5433_s19 + $0x90] sm:$0xff] %v4430_v43  ;;  %v4432_v33 = vadd.f32 %v2028_v37, %v1563_v32  ;;  %v2030_v34 = vpop.f32.mrb[39].mxu0 }
 0x1cf   : > { %2173 = vst [vmem:[%s5433_s19 + $0x98] sm:$0xff] %v4432_v33 }
 0x1d2   : > { %v2033_v47 = vpop.f32.mrb[40].mxu0 }
 0x1d3   : > { %v4434_v38 = vadd.f32 %v2033_v47, %v1568_v36  ;;  %v2035_v40 = vpop.f32.mrb[41].mxu0 }
 0x1d4   : > { %v2036_v48 = vpop.f32.mrb[42].mxu0 }
 0x1d5   : > { %2174 = vst [vmem:[%s5433_s19 + $0xa0] sm:$0xff] %v4434_v38  ;;  %v4436_v51 = vadd.f32 %v2036_v48, %v1571_v42  ;;  %v2038_v41 = vpop.f32.mrb[43].mxu0 }
 0x1d7   : > { %2175 = vst [vmem:[%s5433_s19 + $0xa8] sm:$0xff] %v4436_v51 }
 0x1da   : > { %v2041_v45 = vpop.f32.mrb[44].mxu0 }
 0x1db   : > { %v4438_v46 = vadd.f32 %v2041_v45, %v1576_v44  ;;  %v2043_v55 = vpop.f32.mrb[45].mxu0 }
 0x1dc   : > { %v2044_v49 = vpop.f32.mrb[46].mxu0 }
 0x1dd   : > { %2176 = vst [vmem:[%s5433_s19 + $0xb0] sm:$0xff] %v4438_v46  ;;  %v4440_v56 = vadd.f32 %v2044_v49, %v1579_v52  ;;  %v2046_v50 = vpop.f32.mrb[47].mxu0 }
 0x1df   : > { %2177 = vst [vmem:[%s5433_s19 + $0xb8] sm:$0xff] %v4440_v56 }
 0x1e1   : > { %v1824_v53 = vpop.f32.mrb[52].mxu1 }
 0x1e2   : > { %v2049_v54 = vpop.f32.mrb[48].mxu0  ;;  %v1826_v57 = vpop.f32.mrb[53].mxu1  ;;  %v4445_v7 = vadd.f32 %v5426_v6, %v1824_v53 }
 0x1e3   : > { %v4442_v60 = vadd.f32 %v2049_v54, %v1584_v59  ;;  %v2051_v61 = vpop.f32.mrb[49].mxu0  ;;  %v1827_v63 = vpop.f32.mrb[54].mxu1 }
 0x1e4   : > { %v2052_v62 = vpop.f32.mrb[50].mxu0  ;;  %v1829_v2 = vpop.f32.mrb[55].mxu1  ;;  %v4447_v8 = vadd.f32 %v5426_v6, %v1827_v63 }
 0x1e5   : > { %2178 = vst [vmem:[%s5433_s19 + $0xc0] sm:$0xff] %v4442_v60  ;;  %v4444_v4 = vadd.f32 %v2052_v62, %v1587_v58  ;;  %v2054_v5 = vpop.f32.mrb[51].mxu0 }
 0x1e7   : > { %2179 = vst [vmem:[%s5433_s19 + $0xc8] sm:$0xff] %v4444_v4 }
 0x1e9   : > { %v1832_v0 = vpop.f32.mrb[56].mxu1 }
 0x1ea   : > { %v2057_v9 = vpop.f32.mrb[52].mxu0  ;;  %v1834_v10 = vpop.f32.mrb[57].mxu1  ;;  %v4449_v31 = vadd.f32 %v5426_v6, %v1832_v0 }
 0x1eb   : > { %v4446_v11 = vadd.f32 %v4445_v7, %v2057_v9  ;;  %v2059_v3 = vpop.f32.mrb[53].mxu0  ;;  %v1835_v13 = vpop.f32.mrb[58].mxu1 }
 0x1ec   : > { %v2060_v12 = vpop.f32.mrb[54].mxu0  ;;  %v1837_v14 = vpop.f32.mrb[59].mxu1  ;;  %v4451_v20 = vadd.f32 %v5426_v6, %v1835_v13 }
 0x1ed   : > { %2180 = vst [vmem:[%s5433_s19 + $0xd0] sm:$0xff] %v4446_v11  ;;  %v4448_v15 = vadd.f32 %v4447_v8, %v2060_v12  ;;  %v2062_v17 = vpop.f32.mrb[55].mxu0 }
 0x1ef   : > { %2181 = vst [vmem:[%s5433_s19 + $0xd8] sm:$0xff] %v4448_v15 }
 0x1f1   : > { %v1840_v16 = vpop.f32.mrb[60].mxu1 }
 0x1f2   : > { %v2065_v18 = vpop.f32.mrb[56].mxu0  ;;  %v1842_v35 = vpop.f32.mrb[61].mxu1  ;;  %v4453_v1 = vadd.f32 %v5426_v6, %v1840_v16 }
 0x1f3   : > { %v4450_v19 = vadd.f32 %v4449_v31, %v2065_v18  ;;  %v2067_v21 = vpop.f32.mrb[57].mxu0  ;;  %v1843_v22 = vpop.f32.mrb[62].mxu1 }
 0x1f4   : > { %v2068_v23 = vpop.f32.mrb[58].mxu0  ;;  %v1845_v24 = vpop.f32.mrb[63].mxu1  ;;  %v4455_v29 = vadd.f32 %v5426_v6, %v1843_v22 }
 0x1f5   : > { %2182 = vst [vmem:[%s5433_s19 + $0xe0] sm:$0xff] %v4450_v19  ;;  %v4452_v25 = vadd.f32 %v4451_v20, %v2068_v23  ;;  %v2070_v26 = vpop.f32.mrb[59].mxu0 }
 0x1f7   : > { %2183 = vst [vmem:[%s5433_s19 + $0xe8] sm:$0xff] %v4452_v25 }
 0x1f9   : > { %v1848_v27 = vpop.f32.mrb[64].mxu1 }
 0x1fa   : > { %v2073_v39 = vpop.f32.mrb[60].mxu0  ;;  %v1850_v28 = vpop.f32.mrb[65].mxu1  ;;  %v4457_v47 = vadd.f32 %v5426_v6, %v1848_v27 }
 0x1fb   : > { %v4454_v32 = vadd.f32 %v4453_v1, %v2073_v39  ;;  %v2075_v43 = vpop.f32.mrb[61].mxu0  ;;  %v1851_v30 = vpop.f32.mrb[66].mxu1 }
 0x1fc   : > { %v2076_v37 = vpop.f32.mrb[62].mxu0  ;;  %v1853_v33 = vpop.f32.mrb[67].mxu1  ;;  %v4459_v48 = vadd.f32 %v5426_v6, %v1851_v30 }
 0x1fd   : > { %2184 = vst [vmem:[%s5433_s19 + $0xf0] sm:$0xff] %v4454_v32  ;;  %v4456_v34 = vadd.f32 %v4455_v29, %v2076_v37  ;;  %v2078_v36 = vpop.f32.mrb[63].mxu0 }
 0x1ff   : > { %2185 = vst [vmem:[%s5433_s19 + $0xf8] sm:$0xff] %v4456_v34 }
 0x201   : > { %v1856_v42 = vpop.f32.mrb[68].mxu1 }
 0x202   : > { %v2081_v38 = vpop.f32.mrb[64].mxu0  ;;  %v1858_v40 = vpop.f32.mrb[69].mxu1  ;;  %v4461_v49 = vadd.f32 %v5426_v6, %v1856_v42 }
 0x203   : > { %v4458_v51 = vadd.f32 %v4457_v47, %v2081_v38  ;;  %v2083_v41 = vpop.f32.mrb[65].mxu0  ;;  %v1859_v44 = vpop.f32.mrb[70].mxu1 }
 0x204   : > { %v2084_v45 = vpop.f32.mrb[66].mxu0  ;;  %v1861_v52 = vpop.f32.mrb[71].mxu1  ;;  %v4463_v53 = vadd.f32 %v5426_v6, %v1859_v44 }
 0x205   : > { %2186 = vst [vmem:[%s5433_s19 + $0x100] sm:$0xff] %v4458_v51  ;;  %v4460_v46 = vadd.f32 %v4459_v48, %v2084_v45  ;;  %v2086_v55 = vpop.f32.mrb[67].mxu0 }
 0x207   : > { %2187 = vst [vmem:[%s5433_s19 + $0x108] sm:$0xff] %v4460_v46 }
 0x209   : > { %v1864_v56 = vpop.f32.mrb[72].mxu1 }
 0x20a   : > { %v2089_v50 = vpop.f32.mrb[68].mxu0  ;;  %v1866_v59 = vpop.f32.mrb[73].mxu1  ;;  %v4465_v2 = vadd.f32 %v5426_v6, %v1864_v56 }
 0x20b   : > { %v4462_v54 = vadd.f32 %v4461_v49, %v2089_v50  ;;  %v2091_v57 = vpop.f32.mrb[69].mxu0  ;;  %v1867_v58 = vpop.f32.mrb[74].mxu1 }
 0x20c   : > { %v2092_v60 = vpop.f32.mrb[70].mxu0  ;;  %v1869_v61 = vpop.f32.mrb[75].mxu1  ;;  %v4467_v0 = vadd.f32 %v5426_v6, %v1867_v58 }
 0x20d   : > { %2188 = vst [vmem:[%s5433_s19 + $0x110] sm:$0xff] %v4462_v54  ;;  %v4464_v63 = vadd.f32 %v4463_v53, %v2092_v60  ;;  %v2094_v62 = vpop.f32.mrb[71].mxu0 }
 0x20f   : > { %2189 = vst [vmem:[%s5433_s19 + $0x118] sm:$0xff] %v4464_v63 }
 0x211   : > { %v1872_v4 = vpop.f32.mrb[76].mxu1 }
 0x212   : > { %v2097_v5 = vpop.f32.mrb[72].mxu0  ;;  %v1874_v7 = vpop.f32.mrb[77].mxu1  ;;  %v4469_v14 = vadd.f32 %v5426_v6, %v1872_v4 }
 0x213   : > { %v4466_v9 = vadd.f32 %v4465_v2, %v2097_v5  ;;  %v2099_v10 = vpop.f32.mrb[73].mxu0  ;;  %v1875_v8 = vpop.f32.mrb[78].mxu1 }
 0x214   : > { %v2100_v11 = vpop.f32.mrb[74].mxu0  ;;  %v1877_v3 = vpop.f32.mrb[79].mxu1  ;;  %v4471_v16 = vadd.f32 %v5426_v6, %v1875_v8 }
 0x215   : > { %2190 = vst [vmem:[%s5433_s19 + $0x120] sm:$0xff] %v4466_v9  ;;  %v4468_v13 = vadd.f32 %v4467_v0, %v2100_v11  ;;  %v2102_v12 = vpop.f32.mrb[75].mxu0 }
 0x217   : > { %2191 = vst [vmem:[%s5433_s19 + $0x128] sm:$0xff] %v4468_v13 }
 0x219   : > { %v1880_v15 = vpop.f32.mrb[80].mxu1 }
 0x21a   : > { %v2105_v17 = vpop.f32.mrb[76].mxu0  ;;  %v1882_v31 = vpop.f32.mrb[81].mxu1  ;;  %v4473_v24 = vadd.f32 %v5426_v6, %v1880_v15 }
 0x21b   : > { %v4470_v18 = vadd.f32 %v4469_v14, %v2105_v17  ;;  %v2107_v35 = vpop.f32.mrb[77].mxu0  ;;  %v1883_v20 = vpop.f32.mrb[82].mxu1 }
 0x21c   : > { %v2108_v19 = vpop.f32.mrb[78].mxu0  ;;  %v1885_v21 = vpop.f32.mrb[83].mxu1  ;;  %v4475_v27 = vadd.f32 %v5426_v6, %v1883_v20 }
 0x21d   : > { %2192 = vst [vmem:[%s5433_s19 + $0x130] sm:$0xff] %v4470_v18  ;;  %v4472_v22 = vadd.f32 %v4471_v16, %v2108_v19  ;;  %v2110_v23 = vpop.f32.mrb[79].mxu0 }
 0x21f   : > { %2193 = vst [vmem:[%s5433_s19 + $0x138] sm:$0xff] %v4472_v22 }
 0x221   : > { %v1888_v25 = vpop.f32.mrb[84].mxu1 }
 0x222   : > { %v2113_v26 = vpop.f32.mrb[80].mxu0  ;;  %v1890_v1 = vpop.f32.mrb[85].mxu1  ;;  %v4477_v33 = vadd.f32 %v5426_v6, %v1888_v25 }
 0x223   : > { %v4474_v39 = vadd.f32 %v4473_v24, %v2113_v26  ;;  %v2115_v28 = vpop.f32.mrb[81].mxu0  ;;  %v1891_v29 = vpop.f32.mrb[86].mxu1 }
 0x224   : > { %v2116_v32 = vpop.f32.mrb[82].mxu0  ;;  %v1893_v43 = vpop.f32.mrb[87].mxu1  ;;  %v4479_v42 = vadd.f32 %v5426_v6, %v1891_v29 }
 0x225   : > { %2194 = vst [vmem:[%s5433_s19 + $0x140] sm:$0xff] %v4474_v39  ;;  %v4476_v30 = vadd.f32 %v4475_v27, %v2116_v32  ;;  %v2118_v37 = vpop.f32.mrb[83].mxu0 }
 0x227   : > { %2195 = vst [vmem:[%s5433_s19 + $0x148] sm:$0xff] %v4476_v30 }
 0x229   : > { %v1896_v34 = vpop.f32.mrb[88].mxu1 }
 0x22a   : > { %v2121_v36 = vpop.f32.mrb[84].mxu0  ;;  %v1898_v47 = vpop.f32.mrb[89].mxu1  ;;  %v4481_v52 = vadd.f32 %v5426_v6, %v1896_v34 }
 0x22b   : > { %v4478_v38 = vadd.f32 %v4477_v33, %v2121_v36  ;;  %v2123_v40 = vpop.f32.mrb[85].mxu0  ;;  %v1899_v48 = vpop.f32.mrb[90].mxu1 }
 0x22c   : > { %v2124_v51 = vpop.f32.mrb[86].mxu0  ;;  %v1901_v41 = vpop.f32.mrb[91].mxu1  ;;  %v4483_v56 = vadd.f32 %v5426_v6, %v1899_v48 }
 0x22d   : > { %2196 = vst [vmem:[%s5433_s19 + $0x150] sm:$0xff] %v4478_v38  ;;  %v4480_v44 = vadd.f32 %v4479_v42, %v2124_v51  ;;  %v2126_v45 = vpop.f32.mrb[87].mxu0 }
 0x22f   : > { %2197 = vst [vmem:[%s5433_s19 + $0x158] sm:$0xff] %v4480_v44 }
 0x231   : > { %v1904_v46 = vpop.f32.mrb[92].mxu1 }
 0x232   : > { %v2129_v55 = vpop.f32.mrb[88].mxu0  ;;  %v1906_v49 = vpop.f32.mrb[93].mxu1  ;;  %v4485_v61 = vadd.f32 %v5426_v6, %v1904_v46 }
 0x233   : > { %v4482_v50 = vadd.f32 %v4481_v52, %v2129_v55  ;;  %v2131_v59 = vpop.f32.mrb[89].mxu0  ;;  %v1907_v53 = vpop.f32.mrb[94].mxu1 }
 0x234   : > { %v2132_v54 = vpop.f32.mrb[90].mxu0  ;;  %v1909_v57 = vpop.f32.mrb[95].mxu1  ;;  %v4487_v4 = vadd.f32 %v5426_v6, %v1907_v53 }
 0x235   : > { %2198 = vst [vmem:[%s5433_s19 + $0x160] sm:$0xff] %v4482_v50  ;;  %v4484_v58 = vadd.f32 %v4483_v56, %v2132_v54  ;;  %v2134_v60 = vpop.f32.mrb[91].mxu0 }
 0x237   : > { %2199 = vst [vmem:[%s5433_s19 + $0x168] sm:$0xff] %v4484_v58 }
 0x239   : > { %v1912_v63 = vpop.f32.mrb[96].mxu1 }
 0x23a   : > { %v2137_v62 = vpop.f32.mrb[92].mxu0  ;;  %v1914_v2 = vpop.f32.mrb[97].mxu1  ;;  %v4489_v3 = vadd.f32 %v5426_v6, %v1912_v63 }
 0x23b   : > { %v4486_v5 = vadd.f32 %v4485_v61, %v2137_v62  ;;  %v2139_v7 = vpop.f32.mrb[93].mxu0  ;;  %v1915_v0 = vpop.f32.mrb[98].mxu1 }
 0x23c   : > { %v2140_v9 = vpop.f32.mrb[94].mxu0  ;;  %v1917_v10 = vpop.f32.mrb[99].mxu1  ;;  %v4491_v12 = vadd.f32 %v5426_v6, %v1915_v0 }
 0x23d   : > { %2200 = vst [vmem:[%s5433_s19 + $0x170] sm:$0xff] %v4486_v5  ;;  %v4488_v8 = vadd.f32 %v4487_v4, %v2140_v9  ;;  %v2142_v11 = vpop.f32.mrb[95].mxu0 }
 0x23f   : > { %2201 = vst [vmem:[%s5433_s19 + $0x178] sm:$0xff] %v4488_v8 }
 0x241   : > { %2207 = sbr.rel (%p3859_p4) target bundleno = 964 (0x3c4), region = 36 }
 0x242   : > { %v2145_v13 = vpop.f32.mrb[96].mxu0 }
 0x243   : > { %v4490_v14 = vadd.f32 %v4489_v3, %v2145_v13  ;;  %v2147_v15 = vpop.f32.mrb[97].mxu0 }
 0x244   : > { %v2148_v17 = vpop.f32.mrb[98].mxu0 }
 0x245   : > { %2202 = vst [vmem:[%s5433_s19 + $0x180] sm:$0xff] %v4490_v14  ;;  %v4492_v31 = vadd.f32 %v4491_v12, %v2148_v17  ;;  %v2150_v16 = vpop.f32.mrb[99].mxu0 }
 0x247   : > { %2203 = vst [vmem:[%s5433_s19 + $0x188] sm:$0xff] %v4492_v31 }
 0x24e   : > { %v5558_v18 = vld [vmem:[#allocation2] sm:$0xff]  ;;  %v5560_v35 = vld [vmem:[#allocation2 + $0x8] sm:$0xff]  ;;  %v5562_v20 = vld [vmem:[#allocation2 + $0x10] sm:$0xff] }
 0x24f   : > { %v5564_v19 = vld [vmem:[#allocation2 + $0x18] sm:$0xff]  ;;  %v2308_v6 = vadd.f32 %v5560_v35, %v5558_v18  ;;  %v2413_v21 = vmul.f32 %v5558_v18, %v5558_v18  ;;  %v2414_v22 = vmul.f32 %v5560_v35, %v5560_v35  ;;  %v2415_v23 = vmul.f32 %v5562_v20, %v5562_v20  ;;  %v5574_v24 = vld [vmem:[#allocation2 + $0x20] sm:$0xff]  ;;  %v5579_v27 = vld [vmem:[#allocation2 + $0x28] sm:$0xff] }
 0x250   : > { %v2416_v26 = vmul.f32 %v5564_v19, %v5564_v19  ;;  %v2417_v28 = vmul.f32 %v5574_v24, %v5574_v24  ;;  %v5584_v32 = vld [vmem:[#allocation2 + $0x30] sm:$0xff]  ;;  %v2418_v30 = vmul.f32 %v5579_v27, %v5579_v27  ;;  %v5589_v33 = vld [vmem:[#allocation2 + $0x38] sm:$0xff]  ;;  %v5594_v42 = vld [vmem:[#allocation2 + $0x40] sm:$0xff] }
 0x251   : > { %v2309_v25 = vadd.f32 %v2308_v6, %v5562_v20  ;;  %v2513_v1 = vadd.f32 %v2414_v22, %v2413_v21  ;;  %v2419_v36 = vmul.f32 %v5584_v32, %v5584_v32  ;;  %v2420_v40 = vmul.f32 %v5589_v33, %v5589_v33  ;;  %v5599_v51 = vld [vmem:[#allocation2 + $0x48] sm:$0xff]  ;;  %v5604_v52 = vld [vmem:[#allocation2 + $0x50] sm:$0xff]  ;;  %v5609_v56 = vld [vmem:[#allocation2 + $0x58] sm:$0xff] }
 0x252   : > { %v2421_v44 = vmul.f32 %v5594_v42, %v5594_v42  ;;  %v2422_v55 = vmul.f32 %v5599_v51, %v5599_v51  ;;  %v2423_v59 = vmul.f32 %v5604_v52, %v5604_v52  ;;  %v5614_v54 = vld [vmem:[#allocation2 + $0x60] sm:$0xff]  ;;  %v2424_v58 = vmul.f32 %v5609_v56, %v5609_v56  ;;  %v5619_v61 = vld [vmem:[#allocation2 + $0x68] sm:$0xff]  ;;  %v5624_v4 = vld [vmem:[#allocation2 + $0x70] sm:$0xff] }
 0x253   : > { %v2310_v39 = vadd.f32 %v2309_v25, %v5564_v19  ;;  %v2514_v29 = vadd.f32 %v2513_v1, %v2415_v23  ;;  %v2425_v62 = vmul.f32 %v5614_v54, %v5614_v54  ;;  %v2426_v7 = vmul.f32 %v5619_v61, %v5619_v61  ;;  %v5629_v9 = vld [vmem:[#allocation2 + $0x78] sm:$0xff]  ;;  %v5634_v3 = vld [vmem:[#allocation2 + $0x80] sm:$0xff]  ;;  %v5639_v15 = vld [vmem:[#allocation2 + $0x88] sm:$0xff] }
 0x254   : > { %v2427_v8 = vmul.f32 %v5624_v4, %v5624_v4  ;;  %v2428_v12 = vmul.f32 %v5629_v9, %v5629_v9  ;;  %v2429_v31 = vmul.f32 %v5634_v3, %v5634_v3  ;;  %v5644_v6 = vld [vmem:[#allocation2 + $0x90] sm:$0xff]  ;;  %v2430_v22 = vmul.f32 %v5639_v15, %v5639_v15  ;;  %v5649_v25 = vld [vmem:[#allocation2 + $0x98] sm:$0xff] }
 0x255   : > { %v2311_v43 = vadd.f32 %v2310_v39, %v5574_v24  ;;  %v2515_v37 = vadd.f32 %v2514_v29, %v2416_v26  ;;  %v2431_v1 = vmul.f32 %v5644_v6, %v5644_v6 }
 0x257   : > { %v2312_v34 = vadd.f32 %v2311_v43, %v5579_v27  ;;  %v2516_v47 = vadd.f32 %v2515_v37, %v2417_v28  ;;  %v5654_v28 = vld [vmem:[#allocation2 + $0xa0] sm:$0xff]  ;;  %v2432_v43 = vmul.f32 %v5649_v25, %v5649_v25  ;;  %v5659_v37 = vld [vmem:[#allocation2 + $0xa8] sm:$0xff] }
 0x259   : > { %v2313_v38 = vadd.f32 %v2312_v34, %v5584_v32  ;;  %v2517_v48 = vadd.f32 %v2516_v47, %v2418_v30 }
 0x25b   : > { %v2314_v41 = vadd.f32 %v2313_v38, %v5589_v33  ;;  %v2518_v45 = vadd.f32 %v2517_v48, %v2419_v36  ;;  %v2433_v36 = vmul.f32 %v5654_v28, %v5654_v28  ;;  %v5664_v38 = vld [vmem:[#allocation2 + $0xb0] sm:$0xff]  ;;  %v2434_v48 = vmul.f32 %v5659_v37, %v5659_v37 }
 0x25d   : > { %v2315_v46 = vadd.f32 %v2314_v41, %v5594_v42  ;;  %v2519_v49 = vadd.f32 %v2518_v45, %v2420_v40 }
 0x25f   : > { %v2316_v50 = vadd.f32 %v2315_v46, %v5599_v51  ;;  %v2520_v53 = vadd.f32 %v2519_v49, %v2421_v44  ;;  %v5669_v44 = vld [vmem:[#allocation2 + $0xb8] sm:$0xff]  ;;  %v2435_v46 = vmul.f32 %v5664_v38, %v5664_v38  ;;  %v5674_v49 = vld [vmem:[#allocation2 + $0xc0] sm:$0xff] }
 0x261   : > { %v2317_v57 = vadd.f32 %v2316_v50, %v5604_v52  ;;  %v2521_v60 = vadd.f32 %v2520_v53, %v2422_v55 }
 0x263   : > { %v2318_v63 = vadd.f32 %v2317_v57, %v5609_v56  ;;  %v2522_v2 = vadd.f32 %v2521_v60, %v2423_v59  ;;  %v2436_v59 = vmul.f32 %v5669_v44, %v5669_v44  ;;  %v5679_v57 = vld [vmem:[#allocation2 + $0xc8] sm:$0xff]  ;;  %v2437_v60 = vmul.f32 %v5674_v49, %v5674_v49 }
 0x265   : > { %v2319_v5 = vadd.f32 %v2318_v63, %v5614_v54  ;;  %v2523_v0 = vadd.f32 %v2522_v2, %v2424_v58 }
 0x267   : > { %v2320_v10 = vadd.f32 %v2319_v5, %v5619_v61  ;;  %v2524_v11 = vadd.f32 %v2523_v0, %v2425_v62  ;;  %v5684_v62 = vld [vmem:[#allocation2 + $0xd0] sm:$0xff]  ;;  %v2438_v5 = vmul.f32 %v5679_v57, %v5679_v57  ;;  %v5689_v0 = vld [vmem:[#allocation2 + $0xd8] sm:$0xff] }
 0x269   : > { %v2321_v13 = vadd.f32 %v2320_v10, %v5624_v4  ;;  %v2525_v14 = vadd.f32 %v2524_v11, %v2426_v7 }
 0x26b   : > { %v2322_v17 = vadd.f32 %v2321_v13, %v5629_v9  ;;  %v2526_v16 = vadd.f32 %v2525_v14, %v2427_v8  ;;  %v2439_v8 = vmul.f32 %v5684_v62, %v5684_v62  ;;  %v5694_v13 = vld [vmem:[#allocation2 + $0xe0] sm:$0xff]  ;;  %v2440_v14 = vmul.f32 %v5689_v0, %v5689_v0 }
 0x26d   : > { %v2323_v21 = vadd.f32 %v2322_v17, %v5634_v3  ;;  %v2527_v23 = vadd.f32 %v2526_v16, %v2428_v12 }
 0x26f   : > { %v2324_v26 = vadd.f32 %v2323_v21, %v5639_v15  ;;  %v2528_v39 = vadd.f32 %v2527_v23, %v2429_v31  ;;  %v5699_v31 = vld [vmem:[#allocation2 + $0xe8] sm:$0xff]  ;;  %v2441_v21 = vmul.f32 %v5694_v13, %v5694_v13  ;;  %v5704_v23 = vld [vmem:[#allocation2 + $0xf0] sm:$0xff] }
 0x271   : > { %v2325_v29 = vadd.f32 %v2324_v26, %v5644_v6  ;;  %v2529_v30 = vadd.f32 %v2528_v39, %v2430_v22 }
 0x273   : > { %v2326_v34 = vadd.f32 %v2325_v29, %v5649_v25  ;;  %v2530_v47 = vadd.f32 %v2529_v30, %v2431_v1  ;;  %v2442_v1 = vmul.f32 %v5699_v31, %v5699_v31  ;;  %v5709_v29 = vld [vmem:[#allocation2 + $0xf8] sm:$0xff]  ;;  %v2443_v30 = vmul.f32 %v5704_v23, %v5704_v23 }
 0x275   : > { %v2327_v40 = vadd.f32 %v2326_v34, %v5654_v28  ;;  %v2531_v41 = vadd.f32 %v2530_v47, %v2432_v43 }
 0x277   : > { %v2328_v45 = vadd.f32 %v2327_v40, %v5659_v37  ;;  %v2532_v55 = vadd.f32 %v2531_v41, %v2433_v36  ;;  %v5714_v36 = vld [vmem:[#allocation2 + $0x100] sm:$0xff]  ;;  %v2444_v40 = vmul.f32 %v5709_v29, %v5709_v29  ;;  %v5719_v41 = vld [vmem:[#allocation2 + $0x108] sm:$0xff] }
 0x279   : > { %v2329_v50 = vadd.f32 %v2328_v45, %v5664_v38  ;;  %v2533_v53 = vadd.f32 %v2532_v55, %v2434_v48 }
 0x27b   : > { %v2330_v58 = vadd.f32 %v2329_v50, %v5669_v44  ;;  %v2534_v63 = vadd.f32 %v2533_v53, %v2435_v46  ;;  %v2445_v46 = vmul.f32 %v5714_v36, %v5714_v36  ;;  %v5724_v50 = vld [vmem:[#allocation2 + $0x110] sm:$0xff]  ;;  %v2446_v53 = vmul.f32 %v5719_v41, %v5719_v41 }
 0x27d   : > { %v2331_v2 = vadd.f32 %v2330_v58, %v5674_v49  ;;  %v2535_v7 = vadd.f32 %v2534_v63, %v2436_v59 }
 0x27f   : > { %v2332_v10 = vadd.f32 %v2331_v2, %v5679_v57  ;;  %v2536_v11 = vadd.f32 %v2535_v7, %v2437_v60  ;;  %v5729_v60 = vld [vmem:[#allocation2 + $0x118] sm:$0xff]  ;;  %v2447_v2 = vmul.f32 %v5724_v50, %v5724_v50  ;;  %v5734_v7 = vld [vmem:[#allocation2 + $0x120] sm:$0xff] }
 0x281   : > { %v2333_v12 = vadd.f32 %v2332_v10, %v5684_v62  ;;  %v2537_v17 = vadd.f32 %v2536_v11, %v2438_v5 }
 0x283   : > { %v2334_v16 = vadd.f32 %v2333_v12, %v5689_v0  ;;  %v2538_v22 = vadd.f32 %v2537_v17, %v2439_v8  ;;  %v2448_v8 = vmul.f32 %v5729_v60, %v5729_v60  ;;  %v5739_v12 = vld [vmem:[#allocation2 + $0x128] sm:$0xff]  ;;  %v2449_v17 = vmul.f32 %v5734_v7, %v5734_v7 }
 0x284   : > { %6661 = vst [vmem:[#allocation3_spill] sm:$0xff] %v5739_v12 }
 0x285   : > { %v2335_v26 = vadd.f32 %v2334_v16, %v5694_v13  ;;  %v2539_v39 = vadd.f32 %v2538_v22, %v2440_v14 }
 0x287   : > { %v2336_v43 = vadd.f32 %v2335_v26, %v5699_v31  ;;  %v2540_v34 = vadd.f32 %v2539_v39, %v2441_v21  ;;  %v5744_v21 = vld [vmem:[#allocation2 + $0x130] sm:$0xff]  ;;  %v2450_v26 = vmul.f32 %v5739_v12, %v5739_v12  ;;  %v5749_v39 = vld [vmem:[#allocation2 + $0x138] sm:$0xff] }
 0x288   : > { %6662 = vst [vmem:[#allocation4_spill] sm:$0xff] %v5744_v21  ;;  %6663 = vst [vmem:[#allocation5_spill] sm:$0xff] %v5749_v39 }
 0x289   : > { %v2337_v47 = vadd.f32 %v2336_v43, %v5704_v23  ;;  %v2541_v48 = vadd.f32 %v2540_v34, %v2442_v1 }
 0x28b   : > { %v2338_v45 = vadd.f32 %v2337_v47, %v5709_v29  ;;  %v2542_v55 = vadd.f32 %v2541_v48, %v2443_v30  ;;  %v2451_v30 = vmul.f32 %v5744_v21, %v5744_v21  ;;  %v5754_v47 = vld [vmem:[#allocation2 + $0x140] sm:$0xff]  ;;  %v2452_v48 = vmul.f32 %v5749_v39, %v5749_v39 }
 0x28c   : > { %6664 = vst [vmem:[#allocation6_spill] sm:$0xff] %v5754_v47 }
 0x28d   : > { %v2339_v59 = vadd.f32 %v2338_v45, %v5714_v36  ;;  %v2543_v58 = vadd.f32 %v2542_v55, %v2444_v40 }
 0x28f   : > { %v2340_v63 = vadd.f32 %v2339_v59, %v5719_v41  ;;  %v2544_v5 = vadd.f32 %v2543_v58, %v2445_v46  ;;  %v5759_v46 = vld [vmem:[#allocation2 + $0x148] sm:$0xff]  ;;  %v2453_v59 = vmul.f32 %v5754_v47, %v5754_v47  ;;  %v5764_v58 = vld [vmem:[#allocation2 + $0x150] sm:$0xff] }
 0x290   : > { %6665 = vst [vmem:[#allocation7_spill] sm:$0xff] %v5759_v46  ;;  %6666 = vst [vmem:[#allocation8_spill] sm:$0xff] %v5764_v58 }
 0x291   : > { %v2341_v10 = vadd.f32 %v2340_v63, %v5724_v50  ;;  %v2545_v11 = vadd.f32 %v2544_v5, %v2446_v53 }
 0x293   : > { %v2342_v14 = vadd.f32 %v2341_v10, %v5729_v60  ;;  %v2546_v16 = vadd.f32 %v2545_v11, %v2447_v2  ;;  %v2454_v2 = vmul.f32 %v5759_v46, %v5759_v46  ;;  %v5769_v10 = vld [vmem:[#allocation2 + $0x158] sm:$0xff]  ;;  %v2455_v11 = vmul.f32 %v5764_v58, %v5764_v58 }
 0x294   : > { %6667 = vst [vmem:[#allocation9_spill] sm:$0xff] %v5769_v10 }
 0x295   : > { %v2343_v22 = vadd.f32 %v2342_v14, %v5734_v7  ;;  %v2547_v1 = vadd.f32 %v2546_v16, %v2448_v8 }
 0x297   : > { %v2344_v43 = vadd.f32 %v2343_v22, %v5739_v12  ;;  %v2548_v34 = vadd.f32 %v2547_v1, %v2449_v17  ;;  %v5774_v17 = vld [vmem:[#allocation2 + $0x160] sm:$0xff]  ;;  %v2456_v22 = vmul.f32 %v5769_v10, %v5769_v10  ;;  %v5779_v1 = vld [vmem:[#allocation2 + $0x168] sm:$0xff] }
 0x298   : > { %6668 = vst [vmem:[#allocation10_spill] sm:$0xff] %v5774_v17  ;;  %6669 = vst [vmem:[#allocation11_spill] sm:$0xff] %v5779_v1  ;;  %v2288_v12 = vld [vmem:[#allocation2 + $0x280] sm:$0xff] }
 0x299   : > { %v2345_v40 = vadd.f32 %v2344_v43, %v5744_v21  ;;  %v2549_v45 = vadd.f32 %v2548_v34, %v2450_v26 }
 0x29b   : > { %v2346_v55 = vadd.f32 %v2345_v40, %v5749_v39  ;;  %v2550_v53 = vadd.f32 %v2549_v45, %v2451_v30  ;;  %v2457_v30 = vmul.f32 %v5774_v17, %v5774_v17  ;;  %v5784_v40 = vld [vmem:[#allocation2 + $0x170] sm:$0xff]  ;;  %v2458_v45 = vmul.f32 %v5779_v1, %v5779_v1  ;;  %v2287_v39 = vld [vmem:[#allocation2 + $0x278] sm:$0xff] }
 0x29c   : > { %6670 = vst [vmem:[#allocation12_spill] sm:$0xff] %v5784_v40 }
 0x29d   : > { %v2347_v63 = vadd.f32 %v2346_v55, %v5754_v47  ;;  %v2551_v5 = vadd.f32 %v2550_v53, %v2452_v48 }
 0x29f   : > { %v2348_v8 = vadd.f32 %v2347_v63, %v5759_v46  ;;  %v2552_v14 = vadd.f32 %v2551_v5, %v2453_v59  ;;  %v5789_v59 = vld [vmem:[#allocation2 + $0x178] sm:$0xff]  ;;  %v2459_v63 = vmul.f32 %v5784_v40, %v5784_v40  ;;  %v5794_v5 = vld [vmem:[#allocation2 + $0x180] sm:$0xff] }
 0x2a0   : > { %6671 = vst [vmem:[#allocation13_spill] sm:$0xff] %v5789_v59  ;;  %6672 = vst [vmem:[#allocation14_spill] sm:$0xff] %v5794_v5 }
 0x2a1   : > { %v2349_v16 = vadd.f32 %v2348_v8, %v5764_v58  ;;  %v2553_v26 = vadd.f32 %v2552_v14, %v2454_v2 }
 0x2a3   : > { %v2350_v43 = vadd.f32 %v2349_v16, %v5769_v10  ;;  %v2554_v34 = vadd.f32 %v2553_v26, %v2455_v11  ;;  %v2460_v11 = vmul.f32 %v5789_v59, %v5789_v59  ;;  %v5799_v16 = vld [vmem:[#allocation2 + $0x188] sm:$0xff]  ;;  %v2461_v26 = vmul.f32 %v5794_v5, %v5794_v5 }
 0x2a4   : > { %6673 = vst [vmem:[#allocation15_spill] sm:$0xff] %v5799_v16 }
 0x2a5   : > { %v2351_v48 = vadd.f32 %v2350_v43, %v5774_v17  ;;  %v2555_v55 = vadd.f32 %v2554_v34, %v2456_v22  ;;  %v5804_v34 = vld [vmem:[#allocation2 + $0x190] sm:$0xff] }
 0x2a6   : > { %6674 = vst [vmem:[#allocation16_spill] sm:$0xff] %v5804_v34 }
 0x2a7   : > { %v2352_v53 = vadd.f32 %v2351_v48, %v5779_v1  ;;  %v2556_v2 = vadd.f32 %v2555_v55, %v2457_v30  ;;  %v2462_v48 = vmul.f32 %v5799_v16, %v5799_v16 }
 0x2a9   : > { %v2353_v8 = vadd.f32 %v2352_v53, %v5784_v40  ;;  %v2557_v14 = vadd.f32 %v2556_v2, %v2458_v45  ;;  %v5809_v53 = vld [vmem:[#allocation2 + $0x198] sm:$0xff]  ;;  %v2463_v2 = vmul.f32 %v5804_v34, %v5804_v34 }
 0x2aa   : > { %6675 = vst [vmem:[#allocation17_spill] sm:$0xff] %v5809_v53 }
 0x2ab   : > { %v2354_v22 = vadd.f32 %v2353_v8, %v5789_v59  ;;  %v2558_v43 = vadd.f32 %v2557_v14, %v2459_v63  ;;  %v5814_v59 = vld [vmem:[#allocation2 + $0x1a0] sm:$0xff]  ;;  %v2464_v14 = vmul.f32 %v5809_v53, %v5809_v53 }
 0x2ac   : > { %6676 = vst [vmem:[#allocation18_spill] sm:$0xff] %v5814_v59 }
 0x2ad   : > { %v2355_v30 = vadd.f32 %v2354_v22, %v5794_v5  ;;  %v2559_v55 = vadd.f32 %v2558_v43, %v2460_v11  ;;  %v5819_v5 = vld [vmem:[#allocation2 + $0x1a8] sm:$0xff]  ;;  %v2465_v43 = vmul.f32 %v5814_v59, %v5814_v59 }
 0x2ae   : > { %6677 = vst [vmem:[#allocation19_spill] sm:$0xff] %v5819_v5 }
 0x2af   : > { %v2356_v45 = vadd.f32 %v2355_v30, %v5799_v16  ;;  %v2560_v8 = vadd.f32 %v2559_v55, %v2461_v26  ;;  %v5824_v16 = vld [vmem:[#allocation2 + $0x1b0] sm:$0xff]  ;;  %v2466_v55 = vmul.f32 %v5819_v5, %v5819_v5 }
 0x2b0   : > { %6678 = vst [vmem:[#allocation20_spill] sm:$0xff] %v5824_v16 }
 0x2b1   : > { %v2357_v63 = vadd.f32 %v2356_v45, %v5804_v34  ;;  %v2561_v22 = vadd.f32 %v2560_v8, %v2462_v48  ;;  %v5829_v34 = vld [vmem:[#allocation2 + $0x1b8] sm:$0xff]  ;;  %v2467_v8 = vmul.f32 %v5824_v16, %v5824_v16 }
 0x2b2   : > { %6679 = vst [vmem:[#allocation21_spill] sm:$0xff] %v5829_v34 }
 0x2b3   : > { %v2358_v11 = vadd.f32 %v2357_v63, %v5809_v53  ;;  %v2562_v30 = vadd.f32 %v2561_v22, %v2463_v2  ;;  %v5834_v53 = vld [vmem:[#allocation2 + $0x1c0] sm:$0xff]  ;;  %v2468_v22 = vmul.f32 %v5829_v34, %v5829_v34 }
 0x2b4   : > { %6680 = vst [vmem:[#allocation22_spill] sm:$0xff] %v5834_v53 }
 0x2b5   : > { %v2359_v26 = vadd.f32 %v2358_v11, %v5814_v59  ;;  %v2563_v45 = vadd.f32 %v2562_v30, %v2464_v14  ;;  %v5839_v59 = vld [vmem:[#allocation2 + $0x1c8] sm:$0xff]  ;;  %v2469_v30 = vmul.f32 %v5834_v53, %v5834_v53 }
 0x2b6   : > { %6681 = vst [vmem:[#allocation23_spill] sm:$0xff] %v5839_v59 }
 0x2b7   : > { %v2360_v48 = vadd.f32 %v2359_v26, %v5819_v5  ;;  %v2564_v63 = vadd.f32 %v2563_v45, %v2465_v43  ;;  %v5844_v5 = vld [vmem:[#allocation2 + $0x1d0] sm:$0xff]  ;;  %v2470_v45 = vmul.f32 %v5839_v59, %v5839_v59 }
 0x2b8   : > { %6682 = vst [vmem:[#allocation24_spill] sm:$0xff] %v5844_v5 }
 0x2b9   : > { %v2361_v2 = vadd.f32 %v2360_v48, %v5824_v16  ;;  %v2565_v11 = vadd.f32 %v2564_v63, %v2466_v55  ;;  %v5849_v16 = vld [vmem:[#allocation2 + $0x1d8] sm:$0xff]  ;;  %v2471_v63 = vmul.f32 %v5844_v5, %v5844_v5 }
 0x2ba   : > { %6683 = vst [vmem:[#allocation25_spill] sm:$0xff] %v5849_v16 }
 0x2bb   : > { %v2362_v14 = vadd.f32 %v2361_v2, %v5829_v34  ;;  %v2566_v26 = vadd.f32 %v2565_v11, %v2467_v8  ;;  %v5854_v34 = vld [vmem:[#allocation2 + $0x1e0] sm:$0xff]  ;;  %v2472_v11 = vmul.f32 %v5849_v16, %v5849_v16 }
 0x2bc   : > { %6684 = vst [vmem:[#allocation26_spill] sm:$0xff] %v5854_v34 }
 0x2bd   : > { %v2363_v43 = vadd.f32 %v2362_v14, %v5834_v53  ;;  %v2567_v48 = vadd.f32 %v2566_v26, %v2468_v22  ;;  %v5859_v53 = vld [vmem:[#allocation2 + $0x1e8] sm:$0xff]  ;;  %v2473_v26 = vmul.f32 %v5854_v34, %v5854_v34 }
 0x2be   : > { %6685 = vst [vmem:[#allocation27_spill] sm:$0xff] %v5859_v53 }
 0x2bf   : > { %v2364_v55 = vadd.f32 %v2363_v43, %v5839_v59  ;;  %v2568_v2 = vadd.f32 %v2567_v48, %v2469_v30  ;;  %v5864_v59 = vld [vmem:[#allocation2 + $0x1f0] sm:$0xff]  ;;  %v2474_v48 = vmul.f32 %v5859_v53, %v5859_v53 }
 0x2c0   : > { %6686 = vst [vmem:[#allocation28_spill] sm:$0xff] %v5864_v59 }
 0x2c1   : > { %v2365_v8 = vadd.f32 %v2364_v55, %v5844_v5  ;;  %v2569_v14 = vadd.f32 %v2568_v2, %v2470_v45  ;;  %v5869_v5 = vld [vmem:[#allocation2 + $0x1f8] sm:$0xff]  ;;  %v2475_v2 = vmul.f32 %v5864_v59, %v5864_v59 }
 0x2c2   : > { %6687 = vst [vmem:[#allocation29_spill] sm:$0xff] %v5869_v5 }
 0x2c3   : > { %v2366_v22 = vadd.f32 %v2365_v8, %v5849_v16  ;;  %v2570_v43 = vadd.f32 %v2569_v14, %v2471_v63  ;;  %v5874_v16 = vld [vmem:[#allocation2 + $0x200] sm:$0xff]  ;;  %v2476_v14 = vmul.f32 %v5869_v5, %v5869_v5 }
 0x2c4   : > { %6688 = vst [vmem:[#allocation30_spill] sm:$0xff] %v5874_v16 }
 0x2c5   : > { %v2367_v30 = vadd.f32 %v2366_v22, %v5854_v34  ;;  %v2571_v55 = vadd.f32 %v2570_v43, %v2472_v11  ;;  %v5879_v34 = vld [vmem:[#allocation2 + $0x208] sm:$0xff]  ;;  %v2477_v43 = vmul.f32 %v5874_v16, %v5874_v16 }
 0x2c6   : > { %6689 = vst [vmem:[#allocation31_spill] sm:$0xff] %v5879_v34 }
 0x2c7   : > { %v2368_v45 = vadd.f32 %v2367_v30, %v5859_v53  ;;  %v2572_v8 = vadd.f32 %v2571_v55, %v2473_v26  ;;  %v5884_v53 = vld [vmem:[#allocation2 + $0x210] sm:$0xff]  ;;  %v2478_v55 = vmul.f32 %v5879_v34, %v5879_v34 }
 0x2c8   : > { %6690 = vst [vmem:[#allocation32_spill] sm:$0xff] %v5884_v53 }
 0x2c9   : > { %v2369_v63 = vadd.f32 %v2368_v45, %v5864_v59  ;;  %v2573_v22 = vadd.f32 %v2572_v8, %v2474_v48  ;;  %v5889_v59 = vld [vmem:[#allocation2 + $0x218] sm:$0xff]  ;;  %v2479_v8 = vmul.f32 %v5884_v53, %v5884_v53 }
 0x2ca   : > { %6691 = vst [vmem:[#allocation33_spill] sm:$0xff] %v5889_v59 }
 0x2cb   : > { %v2370_v11 = vadd.f32 %v2369_v63, %v5869_v5  ;;  %v2574_v30 = vadd.f32 %v2573_v22, %v2475_v2  ;;  %v5894_v5 = vld [vmem:[#allocation2 + $0x220] sm:$0xff]  ;;  %v2480_v22 = vmul.f32 %v5889_v59, %v5889_v59 }
 0x2cc   : > { %6692 = vst [vmem:[#allocation34_spill] sm:$0xff] %v5894_v5 }
 0x2cd   : > { %v2371_v26 = vadd.f32 %v2370_v11, %v5874_v16  ;;  %v2575_v45 = vadd.f32 %v2574_v30, %v2476_v14  ;;  %v5899_v16 = vld [vmem:[#allocation2 + $0x228] sm:$0xff]  ;;  %v2481_v30 = vmul.f32 %v5894_v5, %v5894_v5 }
 0x2ce   : > { %6693 = vst [vmem:[#allocation35_spill] sm:$0xff] %v5899_v16 }
 0x2cf   : > { %v2372_v48 = vadd.f32 %v2371_v26, %v5879_v34  ;;  %v2576_v63 = vadd.f32 %v2575_v45, %v2477_v43  ;;  %v5904_v34 = vld [vmem:[#allocation2 + $0x230] sm:$0xff]  ;;  %v2482_v45 = vmul.f32 %v5899_v16, %v5899_v16 }
 0x2d0   : > { %6694 = vst [vmem:[#allocation36_spill] sm:$0xff] %v5904_v34 }
 0x2d1   : > { %v2373_v2 = vadd.f32 %v2372_v48, %v5884_v53  ;;  %v2577_v11 = vadd.f32 %v2576_v63, %v2478_v55  ;;  %v5909_v53 = vld [vmem:[#allocation2 + $0x238] sm:$0xff]  ;;  %v2483_v63 = vmul.f32 %v5904_v34, %v5904_v34 }
 0x2d2   : > { %6695 = vst [vmem:[#allocation37_spill] sm:$0xff] %v5909_v53 }
 0x2d3   : > { %v2374_v14 = vadd.f32 %v2373_v2, %v5889_v59  ;;  %v2578_v26 = vadd.f32 %v2577_v11, %v2479_v8  ;;  %v5914_v59 = vld [vmem:[#allocation2 + $0x240] sm:$0xff]  ;;  %v2484_v11 = vmul.f32 %v5909_v53, %v5909_v53 }
 0x2d4   : > { %6696 = vst [vmem:[#allocation38_spill] sm:$0xff] %v5914_v59 }
 0x2d5   : > { %v2375_v43 = vadd.f32 %v2374_v14, %v5894_v5  ;;  %v2579_v48 = vadd.f32 %v2578_v26, %v2480_v22  ;;  %v5919_v5 = vld [vmem:[#allocation2 + $0x248] sm:$0xff]  ;;  %v2485_v26 = vmul.f32 %v5914_v59, %v5914_v59 }
 0x2d6   : > { %6697 = vst [vmem:[#allocation39_spill] sm:$0xff] %v5919_v5 }
 0x2d7   : > { %v2376_v55 = vadd.f32 %v2375_v43, %v5899_v16  ;;  %v2580_v2 = vadd.f32 %v2579_v48, %v2481_v30  ;;  %v2282_v16 = vld [vmem:[#allocation2 + $0x250] sm:$0xff]  ;;  %v2486_v30 = vmul.f32 %v5919_v5, %v5919_v5 }
 0x2d8   : > { %v2487_v1 = vmul.f32 %v2282_v16, %v2282_v16 }
 0x2d9   : > { %v2377_v8 = vadd.f32 %v2376_v55, %v5904_v34  ;;  %v2581_v14 = vadd.f32 %v2580_v2, %v2482_v45  ;;  %v2283_v55 = vld [vmem:[#allocation2 + $0x258] sm:$0xff]  ;;  %v2284_v2 = vld [vmem:[#allocation2 + $0x260] sm:$0xff] }
 0x2da   : > { %v2488_v10 = vmul.f32 %v2283_v55, %v2283_v55  ;;  %v2489_v46 = vmul.f32 %v2284_v2, %v2284_v2 }
 0x2db   : > { %v2378_v22 = vadd.f32 %v2377_v8, %v5909_v53  ;;  %v2582_v43 = vadd.f32 %v2581_v14, %v2483_v63  ;;  %v2285_v53 = vld [vmem:[#allocation2 + $0x268] sm:$0xff]  ;;  %v2286_v14 = vld [vmem:[#allocation2 + $0x270] sm:$0xff] }
 0x2dd   : > { %v2379_v40 = vadd.f32 %v2378_v22, %v5914_v59  ;;  %v2583_v48 = vadd.f32 %v2582_v43, %v2484_v11  ;;  %v2490_v22 = vmul.f32 %v2285_v53, %v2285_v53  ;;  %v2491_v11 = vmul.f32 %v2286_v14, %v2286_v14 }
 0x2df   : > { %v2380_v34 = vadd.f32 %v2379_v40, %v5919_v5  ;;  %v2584_v45 = vadd.f32 %v2583_v48, %v2485_v26  ;;  %v2492_v5 = vmul.f32 %v2287_v39, %v2287_v39  ;;  %v2289_v48 = vld [vmem:[#allocation2 + $0x288] sm:$0xff] }
 0x2e1   : > { %v2381_v17 = vadd.f32 %v2380_v34, %v2282_v16  ;;  %v2585_v8 = vadd.f32 %v2584_v45, %v2486_v30  ;;  %v2493_v34 = vmul.f32 %v2288_v12, %v2288_v12  ;;  %v2290_v45 = vld [vmem:[#allocation2 + $0x290] sm:$0xff] }
 0x2e3   : > { %v2382_v58 = vadd.f32 %v2381_v17, %v2283_v55  ;;  %v2586_v63 = vadd.f32 %v2585_v8, %v2487_v1  ;;  %v2494_v55 = vmul.f32 %v2289_v48, %v2289_v48  ;;  %v2291_v8 = vld [vmem:[#allocation2 + $0x298] sm:$0xff] }
 0x2e5   : > { %v2383_v47 = vadd.f32 %v2382_v58, %v2284_v2  ;;  %v2587_v59 = vadd.f32 %v2586_v63, %v2488_v10  ;;  %v2495_v2 = vmul.f32 %v2290_v45, %v2290_v45  ;;  %v2292_v63 = vld [vmem:[#allocation2 + $0x2a0] sm:$0xff] }
 0x2e7   : > { %v2384_v21 = vadd.f32 %v2383_v47, %v2285_v53  ;;  %v2588_v43 = vadd.f32 %v2587_v59, %v2489_v46  ;;  %v2496_v53 = vmul.f32 %v2291_v8, %v2291_v8  ;;  %v2293_v59 = vld [vmem:[#allocation2 + $0x2a8] sm:$0xff] }
 0x2e9   : > { %v2385_v40 = vadd.f32 %v2384_v21, %v2286_v14  ;;  %v2589_v26 = vadd.f32 %v2588_v43, %v2490_v22  ;;  %v2497_v14 = vmul.f32 %v2292_v63, %v2292_v63  ;;  %v2294_v43 = vld [vmem:[#allocation2 + $0x2b0] sm:$0xff] }
 0x2eb   : > { %v2386_v16 = vadd.f32 %v2385_v40, %v2287_v39  ;;  %v2590_v30 = vadd.f32 %v2589_v26, %v2491_v11  ;;  %v2498_v40 = vmul.f32 %v2293_v59, %v2293_v59  ;;  %v2295_v26 = vld [vmem:[#allocation2 + $0x2b8] sm:$0xff] }
 0x2ed   : > { %v2387_v17 = vadd.f32 %v2386_v16, %v2288_v12  ;;  %v2591_v1 = vadd.f32 %v2590_v30, %v2492_v5  ;;  %v2499_v16 = vmul.f32 %v2294_v43, %v2294_v43  ;;  %v2296_v30 = vld [vmem:[#allocation2 + $0x2c0] sm:$0xff] }
 0x2ef   : > { %v2388_v58 = vadd.f32 %v2387_v17, %v2289_v48  ;;  %v2592_v10 = vadd.f32 %v2591_v1, %v2493_v34  ;;  %v2500_v17 = vmul.f32 %v2295_v26, %v2295_v26  ;;  %v2297_v1 = vld [vmem:[#allocation2 + $0x2c8] sm:$0xff] }
 0x2f1   : > { %v2389_v47 = vadd.f32 %v2388_v58, %v2290_v45  ;;  %v2593_v46 = vadd.f32 %v2592_v10, %v2494_v55  ;;  %v2501_v58 = vmul.f32 %v2296_v30, %v2296_v30  ;;  %v2298_v10 = vld [vmem:[#allocation2 + $0x2d0] sm:$0xff] }
 0x2f3   : > { %v2390_v21 = vadd.f32 %v2389_v47, %v2291_v8  ;;  %v2594_v22 = vadd.f32 %v2593_v46, %v2495_v2  ;;  %v2502_v47 = vmul.f32 %v2297_v1, %v2297_v1  ;;  %v2299_v46 = vld [vmem:[#allocation2 + $0x2d8] sm:$0xff] }
 0x2f5   : > { %v2391_v39 = vadd.f32 %v2390_v21, %v2292_v63  ;;  %v2595_v11 = vadd.f32 %v2594_v22, %v2496_v53  ;;  %v2503_v21 = vmul.f32 %v2298_v10, %v2298_v10  ;;  %v2300_v22 = vld [vmem:[#allocation2 + $0x2e0] sm:$0xff] }
 0x2f7   : > { %v2392_v12 = vadd.f32 %v2391_v39, %v2293_v59  ;;  %v2596_v5 = vadd.f32 %v2595_v11, %v2497_v14  ;;  %v2504_v39 = vmul.f32 %v2299_v46, %v2299_v46  ;;  %v2301_v11 = vld [vmem:[#allocation2 + $0x2e8] sm:$0xff] }
 0x2f9   : > { %v2393_v48 = vadd.f32 %v2392_v12, %v2294_v43  ;;  %v2597_v34 = vadd.f32 %v2596_v5, %v2498_v40  ;;  %v2505_v12 = vmul.f32 %v2300_v22, %v2300_v22  ;;  %v2302_v5 = vld [vmem:[#allocation2 + $0x2f0] sm:$0xff] }
 0x2fb   : > { %v2394_v45 = vadd.f32 %v2393_v48, %v2295_v26  ;;  %v2598_v55 = vadd.f32 %v2597_v34, %v2499_v16  ;;  %v2506_v48 = vmul.f32 %v2301_v11, %v2301_v11  ;;  %v2303_v34 = vld [vmem:[#allocation2 + $0x2f8] sm:$0xff] }
 0x2fd   : > { %v2395_v8 = vadd.f32 %v2394_v45, %v2296_v30  ;;  %v2599_v2 = vadd.f32 %v2598_v55, %v2500_v17  ;;  %v2507_v45 = vmul.f32 %v2302_v5, %v2302_v5  ;;  %v2304_v55 = vld [vmem:[#allocation2 + $0x300] sm:$0xff] }
 0x2ff   : > { %v2396_v63 = vadd.f32 %v2395_v8, %v2297_v1  ;;  %v2600_v53 = vadd.f32 %v2599_v2, %v2501_v58  ;;  %v2508_v8 = vmul.f32 %v2303_v34, %v2303_v34  ;;  %v2305_v2 = vld [vmem:[#allocation2 + $0x308] sm:$0xff] }
 0x301   : > { %v2397_v59 = vadd.f32 %v2396_v63, %v2298_v10  ;;  %v2601_v14 = vadd.f32 %v2600_v53, %v2502_v47  ;;  %v2509_v63 = vmul.f32 %v2304_v55, %v2304_v55  ;;  %v2306_v53 = vld [vmem:[#allocation2 + $0x310] sm:$0xff] }
 0x303   : > { %v2398_v43 = vadd.f32 %v2397_v59, %v2299_v46  ;;  %v2602_v40 = vadd.f32 %v2601_v14, %v2503_v21  ;;  %v2510_v59 = vmul.f32 %v2305_v2, %v2305_v2  ;;  %v2307_v14 = vld [vmem:[#allocation2 + $0x318] sm:$0xff] }
 0x305   : > { %v2399_v26 = vadd.f32 %v2398_v43, %v2300_v22  ;;  %v2603_v16 = vadd.f32 %v2602_v40, %v2504_v39  ;;  %v2511_v43 = vmul.f32 %v2306_v53, %v2306_v53 }
 0x307   : > { %v2400_v30 = vadd.f32 %v2399_v26, %v2301_v11  ;;  %v2604_v17 = vadd.f32 %v2603_v16, %v2505_v12  ;;  %v2512_v11 = vmul.f32 %v2307_v14, %v2307_v14 }
 0x309   : > { %v2401_v1 = vadd.f32 %v2400_v30, %v2302_v5  ;;  %v2605_v58 = vadd.f32 %v2604_v17, %v2506_v48 }
 0x30b   : > { %v2402_v10 = vadd.f32 %v2401_v1, %v2303_v34  ;;  %v2606_v47 = vadd.f32 %v2605_v58, %v2507_v45 }
 0x30d   : > { %v2403_v46 = vadd.f32 %v2402_v10, %v2304_v55  ;;  %v2607_v21 = vadd.f32 %v2606_v47, %v2508_v8 }
 0x30f   : > { %v2404_v22 = vadd.f32 %v2403_v46, %v2305_v2  ;;  %v2608_v39 = vadd.f32 %v2607_v21, %v2509_v63 }
 0x311   : > { %v2405_v40 = vadd.f32 %v2404_v22, %v2306_v53  ;;  %v2609_v26 = vadd.f32 %v2608_v39, %v2510_v59 }
 0x313   : > { %v2406_v12 = vadd.f32 %v2405_v40, %v2307_v14  ;;  %v2610_v16 = vadd.f32 %v2609_v26, %v2511_v43 }
 0x315   : > { %v2407_v5 = vrot.slane %v2406_v12, 4  ;;  %v2611_v30 = vadd.f32 %v2610_v16, %v2512_v11 }
 0x317   : > { %v2408_v48 = vadd.f32 %v2407_v5, %v2406_v12  ;;  %v2612_v17 = vrot.slane %v2611_v30, 4 }
 0x319   : > { %v2409_v34 = vrot.slane %v2408_v48, 2  ;;  %v2613_v1 = vadd.f32 %v2612_v17, %v2611_v30 }
 0x31b   : > { %v2410_v45 = vadd.f32 %v2409_v34, %v2408_v48  ;;  %v2614_v58 = vrot.slane %v2613_v1, 2 }
 0x31d   : > { %v2411_v55 = vrot.slane %v2410_v45, 1  ;;  %v2615_v10 = vadd.f32 %v2614_v58, %v2613_v1 }
 0x31f   : > { %v2412_v8 = vadd.f32 %v2411_v55, %v2410_v45  ;;  %v2616_v47 = vrot.slane %v2615_v10, 1  ;;  %v6699_v55 = vld [vmem:[#allocation4_spill] sm:$0xff] }
 0x320   : > { %v6707_v45 = vld [vmem:[#allocation12_spill] sm:$0xff] }
 0x321   : > { %v5928_v2 = vmul.f32 0.00125, %v2412_v8  ;;  %v2617_v63 = vadd.f32 %v2616_v47, %v2615_v10  ;;  %v6700_v10 = vld [vmem:[#allocation5_spill] sm:$0xff]  ;;  %v6701_v8 = vld [vmem:[#allocation6_spill] sm:$0xff]  ;;  %v6702_v47 = vld [vmem:[#allocation7_spill] sm:$0xff] }
 0x323   : > { %v2620_v53 = vmul.f32 %v5928_v2, %v5928_v2  ;;  %v2619_v14 = vmul.f32 0.00125, %v2617_v63  ;;  %v6703_v63 = vld [vmem:[#allocation8_spill] sm:$0xff]  ;;  %v6735_v59 = vsub.f32 %v5558_v18, %v5928_v2  ;;  %v6736_v46 = vsub.f32 %v5560_v35, %v5928_v2 }
 0x324   : > { %v6737_v39 = vsub.f32 %v5562_v20, %v5928_v2  ;;  %v6738_v22 = vsub.f32 %v5564_v19, %v5928_v2  ;;  %v6739_v18 = vsub.f32 %v5574_v24, %v5928_v2  ;;  %v6740_v35 = vsub.f32 %v5579_v27, %v5928_v2 }
 0x325   : > { %v2621_v16 = vsub.f32 %v2619_v14, %v2620_v53  ;;  %v6704_v53 = vld [vmem:[#allocation9_spill] sm:$0xff]  ;;  %v6706_v14 = vld [vmem:[#allocation11_spill] sm:$0xff]  ;;  %v6741_v20 = vsub.f32 %v5584_v32, %v5928_v2  ;;  %v6742_v19 = vsub.f32 %v5589_v33, %v5928_v2 }
 0x327   : > { %v2622_v58 = vmax.f32 %v2621_v16, 0.0 }
 0x329   : > { %v2723_v16 = vadd.f32 1e-05, %v2622_v58  ;;  %v6705_v58 = vld [vmem:[#allocation10_spill] sm:$0xff] }
 0x32b   : > { %4876 = vrsqrt.f32 %v2723_v16  ;;  %v6698_v16 = vld [vmem:[#allocation3_spill] sm:$0xff] }
 0x335   : > { %v6072_v34 = vpop.eup %4876 }
 0x336   : > { %v2725_v26 = vmul.f32 %v6072_v34, %v6735_v59  ;;  %v2726_v11 = vmul.f32 %v6072_v34, %v6736_v46  ;;  %v2727_v43 = vmul.f32 %v6072_v34, %v6737_v39  ;;  %v2728_v21 = vmul.f32 %v6072_v34, %v6738_v22 }
 0x337   : > { %v2729_v59 = vmul.f32 %v6072_v34, %v6739_v18  ;;  %v2730_v46 = vmul.f32 %v6072_v34, %v6740_v35  ;;  %v2731_v39 = vmul.f32 %v6072_v34, %v6741_v20  ;;  %v2732_v22 = vmul.f32 %v6072_v34, %v6742_v19 }
 0x338   : > { %vm2825_vm0 = vcmp.ge.f32.partialorder %v2725_v26, 0.0  ;;  %vm2826_vm1 = vcmp.ge.f32.partialorder %v2726_v11, 0.0  ;;  %v2925_v24 = vmul.f32 0.01, %v2725_v26  ;;  %v2926_v5 = vmul.f32 0.01, %v2726_v11 }
 0x339   : > { %vm2827_vm2 = vcmp.ge.f32.partialorder %v2727_v43, 0.0  ;;  %vm2828_vm3 = vcmp.ge.f32.partialorder %v2728_v21, 0.0  ;;  %v2927_v18 = vmul.f32 0.01, %v2727_v43  ;;  %v2928_v27 = vmul.f32 0.01, %v2728_v21 }
 0x33a   : > { %v3025_v30 = vsel %vm2825_vm0, %v2725_v26, %v2925_v24  ;;  %v3026_v35 = vsel %vm2826_vm1, %v2726_v11, %v2926_v5  ;;  %vm2829_vm4 = vcmp.ge.f32.partialorder %v2729_v59, 0.0  ;;  %vm2830_vm5 = vcmp.ge.f32.partialorder %v2730_v46, 0.0 }
 0x33b   : > { %v4065_v32 = vpack.c.bf16 %v3026_v35, %v3025_v30  ;;  %v3027_v48 = vsel %vm2827_vm2, %v2727_v43, %v2927_v18  ;;  %v3028_v20 = vsel %vm2828_vm3, %v2728_v21, %v2928_v27  ;;  %v2929_v40 = vmul.f32 0.01, %v2729_v59 }
 0x33c   : > { %v4070_v12 = vpack.c.bf16 %v3028_v20, %v3027_v48  ;;  %v2930_v33 = vmul.f32 0.01, %v2730_v46  ;;  %vm2831_vm6 = vcmp.ge.f32.partialorder %v2731_v39, 0.0  ;;  %vm2832_vm7 = vcmp.ge.f32.partialorder %v2732_v22, 0.0 }
 0x33d   : > { %4066 = vst [vmem:[%s6586_s3] sm:$0xff] %v4065_v32   ;;  %v3029_v19 = vsel %vm2829_vm4, %v2729_v59, %v2929_v40  ;;  %v2931_v17 = vmul.f32 0.01, %v2731_v39  ;;  %v2932_v1 = vmul.f32 0.01, %v2732_v22  ;;  %v6743_v11 = vsub.f32 %v5594_v42, %v5928_v2 }
 0x33e   : > { %4312 = vst [vmem:[%s6586_s3 + $0x8] sm:$0xff] %v4070_v12   ;;  %v3030_v21 = vsel %vm2830_vm5, %v2730_v46, %v2930_v33  ;;  %v6744_v43 = vsub.f32 %v5599_v51, %v5928_v2  ;;  %v6745_v40 = vsub.f32 %v5604_v52, %v5928_v2  ;;  %v6746_v42 = vsub.f32 %v5609_v56, %v5928_v2 }
 0x33f   : > { %v2733_v26 = vmul.f32 %v6072_v34, %v6743_v11  ;;  %v4075_v59 = vpack.c.bf16 %v3030_v21, %v3029_v19  ;;  %v3031_v24 = vsel %vm2831_vm6, %v2731_v39, %v2931_v17  ;;  %v3032_v18 = vsel %vm2832_vm7, %v2732_v22, %v2932_v1 }
 0x340   : > { %v2734_v5 = vmul.f32 %v6072_v34, %v6744_v43  ;;  %v2735_v30 = vmul.f32 %v6072_v34, %v6745_v40  ;;  %v2736_v48 = vmul.f32 %v6072_v34, %v6746_v42  ;;  %v4080_v12 = vpack.c.bf16 %v3032_v18, %v3031_v24 }
 0x341   : > { %vm2833_vm8 = vcmp.ge.f32.partialorder %v2733_v26, 0.0  ;;  %v2933_v46 = vmul.f32 0.01, %v2733_v26  ;;  %4313 = vst [vmem:[%s6586_s3 + $0x10] sm:$0xff] %v4075_v59   ;;  %v6747_v1 = vsub.f32 %v5614_v54, %v5928_v2  ;;  %v6748_v22 = vsub.f32 %v5619_v61, %v5928_v2 }
 0x342   : > { %vm2834_vm9 = vcmp.ge.f32.partialorder %v2734_v5, 0.0  ;;  %v2934_v51 = vmul.f32 0.01, %v2734_v5  ;;  %vm2835_vm10 = vcmp.ge.f32.partialorder %v2735_v30, 0.0  ;;  %vm2836_vm11 = vcmp.ge.f32.partialorder %v2736_v48, 0.0  ;;  %4314 = vst [vmem:[%s6586_s3 + $0x18] sm:$0xff] %v4080_v12  }
 0x343   : > { %v2935_v52 = vmul.f32 0.01, %v2735_v30  ;;  %v2936_v27 = vmul.f32 0.01, %v2736_v48  ;;  %v3033_v56 = vsel %vm2833_vm8, %v2733_v26, %v2933_v46  ;;  %v2737_v39 = vmul.f32 %v6072_v34, %v6747_v1 }
 0x344   : > { %v3034_v17 = vsel %vm2834_vm9, %v2734_v5, %v2934_v51  ;;  %v2738_v35 = vmul.f32 %v6072_v34, %v6748_v22  ;;  %v6749_v19 = vsub.f32 %v5624_v4, %v5928_v2  ;;  %v6750_v61 = vsub.f32 %v5629_v9, %v5928_v2 }
 0x345   : > { %v4085_v32 = vpack.c.bf16 %v3034_v17, %v3033_v56  ;;  %v3035_v20 = vsel %vm2835_vm10, %v2735_v30, %v2935_v52  ;;  %v3036_v33 = vsel %vm2836_vm11, %v2736_v48, %v2936_v27  ;;  %vm2837_vm12 = vcmp.ge.f32.partialorder %v2737_v39, 0.0 }
 0x346   : > { %v2739_v11 = vmul.f32 %v6072_v34, %v6749_v19  ;;  %v4090_v26 = vpack.c.bf16 %v3036_v33, %v3035_v20  ;;  %vm2838_vm13 = vcmp.ge.f32.partialorder %v2738_v35, 0.0  ;;  %v2937_v21 = vmul.f32 0.01, %v2737_v39 }
 0x347   : > { %4315 = vst [vmem:[%s6586_s3 + $0x20] sm:$0xff] %v4085_v32   ;;  %v2938_v54 = vmul.f32 0.01, %v2738_v35  ;;  %v2740_v43 = vmul.f32 %v6072_v34, %v6750_v61  ;;  %v6751_v40 = vsub.f32 %v5634_v3, %v5928_v2  ;;  %v6752_v42 = vsub.f32 %v5639_v15, %v5928_v2 }
 0x348   : > { %vm2839_vm14 = vcmp.ge.f32.partialorder %v2739_v11, 0.0  ;;  %v2939_v5 = vmul.f32 0.01, %v2739_v11  ;;  %4316 = vst [vmem:[%s6586_s3 + $0x28] sm:$0xff] %v4090_v26   ;;  %v3037_v4 = vsel %vm2837_vm12, %v2737_v39, %v2937_v21  ;;  %v6753_v9 = vsub.f32 %v5644_v6, %v5928_v2 }
 0x349   : > { %v2741_v30 = vmul.f32 %v6072_v34, %v6751_v40  ;;  %v2742_v48 = vmul.f32 %v6072_v34, %v6752_v42  ;;  %v3038_v24 = vsel %vm2838_vm13, %v2738_v35, %v2938_v54  ;;  %vm2840_vm15 = vcmp.ge.f32.partialorder %v2740_v43, 0.0 }
 0x34a   : > { %v2743_v59 = vmul.f32 %v6072_v34, %v6753_v9  ;;  %v2940_v18 = vmul.f32 0.01, %v2740_v43  ;;  %v3039_v12 = vsel %vm2839_vm14, %v2739_v11, %v2939_v5  ;;  %v4095_v46 = vpack.c.bf16 %v3038_v24, %v3037_v4 }
 0x34b   : > { %vm2841_vm0 = vcmp.ge.f32.partialorder %v2741_v30, 0.0  ;;  %vm2842_vm1 = vcmp.ge.f32.partialorder %v2742_v48, 0.0  ;;  %v2941_v3 = vmul.f32 0.01, %v2741_v30  ;;  %v2942_v52 = vmul.f32 0.01, %v2742_v48 }
 0x34c   : > { %v3040_v51 = vsel %vm2840_vm15, %v2740_v43, %v2940_v18  ;;  %v6754_v15 = vsub.f32 %v5649_v25, %v5928_v2  ;;  %vm2843_vm2 = vcmp.ge.f32.partialorder %v2743_v59, 0.0  ;;  %4317 = vst [vmem:[%s6586_s3 + $0x30] sm:$0xff] %v4095_v46   ;;  %v2943_v17 = vmul.f32 0.01, %v2743_v59 }
 0x34d   : > { %v4100_v6 = vpack.c.bf16 %v3040_v51, %v3039_v12  ;;  %v3041_v56 = vsel %vm2841_vm0, %v2741_v30, %v2941_v3  ;;  %v6755_v1 = vsub.f32 %v5654_v28, %v5928_v2  ;;  %v3042_v22 = vsel %vm2842_vm1, %v2742_v48, %v2942_v52 }
 0x34e   : > { %v2744_v27 = vmul.f32 %v6072_v34, %v6754_v15  ;;  %v6756_v25 = vsub.f32 %v5659_v37, %v5928_v2  ;;  %v4105_v20 = vpack.c.bf16 %v3042_v22, %v3041_v56  ;;  %v3043_v33 = vsel %vm2843_vm2, %v2743_v59, %v2943_v17 }
 0x34f   : > { %v2745_v39 = vmul.f32 %v6072_v34, %v6755_v1  ;;  %4318 = vst [vmem:[%s6586_s3 + $0x38] sm:$0xff] %v4100_v6   ;;  %v6757_v26 = vsub.f32 %v5664_v38, %v5928_v2  ;;  %v6758_v61 = vsub.f32 %v5669_v44, %v5928_v2  ;;  %v6759_v5 = vsub.f32 %v5674_v49, %v5928_v2 }
 0x350   : > { %vm2844_vm3 = vcmp.ge.f32.partialorder %v2744_v27, 0.0  ;;  %v2944_v35 = vmul.f32 0.01, %v2744_v27  ;;  %v2746_v32 = vmul.f32 %v6072_v34, %v6756_v25  ;;  %4319 = vst [vmem:[%s6586_s3 + $0x40] sm:$0xff] %v4105_v20   ;;  %v6760_v30 = vsub.f32 %v5679_v57, %v5928_v2 }
 0x351   : > { %vm2845_vm4 = vcmp.ge.f32.partialorder %v2745_v39, 0.0  ;;  %v2945_v19 = vmul.f32 0.01, %v2745_v39  ;;  %v2747_v21 = vmul.f32 %v6072_v34, %v6757_v26  ;;  %v2748_v43 = vmul.f32 %v6072_v34, %v6758_v61 }
 0x352   : > { %v3044_v11 = vsel %vm2844_vm3, %v2744_v27, %v2944_v35  ;;  %vm2846_vm5 = vcmp.ge.f32.partialorder %v2746_v32, 0.0  ;;  %v2946_v28 = vmul.f32 0.01, %v2746_v32  ;;  %v2749_v4 = vmul.f32 %v6072_v34, %v6759_v5 }
 0x353   : > { %v4110_v37 = vpack.c.bf16 %v3044_v11, %v3043_v33  ;;  %v3045_v54 = vsel %vm2845_vm4, %v2745_v39, %v2945_v19  ;;  %vm2847_vm6 = vcmp.ge.f32.partialorder %v2747_v21, 0.0  ;;  %v2947_v38 = vmul.f32 0.01, %v2747_v21 }
 0x354   : > { %v3046_v40 = vsel %vm2846_vm5, %v2746_v32, %v2946_v28  ;;  %v2750_v42 = vmul.f32 %v6072_v34, %v6760_v30  ;;  %vm2848_vm7 = vcmp.ge.f32.partialorder %v2748_v43, 0.0  ;;  %v2948_v48 = vmul.f32 0.01, %v2748_v43 }
 0x355   : > { %4320 = vst [vmem:[%s6586_s3 + $0x48] sm:$0xff] %v4110_v37   ;;  %v4115_v44 = vpack.c.bf16 %v3046_v40, %v3045_v54  ;;  %vm2849_vm8 = vcmp.ge.f32.partialorder %v2749_v4, 0.0  ;;  %v3047_v9 = vsel %vm2847_vm6, %v2747_v21, %v2947_v38  ;;  %v2949_v49 = vmul.f32 0.01, %v2749_v4 }
 0x356   : > { %vm2850_vm9 = vcmp.ge.f32.partialorder %v2750_v42, 0.0  ;;  %v2950_v59 = vmul.f32 0.01, %v2750_v42  ;;  %v3048_v24 = vsel %vm2848_vm7, %v2748_v43, %v2948_v48  ;;  %v6761_v57 = vsub.f32 %v5684_v62, %v5928_v2 }
 0x357   : > { %4321 = vst [vmem:[%s6586_s3 + $0x50] sm:$0xff] %v4115_v44   ;;  %v6762_v12 = vsub.f32 %v5689_v0, %v5928_v2  ;;  %v6763_v3 = vsub.f32 %v5694_v13, %v5928_v2  ;;  %v4120_v52 = vpack.c.bf16 %v3048_v24, %v3047_v9  ;;  %v3049_v15 = vsel %vm2849_vm8, %v2749_v4, %v2949_v49 }
 0x358   : > { %v2751_v18 = vmul.f32 %v6072_v34, %v6761_v57  ;;  %v3050_v27 = vsel %vm2850_vm9, %v2750_v42, %v2950_v59  ;;  %v6764_v6 = vsub.f32 %v5699_v31, %v5928_v2  ;;  %v6765_v39 = vsub.f32 %v5704_v23, %v5928_v2 }
 0x359   : > { %v2752_v46 = vmul.f32 %v6072_v34, %v6762_v12  ;;  %v2753_v51 = vmul.f32 %v6072_v34, %v6763_v3  ;;  %v4125_v56 = vpack.c.bf16 %v3050_v27, %v3049_v15  ;;  %4322 = vst [vmem:[%s6586_s3 + $0x58] sm:$0xff] %v4120_v52   ;;  %v6766_v35 = vsub.f32 %v5709_v29, %v5928_v2 }
 0x35a   : > { %v2754_v62 = vmul.f32 %v6072_v34, %v6764_v6  ;;  %vm2851_vm10 = vcmp.ge.f32.partialorder %v2751_v18, 0.0  ;;  %v2951_v17 = vmul.f32 0.01, %v2751_v18  ;;  %v2755_v22 = vmul.f32 %v6072_v34, %v6765_v39 }
 0x35b   : > { %vm2852_vm11 = vcmp.ge.f32.partialorder %v2752_v46, 0.0  ;;  %v2952_v0 = vmul.f32 0.01, %v2752_v46  ;;  %vm2853_vm12 = vcmp.ge.f32.partialorder %v2753_v51, 0.0  ;;  %v2953_v13 = vmul.f32 0.01, %v2753_v51 }
 0x35c   : > { %vm2854_vm13 = vcmp.ge.f32.partialorder %v2754_v62, 0.0  ;;  %4323 = vst [vmem:[%s6586_s3 + $0x60] sm:$0xff] %v4125_v56   ;;  %v3051_v1 = vsel %vm2851_vm10, %v2751_v18, %v2951_v17  ;;  %v2954_v31 = vmul.f32 0.01, %v2754_v62  ;;  %v2756_v25 = vmul.f32 %v6072_v34, %v6766_v35 }
 0x35d   : > { %v3052_v32 = vsel %vm2852_vm11, %v2752_v46, %v2952_v0  ;;  %v3053_v20 = vsel %vm2853_vm12, %v2753_v51, %v2953_v13  ;;  %v6767_v33 = vsub.f32 %v5714_v36, %v5928_v2  ;;  %v6768_v11 = vsub.f32 %v5719_v41, %v5928_v2 }
 0x35e   : > { %v4130_v23 = vpack.c.bf16 %v3052_v32, %v3051_v1  ;;  %v3054_v26 = vsel %vm2854_vm13, %v2754_v62, %v2954_v31  ;;  %vm2855_vm14 = vcmp.ge.f32.partialorder %v2755_v22, 0.0  ;;  %vm2856_vm15 = vcmp.ge.f32.partialorder %v2756_v25, 0.0 }
 0x35f   : > { %v2757_v19 = vmul.f32 %v6072_v34, %v6767_v33  ;;  %v2758_v28 = vmul.f32 %v6072_v34, %v6768_v11  ;;  %v4135_v21 = vpack.c.bf16 %v3054_v26, %v3053_v20  ;;  %v2955_v29 = vmul.f32 0.01, %v2755_v22 }
 0x360   : > { %v2956_v37 = vmul.f32 0.01, %v2756_v25  ;;  %4324 = vst [vmem:[%s6586_s3 + $0x68] sm:$0xff] %v4130_v23   ;;  %v6769_v41 = vsub.f32 %v5724_v50, %v5928_v2  ;;  %v6770_v4 = vsub.f32 %v5729_v60, %v5928_v2  ;;  %v6771_v38 = vsub.f32 %v5734_v7, %v5928_v2  ;;  %v6782_v23 = vld [vmem:[#allocation13_spill] sm:$0xff] }
 0x361   : > { %vm2857_vm0 = vcmp.ge.f32.partialorder %v2757_v19, 0.0  ;;  %vm2858_vm1 = vcmp.ge.f32.partialorder %v2758_v28, 0.0  ;;  %v2957_v36 = vmul.f32 0.01, %v2757_v19  ;;  %v2958_v54 = vmul.f32 0.01, %v2758_v28 }
 0x362   : > { %v2759_v61 = vmul.f32 %v6072_v34, %v6769_v41  ;;  %4325 = vst [vmem:[%s6586_s3 + $0x70] sm:$0xff] %v4135_v21   ;;  %v3055_v43 = vsel %vm2855_vm14, %v2755_v22, %v2955_v29  ;;  %v3056_v5 = vsel %vm2856_vm15, %v2756_v25, %v2956_v37  ;;  %v2760_v40 = vmul.f32 %v6072_v34, %v6770_v4 }
 0x363   : > { %v2761_v30 = vmul.f32 %v6072_v34, %v6771_v38  ;;  %v4140_v42 = vpack.c.bf16 %v3056_v5, %v3055_v43  ;;  %v3057_v50 = vsel %vm2857_vm0, %v2757_v19, %v2957_v36  ;;  %v3058_v44 = vsel %vm2858_vm1, %v2758_v28, %v2958_v54  ;;  %v6784_v38 = vld [vmem:[#allocation14_spill] sm:$0xff] }
 0x364   : > { %vm2859_vm2 = vcmp.ge.f32.partialorder %v2759_v61, 0.0  ;;  %v4145_v48 = vpack.c.bf16 %v3058_v44, %v3057_v50  ;;  %vm2860_vm3 = vcmp.ge.f32.partialorder %v2760_v40, 0.0  ;;  %v2959_v9 = vmul.f32 0.01, %v2759_v61  ;;  %v6786_v50 = vld [vmem:[#allocation15_spill] sm:$0xff] }
 0x365   : > { %v2960_v49 = vmul.f32 0.01, %v2760_v40  ;;  %4326 = vst [vmem:[%s6586_s3 + $0x78] sm:$0xff] %v4140_v42   ;;  %v6772_v60 = vsub.f32 %v6698_v16, %v5928_v2  ;;  %vm2861_vm4 = vcmp.ge.f32.partialorder %v2761_v30, 0.0  ;;  %v2961_v7 = vmul.f32 0.01, %v2761_v30 }
 0x366   : > { %v6773_v24 = vsub.f32 %v6699_v55, %v5928_v2  ;;  %4327 = vst [vmem:[%s6586_s3 + $0x80] sm:$0xff] %v4145_v48   ;;  %v3059_v18 = vsel %vm2859_vm2, %v2759_v61, %v2959_v9  ;;  %v6774_v46 = vsub.f32 %v6700_v10, %v5928_v2  ;;  %v6775_v3 = vsub.f32 %v6701_v8, %v5928_v2 }
 0x367   : > { %v2762_v59 = vmul.f32 %v6072_v34, %v6772_v60  ;;  %v3060_v12 = vsel %vm2860_vm3, %v2760_v40, %v2960_v49  ;;  %v3061_v15 = vsel %vm2861_vm4, %v2761_v30, %v2961_v7  ;;  %v6776_v62 = vsub.f32 %v6702_v47, %v5928_v2  ;;  %v6788_v49 = vld [vmem:[#allocation16_spill] sm:$0xff]  ;;  %v6790_v7 = vld [vmem:[#allocation17_spill] sm:$0xff] }
 0x368   : > { %v2763_v57 = vmul.f32 %v6072_v34, %v6773_v24  ;;  %v2764_v16 = vmul.f32 %v6072_v34, %v6774_v46  ;;  %v2765_v51 = vmul.f32 %v6072_v34, %v6775_v3  ;;  %v4150_v52 = vpack.c.bf16 %v3060_v12, %v3059_v18  ;;  %v6792_v18 = vld [vmem:[#allocation18_spill] sm:$0xff] }
 0x369   : > { %vm2862_vm5 = vcmp.ge.f32.partialorder %v2762_v59, 0.0  ;;  %v2962_v55 = vmul.f32 0.01, %v2762_v59  ;;  %v2766_v8 = vmul.f32 %v6072_v34, %v6776_v62  ;;  %v6777_v1 = vsub.f32 %v6703_v63, %v5928_v2 }
 0x36a   : > { %vm2863_vm6 = vcmp.ge.f32.partialorder %v2763_v57, 0.0  ;;  %vm2864_vm7 = vcmp.ge.f32.partialorder %v2764_v16, 0.0  ;;  %v2963_v27 = vmul.f32 0.01, %v2763_v57  ;;  %v2964_v6 = vmul.f32 0.01, %v2764_v16 }
 0x36b   : > { %4328 = vst [vmem:[%s6586_s3 + $0x88] sm:$0xff] %v4150_v52   ;;  %v3062_v10 = vsel %vm2862_vm5, %v2762_v59, %v2962_v55  ;;  %vm2865_vm8 = vcmp.ge.f32.partialorder %v2765_v51, 0.0  ;;  %v2965_v56 = vmul.f32 0.01, %v2765_v51  ;;  %v2767_v31 = vmul.f32 %v6072_v34, %v6777_v1 }
 0x36c   : > { %v4155_v17 = vpack.c.bf16 %v3062_v10, %v3061_v15  ;;  %v3063_v0 = vsel %vm2863_vm6, %v2763_v57, %v2963_v27  ;;  %v3064_v13 = vsel %vm2864_vm7, %v2764_v16, %v2964_v6  ;;  %vm2866_vm9 = vcmp.ge.f32.partialorder %v2766_v8, 0.0  ;;  %v6794_v27 = vld [vmem:[#allocation19_spill] sm:$0xff] }
 0x36d   : > { %v4160_v39 = vpack.c.bf16 %v3064_v13, %v3063_v0  ;;  %v2966_v22 = vmul.f32 0.01, %v2766_v8  ;;  %v3065_v35 = vsel %vm2865_vm8, %v2765_v51, %v2965_v56  ;;  %v6778_v47 = vsub.f32 %v6704_v53, %v5928_v2 }
 0x36e   : > { %4329 = vst [vmem:[%s6586_s3 + $0x90] sm:$0xff] %v4155_v17   ;;  %vm2867_vm10 = vcmp.ge.f32.partialorder %v2767_v31, 0.0  ;;  %v2967_v32 = vmul.f32 0.01, %v2767_v31  ;;  %v6779_v63 = vsub.f32 %v6705_v58, %v5928_v2  ;;  %v6780_v19 = vsub.f32 %v6706_v14, %v5928_v2  ;;  %v6796_v17 = vld [vmem:[#allocation20_spill] sm:$0xff] }
 0x36f   : > { %v2768_v25 = vmul.f32 %v6072_v34, %v6778_v47  ;;  %4330 = vst [vmem:[%s6586_s3 + $0x98] sm:$0xff] %v4160_v39   ;;  %v3066_v33 = vsel %vm2866_vm9, %v2766_v8, %v2966_v22  ;;  %v6781_v53 = vsub.f32 %v6707_v45, %v5928_v2  ;;  %v6783_v58 = vsub.f32 %v6782_v23, %v5928_v2  ;;  %v6798_v47 = vld [vmem:[#allocation21_spill] sm:$0xff] }
 0x370   : > { %v2769_v20 = vmul.f32 %v6072_v34, %v6779_v63  ;;  %v2770_v11 = vmul.f32 %v6072_v34, %v6780_v19  ;;  %v4165_v21 = vpack.c.bf16 %v3066_v33, %v3065_v35  ;;  %v3067_v37 = vsel %vm2867_vm10, %v2767_v31, %v2967_v32  ;;  %v6800_v33 = vld [vmem:[#allocation22_spill] sm:$0xff] }
 0x371   : > { %v2771_v28 = vmul.f32 %v6072_v34, %v6781_v53  ;;  %v2772_v26 = vmul.f32 %v6072_v34, %v6783_v58  ;;  %vm2868_vm11 = vcmp.ge.f32.partialorder %v2768_v25, 0.0  ;;  %v2968_v29 = vmul.f32 0.01, %v2768_v25  ;;  %v6802_v53 = vld [vmem:[#allocation23_spill] sm:$0xff] }
 0x372   : > { %vm2869_vm12 = vcmp.ge.f32.partialorder %v2769_v20, 0.0  ;;  %vm2870_vm13 = vcmp.ge.f32.partialorder %v2770_v11, 0.0  ;;  %v2969_v36 = vmul.f32 0.01, %v2769_v20  ;;  %v2970_v14 = vmul.f32 0.01, %v2770_v11 }
 0x373   : > { %4331 = vst [vmem:[%s6586_s3 + $0xa0] sm:$0xff] %v4165_v21   ;;  %v3068_v45 = vsel %vm2868_vm11, %v2768_v25, %v2968_v29  ;;  %vm2871_vm14 = vcmp.ge.f32.partialorder %v2771_v28, 0.0  ;;  %vm2872_vm15 = vcmp.ge.f32.partialorder %v2772_v26, 0.0  ;;  %v2971_v54 = vmul.f32 0.01, %v2771_v28  ;;  %v6804_v21 = vld [vmem:[#allocation24_spill] sm:$0xff] }
 0x374   : > { %v4170_v41 = vpack.c.bf16 %v3068_v45, %v3067_v37  ;;  %v3069_v61 = vsel %vm2869_vm12, %v2769_v20, %v2969_v36  ;;  %v3070_v43 = vsel %vm2870_vm13, %v2770_v11, %v2970_v14  ;;  %v2972_v5 = vmul.f32 0.01, %v2772_v26 }
 0x375   : > { %v4175_v4 = vpack.c.bf16 %v3070_v43, %v3069_v61  ;;  %v3071_v40 = vsel %vm2871_vm14, %v2771_v28, %v2971_v54  ;;  %v6785_v30 = vsub.f32 %v6784_v38, %v5928_v2  ;;  %v6787_v44 = vsub.f32 %v6786_v50, %v5928_v2  ;;  %v6808_v38 = vld [vmem:[#allocation26_spill] sm:$0xff] }
 0x376   : > { %4332 = vst [vmem:[%s6586_s3 + $0xa8] sm:$0xff] %v4170_v41   ;;  %v3072_v9 = vsel %vm2872_vm15, %v2772_v26, %v2972_v5  ;;  %v6789_v60 = vsub.f32 %v6788_v49, %v5928_v2  ;;  %v6791_v24 = vsub.f32 %v6790_v7, %v5928_v2  ;;  %v6793_v12 = vsub.f32 %v6792_v18, %v5928_v2  ;;  %v6806_v41 = vld [vmem:[#allocation25_spill] sm:$0xff]  ;;  %v6812_v18 = vld [vmem:[#allocation28_spill] sm:$0xff] }
 0x377   : > { %v2773_v42 = vmul.f32 %v6072_v34, %v6785_v30  ;;  %v2774_v48 = vmul.f32 %v6072_v34, %v6787_v44  ;;  %4333 = vst [vmem:[%s6586_s3 + $0xb0] sm:$0xff] %v4175_v4   ;;  %v4180_v16 = vpack.c.bf16 %v3072_v9, %v3071_v40  ;;  %v6795_v6 = vsub.f32 %v6794_v27, %v5928_v2 }
 0x378   : > { %v2775_v59 = vmul.f32 %v6072_v34, %v6789_v60  ;;  %v2776_v57 = vmul.f32 %v6072_v34, %v6791_v24  ;;  %v2777_v46 = vmul.f32 %v6072_v34, %v6793_v12  ;;  %v6797_v0 = vsub.f32 %v6796_v17, %v5928_v2 }
 0x379   : > { %vm2873_vm0 = vcmp.ge.f32.partialorder %v2773_v42, 0.0  ;;  %vm2874_vm1 = vcmp.ge.f32.partialorder %v2774_v48, 0.0  ;;  %v2973_v3 = vmul.f32 0.01, %v2773_v42  ;;  %v2974_v51 = vmul.f32 0.01, %v2774_v48 }
 0x37a   : > { %vm2875_vm2 = vcmp.ge.f32.partialorder %v2775_v59, 0.0  ;;  %vm2876_vm3 = vcmp.ge.f32.partialorder %v2776_v57, 0.0  ;;  %v2975_v52 = vmul.f32 0.01, %v2775_v59  ;;  %4334 = vst [vmem:[%s6586_s3 + $0xb8] sm:$0xff] %v4180_v16   ;;  %v2778_v10 = vmul.f32 %v6072_v34, %v6795_v6 }
 0x37b   : > { %v3073_v55 = vsel %vm2873_vm0, %v2773_v42, %v2973_v3  ;;  %v2976_v15 = vmul.f32 0.01, %v2776_v57  ;;  %vm2877_vm4 = vcmp.ge.f32.partialorder %v2777_v46, 0.0  ;;  %v3074_v62 = vsel %vm2874_vm1, %v2774_v48, %v2974_v51  ;;  %v6810_v48 = vld [vmem:[#allocation27_spill] sm:$0xff]  ;;  %v6814_v51 = vld [vmem:[#allocation29_spill] sm:$0xff] }
 0x37c   : > { %v3075_v8 = vsel %vm2875_vm2, %v2775_v59, %v2975_v52  ;;  %v2977_v56 = vmul.f32 0.01, %v2777_v46  ;;  %v2779_v13 = vmul.f32 %v6072_v34, %v6797_v0  ;;  %v4185_v1 = vpack.c.bf16 %v3074_v62, %v3073_v55 }
 0x37d   : > { %v3076_v31 = vsel %vm2876_vm3, %v2776_v57, %v2976_v15  ;;  %vm2878_vm5 = vcmp.ge.f32.partialorder %v2778_v10, 0.0  ;;  %v2978_v39 = vmul.f32 0.01, %v2778_v10  ;;  %v6799_v25 = vsub.f32 %v6798_v47, %v5928_v2  ;;  %v6816_v15 = vld [vmem:[#allocation30_spill] sm:$0xff] }
 0x37e   : > { %v4190_v22 = vpack.c.bf16 %v3076_v31, %v3075_v8  ;;  %v3077_v35 = vsel %vm2877_vm4, %v2777_v46, %v2977_v56  ;;  %vm2879_vm6 = vcmp.ge.f32.partialorder %v2779_v13, 0.0  ;;  %4335 = vst [vmem:[%s6586_s3 + $0xc0] sm:$0xff] %v4185_v1   ;;  %v2979_v20 = vmul.f32 0.01, %v2779_v13  ;;  %v6818_v8 = vld [vmem:[#allocation31_spill] sm:$0xff] }
 0x37f   : > { %v2780_v32 = vmul.f32 %v6072_v34, %v6799_v25  ;;  %v3078_v63 = vsel %vm2878_vm5, %v2778_v10, %v2978_v39  ;;  %v6801_v19 = vsub.f32 %v6800_v33, %v5928_v2  ;;  %v6803_v28 = vsub.f32 %v6802_v53, %v5928_v2  ;;  %v6824_v33 = vld [vmem:[#allocation34_spill] sm:$0xff] }
 0x380   : > { %4336 = vst [vmem:[%s6586_s3 + $0xc8] sm:$0xff] %v4190_v22   ;;  %v4195_v58 = vpack.c.bf16 %v3078_v63, %v3077_v35  ;;  %v6805_v29 = vsub.f32 %v6804_v21, %v5928_v2  ;;  %v3079_v36 = vsel %vm2879_vm6, %v2779_v13, %v2979_v20  ;;  %v6807_v61 = vsub.f32 %v6806_v41, %v5928_v2  ;;  %v6820_v35 = vld [vmem:[#allocation32_spill] sm:$0xff] }
 0x381   : > { %v2781_v11 = vmul.f32 %v6072_v34, %v6801_v19  ;;  %v2782_v23 = vmul.f32 %v6072_v34, %v6803_v28  ;;  %vm2880_vm7 = vcmp.ge.f32.partialorder %v2780_v32, 0.0  ;;  %v2980_v26 = vmul.f32 0.01, %v2780_v32  ;;  %v6828_v41 = vld [vmem:[#allocation36_spill] sm:$0xff] }
 0x382   : > { %v2783_v37 = vmul.f32 %v6072_v34, %v6805_v29  ;;  %4337 = vst [vmem:[%s6586_s3 + $0xd0] sm:$0xff] %v4195_v58   ;;  %v2784_v43 = vmul.f32 %v6072_v34, %v6807_v61  ;;  %v6809_v30 = vsub.f32 %v6808_v38, %v5928_v2  ;;  %v6811_v9 = vsub.f32 %v6810_v48, %v5928_v2  ;;  %v6826_v58 = vld [vmem:[#allocation35_spill] sm:$0xff] }
 0x383   : > { %vm2881_vm8 = vcmp.ge.f32.partialorder %v2781_v11, 0.0  ;;  %vm2882_vm9 = vcmp.ge.f32.partialorder %v2782_v23, 0.0  ;;  %v2981_v14 = vmul.f32 0.01, %v2781_v11  ;;  %v3080_v45 = vsel %vm2880_vm7, %v2780_v32, %v2980_v26  ;;  %v6822_v32 = vld [vmem:[#allocation33_spill] sm:$0xff]  ;;  %v6834_v48 = vld [vmem:[#allocation39_spill] sm:$0xff] }
 0x384   : > { %v2982_v54 = vmul.f32 0.01, %v2782_v23  ;;  %vm2883_vm10 = vcmp.ge.f32.partialorder %v2783_v37, 0.0  ;;  %v4200_v5 = vpack.c.bf16 %v3080_v45, %v3079_v36  ;;  %v2983_v40 = vmul.f32 0.01, %v2783_v37 }
 0x385   : > { %v3081_v4 = vsel %vm2881_vm8, %v2781_v11, %v2981_v14  ;;  %v2785_v42 = vmul.f32 %v6072_v34, %v6809_v30  ;;  %vm2884_vm11 = vcmp.ge.f32.partialorder %v2784_v43, 0.0  ;;  %v2984_v44 = vmul.f32 0.01, %v2784_v43 }
 0x386   : > { %v3082_v50 = vsel %vm2882_vm9, %v2782_v23, %v2982_v54  ;;  %v2786_v49 = vmul.f32 %v6072_v34, %v6811_v9  ;;  %4338 = vst [vmem:[%s6586_s3 + $0xd8] sm:$0xff] %v4200_v5   ;;  %v3083_v59 = vsel %vm2883_vm10, %v2783_v37, %v2983_v40  ;;  %v6813_v12 = vsub.f32 %v6812_v18, %v5928_v2  ;;  %v6830_v5 = vld [vmem:[#allocation37_spill] sm:$0xff] }
 0x387   : > { %v4205_v60 = vpack.c.bf16 %v3082_v50, %v3081_v4  ;;  %vm2885_vm12 = vcmp.ge.f32.partialorder %v2785_v42, 0.0  ;;  %v2985_v7 = vmul.f32 0.01, %v2785_v42  ;;  %v3084_v24 = vsel %vm2884_vm11, %v2784_v43, %v2984_v44 }
 0x388   : > { %vm2886_vm13 = vcmp.ge.f32.partialorder %v2786_v49, 0.0  ;;  %v2986_v57 = vmul.f32 0.01, %v2786_v49  ;;  %v2787_v46 = vmul.f32 %v6072_v34, %v6813_v12  ;;  %v4210_v16 = vpack.c.bf16 %v3084_v24, %v3083_v59 }
 0x389   : > { %4339 = vst [vmem:[%s6586_s3 + $0xe0] sm:$0xff] %v4205_v60   ;;  %v3085_v3 = vsel %vm2885_vm12, %v2785_v42, %v2985_v7  ;;  %v6815_v52 = vsub.f32 %v6814_v51, %v5928_v2  ;;  %v6817_v27 = vsub.f32 %v6816_v15, %v5928_v2  ;;  %v6819_v56 = vsub.f32 %v6818_v8, %v5928_v2  ;;  %v6832_v42 = vld [vmem:[#allocation38_spill] sm:$0xff]  ;;  %v4880_v15 = vld [vmem:[#allocation2 + $0x260] sm:$0xff] }
 0x38a   : > { %v3086_v10 = vsel %vm2886_vm13, %v2786_v49, %v2986_v57  ;;  %vm2887_vm14 = vcmp.ge.f32.partialorder %v2787_v46, 0.0  ;;  %v2987_v62 = vmul.f32 0.01, %v2787_v46  ;;  %4340 = vst [vmem:[%s6586_s3 + $0xe8] sm:$0xff] %v4210_v16   ;;  %v6821_v47 = vsub.f32 %v6820_v35, %v5928_v2  ;;  %v4883_v35 = vld [vmem:[#allocation2 + $0x278] sm:$0xff] }
 0x38b   : > { %v2788_v55 = vmul.f32 %v6072_v34, %v6815_v52  ;;  %v2789_v6 = vmul.f32 %v6072_v34, %v6817_v27  ;;  %v2790_v17 = vmul.f32 %v6072_v34, %v6819_v56  ;;  %v4215_v0 = vpack.c.bf16 %v3086_v10, %v3085_v3  ;;  %v4879_v52 = vld [vmem:[#allocation2 + $0x258] sm:$0xff] }
 0x38c   : > { %v3087_v1 = vsel %vm2887_vm14, %v2787_v46, %v2987_v62  ;;  %v2791_v25 = vmul.f32 %v6072_v34, %v6821_v47  ;;  %v6823_v63 = vsub.f32 %v6822_v32, %v5928_v2  ;;  %v6825_v19 = vsub.f32 %v6824_v33, %v5928_v2  ;;  %v4878_v46 = vld [vmem:[#allocation2 + $0x250] sm:$0xff] }
 0x38d   : > { %vm2888_vm15 = vcmp.ge.f32.partialorder %v2788_v55, 0.0  ;;  %v2988_v13 = vmul.f32 0.01, %v2788_v55  ;;  %vm2889_vm0 = vcmp.ge.f32.partialorder %v2789_v6, 0.0  ;;  %vm2890_vm1 = vcmp.ge.f32.partialorder %v2790_v17, 0.0  ;;  %4341 = vst [vmem:[%s6586_s3 + $0xf0] sm:$0xff] %v4215_v0  }
 0x38e   : > { %v2989_v31 = vmul.f32 0.01, %v2789_v6  ;;  %v2990_v39 = vmul.f32 0.01, %v2790_v17  ;;  %v2792_v20 = vmul.f32 %v6072_v34, %v6823_v63  ;;  %v2793_v11 = vmul.f32 %v6072_v34, %v6825_v19  ;;  %v4881_v0 = vld [vmem:[#allocation2 + $0x268] sm:$0xff] }
 0x38f   : > { %v3088_v22 = vsel %vm2888_vm15, %v2788_v55, %v2988_v13  ;;  %v6827_v26 = vsub.f32 %v6826_v58, %v5928_v2  ;;  %vm2891_vm2 = vcmp.ge.f32.partialorder %v2791_v25, 0.0  ;;  %v2991_v37 = vmul.f32 0.01, %v2791_v25 }
 0x390   : > { %v4220_v53 = vpack.c.bf16 %v3088_v22, %v3087_v1  ;;  %v3089_v28 = vsel %vm2889_vm0, %v2789_v6, %v2989_v31  ;;  %v3090_v23 = vsel %vm2890_vm1, %v2790_v17, %v2990_v39  ;;  %vm2892_vm3 = vcmp.ge.f32.partialorder %v2792_v20, 0.0  ;;  %v4882_v39 = vld [vmem:[#allocation2 + $0x270] sm:$0xff] }
 0x391   : > { %v2794_v21 = vmul.f32 %v6072_v34, %v6827_v26  ;;  %v4225_v29 = vpack.c.bf16 %v3090_v23, %v3089_v28  ;;  %v2992_v36 = vmul.f32 0.01, %v2792_v20  ;;  %vm2893_vm4 = vcmp.ge.f32.partialorder %v2793_v11, 0.0  ;;  %v4884_v28 = vld [vmem:[#allocation2 + $0x280] sm:$0xff] }
 0x392   : > { %4342 = vst [vmem:[%s6586_s3 + $0xf8] sm:$0xff] %v4220_v53   ;;  %v2993_v14 = vmul.f32 0.01, %v2793_v11  ;;  %v3091_v45 = vsel %vm2891_vm2, %v2791_v25, %v2991_v37  ;;  %v6829_v61 = vsub.f32 %v6828_v41, %v5928_v2  ;;  %v6831_v4 = vsub.f32 %v6830_v5, %v5928_v2  ;;  %v4886_v41 = vld [vmem:[#allocation2 + $0x290] sm:$0xff] }
 0x393   : > { %vm2894_vm5 = vcmp.ge.f32.partialorder %v2794_v21, 0.0  ;;  %4343 = vst [vmem:[%s6586_s3 + $0x100] sm:$0xff] %v4225_v29   ;;  %v2994_v54 = vmul.f32 0.01, %v2794_v21  ;;  %v3092_v38 = vsel %vm2892_vm3, %v2792_v20, %v2992_v36  ;;  %v6833_v50 = vsub.f32 %v6832_v42, %v5928_v2  ;;  %v4885_v36 = vld [vmem:[#allocation2 + $0x288] sm:$0xff] }
 0x394   : > { %v2795_v43 = vmul.f32 %v6072_v34, %v6829_v61  ;;  %v2796_v40 = vmul.f32 %v6072_v34, %v6831_v4  ;;  %v3093_v30 = vsel %vm2893_vm4, %v2793_v11, %v2993_v14  ;;  %v6835_v9 = vsub.f32 %v6834_v48, %v5928_v2 }
 0x395   : > { %v2797_v44 = vmul.f32 %v6072_v34, %v6833_v50  ;;  %v4230_v60 = vpack.c.bf16 %v3092_v38, %v3091_v45  ;;  %v3094_v59 = vsel %vm2894_vm5, %v2794_v21, %v2994_v54  ;;  %v2697_v16 = vsub.f32 %v4878_v46, %v5928_v2 }
 0x396   : > { %v2798_v49 = vmul.f32 %v6072_v34, %v6835_v9  ;;  %vm2895_vm6 = vcmp.ge.f32.partialorder %v2795_v43, 0.0  ;;  %vm2896_vm7 = vcmp.ge.f32.partialorder %v2796_v40, 0.0  ;;  %v4235_v7 = vpack.c.bf16 %v3094_v59, %v3093_v30  ;;  %v4888_v30 = vld [vmem:[#allocation2 + $0x2a0] sm:$0xff] }
 0x397   : > { %v2995_v24 = vmul.f32 0.01, %v2795_v43  ;;  %v2996_v57 = vmul.f32 0.01, %v2796_v40  ;;  %vm2897_vm8 = vcmp.ge.f32.partialorder %v2797_v44, 0.0  ;;  %4344 = vst [vmem:[%s6586_s3 + $0x108] sm:$0xff] %v4230_v60   ;;  %v2698_v55 = vsub.f32 %v4879_v52, %v5928_v2 }
 0x398   : > { %vm2898_vm9 = vcmp.ge.f32.partialorder %v2798_v49, 0.0  ;;  %v2997_v18 = vmul.f32 0.01, %v2797_v44  ;;  %v2998_v12 = vmul.f32 0.01, %v2798_v49  ;;  %4345 = vst [vmem:[%s6586_s3 + $0x110] sm:$0xff] %v4235_v7   ;;  %v2699_v27 = vsub.f32 %v4880_v15, %v5928_v2 }
 0x399   : > { %v3095_v3 = vsel %vm2895_vm6, %v2795_v43, %v2995_v24  ;;  %v3096_v51 = vsel %vm2896_vm7, %v2796_v40, %v2996_v57  ;;  %v2799_v8 = vmul.f32 %v6072_v34, %v2697_v16  ;;  %v2800_v17 = vmul.f32 %v6072_v34, %v2698_v55  ;;  %v4887_v43 = vld [vmem:[#allocation2 + $0x298] sm:$0xff]  ;;  %v4889_v60 = vld [vmem:[#allocation2 + $0x2a8] sm:$0xff]  ;;  %v4890_v15 = vld [vmem:[#allocation2 + $0x2b0] sm:$0xff] }
 0x39a   : > { %v4240_v6 = vpack.c.bf16 %v3096_v51, %v3095_v3  ;;  %v3097_v10 = vsel %vm2897_vm8, %v2797_v44, %v2997_v18  ;;  %v3098_v62 = vsel %vm2898_vm9, %v2798_v49, %v2998_v12  ;;  %v2700_v13 = vsub.f32 %v4881_v0, %v5928_v2 }
 0x39b   : > { %v4245_v56 = vpack.c.bf16 %v3098_v62, %v3097_v10  ;;  %v2801_v1 = vmul.f32 %v6072_v34, %v2699_v27  ;;  %vm2899_vm10 = vcmp.ge.f32.partialorder %v2799_v8, 0.0  ;;  %v2999_v31 = vmul.f32 0.01, %v2799_v8  ;;  %v4891_v62 = vld [vmem:[#allocation2 + $0x2b8] sm:$0xff] }
 0x39c   : > { %4346 = vst [vmem:[%s6586_s3 + $0x118] sm:$0xff] %v4240_v6   ;;  %v2701_v22 = vsub.f32 %v4882_v39, %v5928_v2  ;;  %v2702_v47 = vsub.f32 %v4883_v35, %v5928_v2  ;;  %vm2900_vm11 = vcmp.ge.f32.partialorder %v2800_v17, 0.0  ;;  %v3000_v25 = vmul.f32 0.01, %v2800_v17  ;;  %v4894_v39 = vld [vmem:[#allocation2 + $0x2d0] sm:$0xff] }
 0x39d   : > { %4347 = vst [vmem:[%s6586_s3 + $0x120] sm:$0xff] %v4245_v56   ;;  %v2802_v32 = vmul.f32 %v6072_v34, %v2700_v13  ;;  %vm2901_vm12 = vcmp.ge.f32.partialorder %v2801_v1, 0.0  ;;  %v3099_v63 = vsel %vm2899_vm10, %v2799_v8, %v2999_v31  ;;  %v3001_v20 = vmul.f32 0.01, %v2801_v1  ;;  %v4892_v56 = vld [vmem:[#allocation2 + $0x2c0] sm:$0xff] }
 0x39e   : > { %v2803_v33 = vmul.f32 %v6072_v34, %v2701_v22  ;;  %v2804_v19 = vmul.f32 %v6072_v34, %v2702_v47  ;;  %v3100_v11 = vsel %vm2900_vm11, %v2800_v17, %v3000_v25  ;;  %v2703_v23 = vsub.f32 %v4884_v28, %v5928_v2 }
 0x39f   : > { %vm2902_vm13 = vcmp.ge.f32.partialorder %v2802_v32, 0.0  ;;  %v3002_v53 = vmul.f32 0.01, %v2802_v32  ;;  %v4250_v58 = vpack.c.bf16 %v3100_v11, %v3099_v63  ;;  %v3101_v26 = vsel %vm2901_vm12, %v2801_v1, %v3001_v20  ;;  %v4893_v1 = vld [vmem:[#allocation2 + $0x2c8] sm:$0xff] }
 0x3a0   : > { %vm2903_vm14 = vcmp.ge.f32.partialorder %v2803_v33, 0.0  ;;  %vm2904_vm15 = vcmp.ge.f32.partialorder %v2804_v19, 0.0  ;;  %v3003_v29 = vmul.f32 0.01, %v2803_v33  ;;  %v3004_v37 = vmul.f32 0.01, %v2804_v19 }
 0x3a1   : > { %v3102_v21 = vsel %vm2902_vm13, %v2802_v32, %v3002_v53  ;;  %v2704_v14 = vsub.f32 %v4885_v36, %v5928_v2  ;;  %4348 = vst [vmem:[%s6586_s3 + $0x128] sm:$0xff] %v4250_v58   ;;  %v2805_v54 = vmul.f32 %v6072_v34, %v2703_v23  ;;  %v2705_v61 = vsub.f32 %v4886_v41, %v5928_v2  ;;  %v4895_v32 = vld [vmem:[#allocation2 + $0x2d8] sm:$0xff]  ;;  %v4896_v41 = vld [vmem:[#allocation2 + $0x2e0] sm:$0xff] }
 0x3a2   : > { %v4255_v45 = vpack.c.bf16 %v3102_v21, %v3101_v26  ;;  %v2706_v5 = vsub.f32 %v4887_v43, %v5928_v2  ;;  %v3103_v4 = vsel %vm2903_vm14, %v2803_v33, %v3003_v29  ;;  %v3104_v40 = vsel %vm2904_vm15, %v2804_v19, %v3004_v37  ;;  %v4897_v43 = vld [vmem:[#allocation2 + $0x2e8] sm:$0xff] }
 0x3a3   : > { %v2806_v38 = vmul.f32 %v6072_v34, %v2704_v14  ;;  %v2707_v42 = vsub.f32 %v4888_v30, %v5928_v2  ;;  %v4260_v50 = vpack.c.bf16 %v3104_v40, %v3103_v4  ;;  %vm2905_vm0 = vcmp.ge.f32.partialorder %v2805_v54, 0.0  ;;  %v4898_v40 = vld [vmem:[#allocation2 + $0x2f0] sm:$0xff]  ;;  %v4899_v30 = vld [vmem:[#allocation2 + $0x2f8] sm:$0xff] }
 0x3a4   : > { %4349 = vst [vmem:[%s6586_s3 + $0x130] sm:$0xff] %v4255_v45   ;;  %v3005_v44 = vmul.f32 0.01, %v2805_v54  ;;  %v2807_v48 = vmul.f32 %v6072_v34, %v2705_v61  ;;  %v2808_v49 = vmul.f32 %v6072_v34, %v2706_v5  ;;  %v2708_v59 = vsub.f32 %v4889_v60, %v5928_v2  ;;  %v4901_v60 = vld [vmem:[#allocation2 + $0x308] sm:$0xff] }
 0x3a5   : > { %vm2906_vm1 = vcmp.ge.f32.partialorder %v2806_v38, 0.0  ;;  %v3006_v9 = vmul.f32 0.01, %v2806_v38  ;;  %4350 = vst [vmem:[%s6586_s3 + $0x138] sm:$0xff] %v4260_v50   ;;  %v2809_v57 = vmul.f32 %v6072_v34, %v2707_v42  ;;  %v2709_v27 = vsub.f32 %v4890_v15, %v5928_v2  ;;  %v4900_v50 = vld [vmem:[#allocation2 + $0x300] sm:$0xff] }
 0x3a6   : > { %v3105_v7 = vsel %vm2905_vm0, %v2805_v54, %v3005_v44  ;;  %vm2907_vm2 = vcmp.ge.f32.partialorder %v2807_v48, 0.0  ;;  %v3007_v24 = vmul.f32 0.01, %v2807_v48  ;;  %vm2908_vm3 = vcmp.ge.f32.partialorder %v2808_v49, 0.0 }
 0x3a7   : > { %v3106_v18 = vsel %vm2906_vm1, %v2806_v38, %v3006_v9  ;;  %v3008_v12 = vmul.f32 0.01, %v2808_v49  ;;  %v2810_v46 = vmul.f32 %v6072_v34, %v2708_v59  ;;  %vm2909_vm4 = vcmp.ge.f32.partialorder %v2809_v57, 0.0 }
 0x3a8   : > { %v4265_v16 = vpack.c.bf16 %v3106_v18, %v3105_v7  ;;  %v3107_v3 = vsel %vm2907_vm2, %v2807_v48, %v3007_v24  ;;  %v3009_v51 = vmul.f32 0.01, %v2809_v57  ;;  %v2710_v8 = vsub.f32 %v4891_v62, %v5928_v2  ;;  %v4902_v18 = vld [vmem:[#allocation2 + $0x310] sm:$0xff] }
 0x3a9   : > { %v3108_v52 = vsel %vm2908_vm3, %v2808_v49, %v3008_v12  ;;  %vm2910_vm5 = vcmp.ge.f32.partialorder %v2810_v46, 0.0  ;;  %v3010_v55 = vmul.f32 0.01, %v2810_v46  ;;  %v2711_v17 = vsub.f32 %v4892_v56, %v5928_v2 }
 0x3aa   : > { %4351 = vst [vmem:[%s6586_s3 + $0x140] sm:$0xff] %v4265_v16   ;;  %v4270_v6 = vpack.c.bf16 %v3108_v52, %v3107_v3  ;;  %v3109_v10 = vsel %vm2909_vm4, %v2809_v57, %v3009_v51  ;;  %v2811_v13 = vmul.f32 %v6072_v34, %v2709_v27  ;;  %v2712_v31 = vsub.f32 %v4893_v1, %v5928_v2 }
 0x3ab   : > { %v3110_v0 = vsel %vm2910_vm5, %v2810_v46, %v3010_v55  ;;  %v2713_v22 = vsub.f32 %v4894_v39, %v5928_v2  ;;  %v2812_v47 = vmul.f32 %v6072_v34, %v2710_v8  ;;  %v2813_v25 = vmul.f32 %v6072_v34, %v2711_v17  ;;  %v4903_v17 = vld [vmem:[#allocation2 + $0x318] sm:$0xff] }
 0x3ac   : > { %4352 = vst [vmem:[%s6586_s3 + $0x148] sm:$0xff] %v4270_v6   ;;  %v4275_v35 = vpack.c.bf16 %v3110_v0, %v3109_v10  ;;  %v2714_v63 = vsub.f32 %v4895_v32, %v5928_v2  ;;  %vm2911_vm6 = vcmp.ge.f32.partialorder %v2811_v13, 0.0  ;;  %v3011_v20 = vmul.f32 0.01, %v2811_v13 }
 0x3ad   : > { %v2814_v33 = vmul.f32 %v6072_v34, %v2712_v31  ;;  %v2815_v19 = vmul.f32 %v6072_v34, %v2713_v22  ;;  %vm2912_vm7 = vcmp.ge.f32.partialorder %v2812_v47, 0.0  ;;  %v3012_v11 = vmul.f32 0.01, %v2812_v47 }
 0x3ae   : > { %4353 = vst [vmem:[%s6586_s3 + $0x150] sm:$0xff] %v4275_v35   ;;  %vm2913_vm8 = vcmp.ge.f32.partialorder %v2813_v25, 0.0  ;;  %v3013_v53 = vmul.f32 0.01, %v2813_v25  ;;  %v3111_v28 = vsel %vm2911_vm6, %v2811_v13, %v3011_v20  ;;  %v2816_v58 = vmul.f32 %v6072_v34, %v2714_v63 }
 0x3af   : > { %vm2914_vm9 = vcmp.ge.f32.partialorder %v2814_v33, 0.0  ;;  %v3014_v23 = vmul.f32 0.01, %v2814_v33  ;;  %v3112_v26 = vsel %vm2912_vm7, %v2812_v47, %v3012_v11  ;;  %vm2915_vm10 = vcmp.ge.f32.partialorder %v2815_v19, 0.0 }
 0x3b0   : > { %v3113_v21 = vsel %vm2913_vm8, %v2813_v25, %v3013_v53  ;;  %v3015_v29 = vmul.f32 0.01, %v2815_v19  ;;  %v4280_v37 = vpack.c.bf16 %v3112_v26, %v3111_v28  ;;  %vm2916_vm11 = vcmp.ge.f32.partialorder %v2816_v58, 0.0 }
 0x3b1   : > { %v3114_v36 = vsel %vm2914_vm9, %v2814_v33, %v3014_v23  ;;  %v3016_v14 = vmul.f32 0.01, %v2816_v58  ;;  %v2715_v61 = vsub.f32 %v4896_v41, %v5928_v2  ;;  %v2716_v5 = vsub.f32 %v4897_v43, %v5928_v2 }
 0x3b2   : > { %v4285_v45 = vpack.c.bf16 %v3114_v36, %v3113_v21  ;;  %v3115_v54 = vsel %vm2915_vm10, %v2815_v19, %v3015_v29  ;;  %4354 = vst [vmem:[%s6586_s3 + $0x158] sm:$0xff] %v4280_v37   ;;  %v2717_v38 = vsub.f32 %v4898_v40, %v5928_v2  ;;  %v2718_v42 = vsub.f32 %v4899_v30, %v5928_v2 }
 0x3b3   : > { %v3116_v4 = vsel %vm2916_vm11, %v2816_v58, %v3016_v14  ;;  %v2719_v44 = vsub.f32 %v4900_v50, %v5928_v2  ;;  %v2817_v9 = vmul.f32 %v6072_v34, %v2715_v61  ;;  %v2818_v49 = vmul.f32 %v6072_v34, %v2716_v5 }
 0x3b4   : > { %4355 = vst [vmem:[%s6586_s3 + $0x160] sm:$0xff] %v4285_v45   ;;  %v4290_v48 = vpack.c.bf16 %v3116_v4, %v3115_v54  ;;  %v2720_v59 = vsub.f32 %v4901_v60, %v5928_v2  ;;  %v2819_v7 = vmul.f32 %v6072_v34, %v2717_v38  ;;  %v2820_v24 = vmul.f32 %v6072_v34, %v2718_v42 }
 0x3b5   : > { %v2821_v57 = vmul.f32 %v6072_v34, %v2719_v44  ;;  %v2721_v12 = vsub.f32 %v4902_v18, %v5928_v2  ;;  %vm2917_vm12 = vcmp.ge.f32.partialorder %v2817_v9, 0.0  ;;  %vm2918_vm13 = vcmp.ge.f32.partialorder %v2818_v49, 0.0 }
 0x3b6   : > { %4356 = vst [vmem:[%s6586_s3 + $0x168] sm:$0xff] %v4290_v48   ;;  %v3017_v46 = vmul.f32 0.01, %v2817_v9  ;;  %v3018_v16 = vmul.f32 0.01, %v2818_v49  ;;  %vm2919_vm14 = vcmp.ge.f32.partialorder %v2819_v7, 0.0  ;;  %v2822_v15 = vmul.f32 %v6072_v34, %v2720_v59 }
 0x3b7   : > { %vm2920_vm15 = vcmp.ge.f32.partialorder %v2820_v24, 0.0  ;;  %v3019_v3 = vmul.f32 0.01, %v2819_v7  ;;  %v3020_v51 = vmul.f32 0.01, %v2820_v24  ;;  %vm2921_vm0 = vcmp.ge.f32.partialorder %v2821_v57, 0.0 }
 0x3b8   : > { %v3117_v52 = vsel %vm2917_vm12, %v2817_v9, %v3017_v46  ;;  %v3118_v55 = vsel %vm2918_vm13, %v2818_v49, %v3018_v16  ;;  %v3021_v62 = vmul.f32 0.01, %v2821_v57  ;;  %vm2922_vm1 = vcmp.ge.f32.partialorder %v2822_v15, 0.0 }
 0x3b9   : > { %v4295_v27 = vpack.c.bf16 %v3118_v55, %v3117_v52  ;;  %v3119_v6 = vsel %vm2919_vm14, %v2819_v7, %v3019_v3  ;;  %v3120_v10 = vsel %vm2920_vm15, %v2820_v24, %v3020_v51  ;;  %v3022_v56 = vmul.f32 0.01, %v2822_v15 }
 0x3ba   : > { %v4300_v8 = vpack.c.bf16 %v3120_v10, %v3119_v6  ;;  %v2722_v0 = vsub.f32 %v4903_v17, %v5928_v2  ;;  %v3121_v13 = vsel %vm2921_vm0, %v2821_v57, %v3021_v62  ;;  %v2823_v1 = vmul.f32 %v6072_v34, %v2721_v12 }
 0x3bb   : > { %4357 = vst [vmem:[%s6586_s3 + $0x170] sm:$0xff] %v4295_v27   ;;  %v3122_v31 = vsel %vm2922_vm1, %v2822_v15, %v3022_v56 }
 0x3bc   : > { %4358 = vst [vmem:[%s6586_s3 + $0x178] sm:$0xff] %v4300_v8   ;;  %v2824_v39 = vmul.f32 %v6072_v34, %v2722_v0  ;;  %v4305_v22 = vpack.c.bf16 %v3122_v31, %v3121_v13  ;;  %vm2923_vm2 = vcmp.ge.f32.partialorder %v2823_v1, 0.0  ;;  %v3023_v35 = vmul.f32 0.01, %v2823_v1 }
 0x3be   : > { %vm2924_vm3 = vcmp.ge.f32.partialorder %v2824_v39, 0.0  ;;  %v3024_v47 = vmul.f32 0.01, %v2824_v39  ;;  %4359 = vst [vmem:[%s6586_s3 + $0x180] sm:$0xff] %v4305_v22   ;;  %v3123_v2 = vsel %vm2923_vm2, %v2823_v1, %v3023_v35 }
 0x3c0   : > { %v3124_v25 = vsel %vm2924_vm3, %v2824_v39, %v3024_v47 }
 0x3c1   : > { %v4310_v32 = vpack.c.bf16 %v3124_v25, %v3123_v2 }
 0x3c3   : > { %4360 = vst [vmem:[%s6586_s3 + $0x188] sm:$0xff] %v4310_v32  }
 0x3c4 PF: > { %s13_s12 = sadd.s32 1, %s4910_s12  }
 0x3c5   : > { %p10_p5 = scmp.ge.s32.totalorder %s13_s12, 4  }
 0x3c7   :  { %12 = sbr.rel (!%p10_p5) target bundleno = 1 (0x1), region = 63 }

// kernel: actor_forward.5
= control target key start
LH: loop header
LB: loop body
LE: loop exit
PB: predicated region body
PF: predicated region fallthrough
CT: control target
= control target key end

     0   :  { %s2169_s1 = inlined_call_operand.vmem [shape: bf16[512,128], index: 1, kind: input, shape index: {}]   ;;  %s2170_s0 = inlined_call_operand.vmem [shape: bf16[168,512], index: 0, kind: input, shape index: {}]   ;;  %s2171_s2 = inlined_call_operand.vmem [shape: f32[1,128], index: 2, kind: input, shape index: {}]   ;;  %s2172_s3 = inlined_call_operand.vmem [shape: bf16[168,128], index: 3, kind: output, shape index: {}]  }
   0x1   :  { %v1523_v0 = vld [vmem:[%s2169_s1 + $0x40] sm:$0xff]   ;;  %v1527_v4 = vld [vmem:[%s2169_s1 + $0x48] sm:$0xff]   ;;  %v1531_v8 = vld [vmem:[%s2169_s1 + $0x50] sm:$0xff]  }
   0x2   :  { %v1524_v1 = vld [vmem:[%s2169_s1 + $0xc0] sm:$0xff]   ;;  %1359 = vmatprep.subr.bf16.mxu0 %v1523_v0  ;;  %v1528_v5 = vld [vmem:[%s2169_s1 + $0xc8] sm:$0xff]   ;;  %v1532_v9 = vld [vmem:[%s2169_s1 + $0xd0] sm:$0xff]  }
   0x3   :  { %v1525_v2 = vld [vmem:[%s2169_s1] sm:$0xff]   ;;  %1441 = vmatprep.subr.bf16.mxu1 %v1524_v1  ;;  %v1529_v6 = vld [vmem:[%s2169_s1 + $0x8] sm:$0xff]   ;;  %v1533_v10 = vld [vmem:[%s2169_s1 + $0x10] sm:$0xff]  }
   0x4   :  { %v1526_v3 = vld [vmem:[%s2169_s1 + $0x80] sm:$0xff]   ;;  %1360 = vmatpush3.bf16.msra.mxu0 %v1525_v2  ;;  %v1530_v7 = vld [vmem:[%s2169_s1 + $0x88] sm:$0xff]   ;;  %v1534_v11 = vld [vmem:[%s2169_s1 + $0x90] sm:$0xff]  }
   0x5   :  { %1442 = vmatpush3.bf16.msra.mxu1 %v1526_v3  ;;  %1361 = vmatprep.subr.bf16.mxu0 %v1527_v4  ;;  %v1535_v12 = vld [vmem:[%s2169_s1 + $0x58] sm:$0xff]   ;;  %v1539_v16 = vld [vmem:[%s2169_s1 + $0x60] sm:$0xff]   ;;  %v1543_v20 = vld [vmem:[%s2169_s1 + $0x68] sm:$0xff]  }
   0x6   :  { %1443 = vmatprep.subr.bf16.mxu1 %v1528_v5  ;;  %v1536_v13 = vld [vmem:[%s2169_s1 + $0xd8] sm:$0xff]   ;;  %v1540_v17 = vld [vmem:[%s2169_s1 + $0xe0] sm:$0xff]   ;;  %v1544_v21 = vld [vmem:[%s2169_s1 + $0xe8] sm:$0xff]  }
   0x7   :  { %v1537_v14 = vld [vmem:[%s2169_s1 + $0x18] sm:$0xff]   ;;  %v1541_v18 = vld [vmem:[%s2169_s1 + $0x20] sm:$0xff]   ;;  %v1545_v22 = vld [vmem:[%s2169_s1 + $0x28] sm:$0xff]  }
   0x8   :  { %1362 = vmatpush3.bf16.msra.mxu0 %v1529_v6  ;;  %v1538_v15 = vld [vmem:[%s2169_s1 + $0x98] sm:$0xff]   ;;  %v1542_v19 = vld [vmem:[%s2169_s1 + $0xa0] sm:$0xff]   ;;  %v1546_v23 = vld [vmem:[%s2169_s1 + $0xa8] sm:$0xff]  }
   0x9   :  { %1444 = vmatpush3.bf16.msra.mxu1 %v1530_v7  ;;  %1363 = vmatprep.subr.bf16.mxu0 %v1531_v8  ;;  %v1547_v24 = vld [vmem:[%s2169_s1 + $0x70] sm:$0xff]   ;;  %v1551_v28 = vld [vmem:[%s2169_s1 + $0x78] sm:$0xff]   ;;  %v55_v6 = vld [vmem:[%s2170_s0 + $0x140] sm:$0xff] }
   0xa   :  { %1445 = vmatprep.subr.bf16.mxu1 %v1532_v9  ;;  %v1548_v25 = vld [vmem:[%s2169_s1 + $0xf0] sm:$0xff]   ;;  %v1552_v29 = vld [vmem:[%s2169_s1 + $0xf8] sm:$0xff]   ;;  %v56_v7 = vld [vmem:[%s2170_s0 + $0x148] sm:$0xff] }
   0xb   :  { %v1549_v26 = vld [vmem:[%s2169_s1 + $0x30] sm:$0xff]   ;;  %v1553_v30 = vld [vmem:[%s2169_s1 + $0x38] sm:$0xff]  }
   0xc   :  { %1364 = vmatpush3.bf16.msra.mxu0 %v1533_v10  ;;  %v1550_v27 = vld [vmem:[%s2169_s1 + $0xb0] sm:$0xff]   ;;  %v1554_v31 = vld [vmem:[%s2169_s1 + $0xb8] sm:$0xff]   ;;  %v1223_v10 = vcombine.high %v55_v6, %v55_v6 }
   0xd   :  { %1446 = vmatpush3.bf16.msra.mxu1 %v1534_v11  ;;  %1365 = vmatprep.subr.bf16.mxu0 %v1535_v12  ;;  %v1555_v32 = vld [vmem:[%s2170_s0] ss:$16 sps:$4 sm:$0xff]   ;;  %v1557_v33 = vld [vmem:[%s2170_s0 + $0x4] ss:$16 sps:$4 sm:$0xff]   ;;  %v1558_v34 = vld [vmem:[%s2170_s0 + $0x8] ss:$16 sps:$4 sm:$0xff]   ;;  %v1225_v11 = vcombine.high %v56_v7, %v56_v7  ;;  %v1222_v12 = vcombine.low %v55_v6, %v55_v6 }
   0xe   :  { %1447 = vmatprep.subr.bf16.mxu1 %v1536_v13  ;;  %v1560_v35 = vld [vmem:[%s2170_s0 + $0xc] ss:$16 sps:$4 sm:$0xff]   ;;  %566 = vmatprep.mubr.bf16.mxu0 %v1557_v33  ;;  %v1561_v36 = vld [vmem:[%s2170_s0 + $0x24] ss:$16 sps:$4 sm:$0xff]   ;;  %v1565_v38 = vld [vmem:[%s2170_s0 + $0x20] ss:$16 sps:$4 sm:$0xff]   ;;  %v1224_v13 = vcombine.low %v56_v7, %v56_v7 }
   0xf   :  { %686 = vmatprep.mubr.bf16.mxu1 %v1560_v35  ;;  %v1563_v37 = vld [vmem:[%s2170_s0 + $0x2c] ss:$16 sps:$4 sm:$0xff]   ;;  %v1566_v39 = vld [vmem:[%s2170_s0 + $0x28] ss:$16 sps:$4 sm:$0xff]   ;;  %v1567_v40 = vld [vmem:[%s2170_s0 + $0x44] ss:$16 sps:$4 sm:$0xff]  }
  0x10   :  { %1366 = vmatpush3.bf16.msra.mxu0 %v1537_v14  ;;  %v1569_v41 = vld [vmem:[%s2170_s0 + $0x4c] ss:$16 sps:$4 sm:$0xff]   ;;  %v1571_v42 = vld [vmem:[%s2170_s0 + $0x40] ss:$16 sps:$4 sm:$0xff]   ;;  %v1572_v43 = vld [vmem:[%s2170_s0 + $0x48] ss:$16 sps:$4 sm:$0xff]  }
  0x11   :  { %1448 = vmatpush3.bf16.msra.mxu1 %v1538_v15  ;;  %1367 = vmatprep.subr.bf16.mxu0 %v1539_v16  ;;  %v1573_v44 = vld [vmem:[%s2170_s0 + $0x64] ss:$16 sps:$4 sm:$0xff]   ;;  %v1575_v45 = vld [vmem:[%s2170_s0 + $0x6c] ss:$16 sps:$4 sm:$0xff]   ;;  %v1577_v46 = vld [vmem:[%s2170_s0 + $0x60] ss:$16 sps:$4 sm:$0xff]  }
  0x12   :  { %1449 = vmatprep.subr.bf16.mxu1 %v1540_v17  ;;  %v1578_v47 = vld [vmem:[%s2170_s0 + $0x68] ss:$16 sps:$4 sm:$0xff]   ;;  %v1579_v48 = vld [vmem:[%s2170_s0 + $0x84] ss:$16 sps:$4 sm:$0xff]   ;;  %v1581_v49 = vld [vmem:[%s2170_s0 + $0x8c] ss:$16 sps:$4 sm:$0xff]  }
  0x13   :  { %v1583_v50 = vld [vmem:[%s2170_s0 + $0x80] ss:$16 sps:$4 sm:$0xff]   ;;  %v1584_v51 = vld [vmem:[%s2170_s0 + $0x88] ss:$16 sps:$4 sm:$0xff]   ;;  %v1585_v52 = vld [vmem:[%s2170_s0 + $0xa4] ss:$16 sps:$4 sm:$0xff]  }
  0x14   :  { %1368 = vmatpush3.bf16.msra.mxu0 %v1541_v18  ;;  %v1587_v53 = vld [vmem:[%s2170_s0 + $0xac] ss:$16 sps:$4 sm:$0xff]   ;;  %v1589_v54 = vld [vmem:[%s2170_s0 + $0xa0] ss:$16 sps:$4 sm:$0xff]   ;;  %v1590_v55 = vld [vmem:[%s2170_s0 + $0xa8] ss:$16 sps:$4 sm:$0xff]  }
  0x15   :  { %1450 = vmatpush3.bf16.msra.mxu1 %v1542_v19  ;;  %1369 = vmatprep.subr.bf16.mxu0 %v1543_v20  ;;  %v1591_v56 = vld [vmem:[%s2170_s0 + $0xc4] ss:$16 sps:$4 sm:$0xff]   ;;  %v1593_v57 = vld [vmem:[%s2170_s0 + $0xcc] ss:$16 sps:$4 sm:$0xff]   ;;  %v1595_v58 = vld [vmem:[%s2170_s0 + $0xc0] ss:$16 sps:$4 sm:$0xff]  }
  0x16   :  { %1451 = vmatprep.subr.bf16.mxu1 %v1544_v21  ;;  %v1596_v59 = vld [vmem:[%s2170_s0 + $0xc8] ss:$16 sps:$4 sm:$0xff]   ;;  %v1597_v60 = vld [vmem:[%s2170_s0 + $0xe4] ss:$16 sps:$4 sm:$0xff]   ;;  %v1599_v61 = vld [vmem:[%s2170_s0 + $0xec] ss:$16 sps:$4 sm:$0xff]  }
  0x17   :  { %v1601_v62 = vld [vmem:[%s2170_s0 + $0xe0] ss:$16 sps:$4 sm:$0xff]   ;;  %v1602_v63 = vld [vmem:[%s2170_s0 + $0xe8] ss:$16 sps:$4 sm:$0xff]   ;;  %v1603_v0 = vld [vmem:[%s2170_s0 + $0x104] ss:$16 sps:$4 sm:$0xff]  }
  0x18   :  { %1370 = vmatpush3.bf16.msra.mxu0 %v1545_v22  ;;  %v1605_v1 = vld [vmem:[%s2170_s0 + $0x10c] ss:$16 sps:$4 sm:$0xff]   ;;  %v1607_v2 = vld [vmem:[%s2170_s0 + $0x100] ss:$16 sps:$4 sm:$0xff]   ;;  %v1608_v3 = vld [vmem:[%s2170_s0 + $0x108] ss:$16 sps:$4 sm:$0xff]  }
  0x19   :  { %1452 = vmatpush3.bf16.msra.mxu1 %v1546_v23  ;;  %1371 = vmatprep.subr.bf16.mxu0 %v1547_v24  ;;  %v1609_v4 = vld [vmem:[%s2170_s0 + $0x124] ss:$16 sps:$4 sm:$0xff]   ;;  %v1611_v5 = vld [vmem:[%s2170_s0 + $0x12c] ss:$16 sps:$4 sm:$0xff]   ;;  %v1613_v8 = vld [vmem:[%s2170_s0 + $0x120] ss:$16 sps:$4 sm:$0xff]  }
  0x1a   :  { %1453 = vmatprep.subr.bf16.mxu1 %v1548_v25  ;;  %v1614_v9 = vld [vmem:[%s2170_s0 + $0x128] ss:$16 sps:$4 sm:$0xff]   ;;  %v1866_v16 = vld [vmem:[%s2171_s2] ss:$0 sm:$0xff] }
  0x1c   :  { %1372 = vmatpush3.bf16.msra.mxu0 %v1549_v26 }
  0x1d   :  { %1454 = vmatpush3.bf16.msra.mxu1 %v1550_v27  ;;  %1373 = vmatprep.subr.bf16.mxu0 %v1551_v28 }
  0x1e   :  { %1455 = vmatprep.subr.bf16.mxu1 %v1552_v29 }
  0x20   :  { %1374 = vmatpush3.bf16.msra.mxu0 %v1553_v30 }
  0x21   :  { %1456 = vmatpush3.bf16.msra.mxu1 %v1554_v31 }
  0x23   :  { %567 = vmatmul.mubr.bf16.vlgmr.msra.gmra.mrb[0].mxu0 %v1555_v32 }
  0x24   :  { %687 = vmatmul.mubr.bf16.vlgmr.msra.gmra.mrb[0].mxu1 %v1558_v34  ;;  %574 = vmatprep.mubr.bf16.mxu0 %v1561_v36 }
  0x25   :  { %694 = vmatprep.mubr.bf16.mxu1 %v1563_v37 }
  0x2b   :  { %575 = vmatmul.mubr.bf16.gmra.mrb[4].mxu0 %v1565_v38 }
  0x2c   :  { %695 = vmatmul.mubr.bf16.gmra.mrb[4].mxu1 %v1566_v39  ;;  %582 = vmatprep.mubr.bf16.mxu0 %v1567_v40 }
  0x2d   :  { %702 = vmatprep.mubr.bf16.mxu1 %v1569_v41 }
  0x33   :  { %583 = vmatmul.mubr.bf16.gmra.mrb[8].mxu0 %v1571_v42 }
  0x34   :  { %703 = vmatmul.mubr.bf16.gmra.mrb[8].mxu1 %v1572_v43  ;;  %590 = vmatprep.mubr.bf16.mxu0 %v1573_v44 }
  0x35   :  { %710 = vmatprep.mubr.bf16.mxu1 %v1575_v45 }
  0x3b   :  { %591 = vmatmul.mubr.bf16.gmra.mrb[12].mxu0 %v1577_v46 }
  0x3c   :  { %711 = vmatmul.mubr.bf16.gmra.mrb[12].mxu1 %v1578_v47  ;;  %598 = vmatprep.mubr.bf16.mxu0 %v1579_v48 }
  0x3d   :  { %718 = vmatprep.mubr.bf16.mxu1 %v1581_v49 }
  0x43   :  { %599 = vmatmul.mubr.bf16.gmra.mrb[16].mxu0 %v1583_v50 }
  0x44   :  { %719 = vmatmul.mubr.bf16.gmra.mrb[16].mxu1 %v1584_v51  ;;  %606 = vmatprep.mubr.bf16.mxu0 %v1585_v52 }
  0x45   :  { %726 = vmatprep.mubr.bf16.mxu1 %v1587_v53 }
  0x4b   :  { %607 = vmatmul.mubr.bf16.gmra.mrb[20].mxu0 %v1589_v54 }
  0x4c   :  { %727 = vmatmul.mubr.bf16.gmra.mrb[20].mxu1 %v1590_v55  ;;  %614 = vmatprep.mubr.bf16.mxu0 %v1591_v56 }
  0x4d   :  { %734 = vmatprep.mubr.bf16.mxu1 %v1593_v57 }
  0x53   :  { %615 = vmatmul.mubr.bf16.gmra.mrb[24].mxu0 %v1595_v58 }
  0x54   :  { %735 = vmatmul.mubr.bf16.gmra.mrb[24].mxu1 %v1596_v59  ;;  %622 = vmatprep.mubr.bf16.mxu0 %v1597_v60 }
  0x55   :  { %742 = vmatprep.mubr.bf16.mxu1 %v1599_v61 }
  0x5b   :  { %623 = vmatmul.mubr.bf16.gmra.mrb[28].mxu0 %v1601_v62 }
  0x5c   :  { %743 = vmatmul.mubr.bf16.gmra.mrb[28].mxu1 %v1602_v63  ;;  %630 = vmatprep.mubr.bf16.mxu0 %v1603_v0 }
  0x5d   :  { %750 = vmatprep.mubr.bf16.mxu1 %v1605_v1 }
  0x63   :  { %631 = vmatmul.mubr.bf16.gmra.mrb[32].mxu0 %v1607_v2 }
  0x64   :  { %751 = vmatmul.mubr.bf16.gmra.mrb[32].mxu1 %v1608_v3  ;;  %638 = vmatprep.mubr.bf16.mxu0 %v1609_v4 }
  0x65   :  { %758 = vmatprep.mubr.bf16.mxu1 %v1611_v5 }
  0x6b   :  { %639 = vmatmul.mubr.bf16.gmra.mrb[36].mxu0 %v1613_v8 }
  0x6c   :  { %759 = vmatmul.mubr.bf16.gmra.mrb[36].mxu1 %v1614_v9  ;;  %646 = vmatprep.mubr.bf16.mxu0 %v1223_v10 }
  0x6d   :  { %766 = vmatprep.mubr.bf16.mxu1 %v1225_v11 }
  0x73   :  { %647 = vmatmul.mubr.bf16.gmra.mrb[40].mxu0 %v1222_v12 }
  0x74   :  { %767 = vmatmul.mubr.bf16.gmra.mrb[40].mxu1 %v1224_v13 }
  0xf6   :  { %v1375_v14 = vpop.f32.mrb[0].mxu0 }
  0xf7   :  { %v1457_v15 = vpop.f32.mrb[0].mxu1  ;;  %v1376_v17 = vpop.f32.mrb[1].mxu0 }
  0xf8   :  { %v1377_v18 = vadd.f32 %v1376_v17, %v1375_v14  ;;  %v1458_v19 = vpop.f32.mrb[1].mxu1  ;;  %v1378_v20 = vpop.f32.mrb[2].mxu0 }
  0xf9   :  { %v1459_v21 = vadd.f32 %v1458_v19, %v1457_v15  ;;  %v1460_v22 = vpop.f32.mrb[2].mxu1  ;;  %v1379_v23 = vpop.f32.mrb[3].mxu0 }
  0xfa   :  { %v569_v24 = vadd.f32 %v1377_v18, %v1866_v16  ;;  %v1380_v25 = vadd.f32 %v1379_v23, %v1378_v20  ;;  %v1461_v26 = vpop.f32.mrb[3].mxu1 }
  0xfb   :  { %v1462_v27 = vadd.f32 %v1461_v26, %v1460_v22 }
  0xfc   :  { %v1869_v28 = vadd.f32 %v1459_v21, %v569_v24  ;;  %v572_v29 = vadd.f32 %v1380_v25, %v1866_v16 }
  0xfe   :  { %v1872_v30 = vadd.f32 %v1462_v27, %v572_v29  ;;  %v1381_v31 = vpop.f32.mrb[4].mxu0  ;;  %v912_v51 = vmul.f32 %v1869_v28, %v1869_v28 }
  0xff   :  { %v1463_v32 = vpop.f32.mrb[4].mxu1  ;;  %v1382_v33 = vpop.f32.mrb[5].mxu0 }
 0x100   :  { %v1383_v34 = vadd.f32 %v1382_v33, %v1381_v31  ;;  %v1464_v35 = vpop.f32.mrb[5].mxu1  ;;  %v1384_v36 = vpop.f32.mrb[6].mxu0  ;;  %v913_v46 = vmul.f32 %v1872_v30, %v1872_v30  ;;  %v886_v52 = vadd.f32 %v1872_v30, %v1869_v28 }
 0x101   :  { %v1465_v37 = vadd.f32 %v1464_v35, %v1463_v32  ;;  %v1466_v38 = vpop.f32.mrb[6].mxu1  ;;  %v1385_v39 = vpop.f32.mrb[7].mxu0 }
 0x102   :  { %v577_v40 = vadd.f32 %v1383_v34, %v1866_v16  ;;  %v1386_v41 = vadd.f32 %v1385_v39, %v1384_v36  ;;  %v1467_v42 = vpop.f32.mrb[7].mxu1  ;;  %v933_v60 = vadd.f32 %v913_v46, %v912_v51 }
 0x103   :  { %v1468_v43 = vadd.f32 %v1467_v42, %v1466_v38 }
 0x104   :  { %v1875_v44 = vadd.f32 %v1465_v37, %v577_v40  ;;  %v580_v45 = vadd.f32 %v1386_v41, %v1866_v16 }
 0x106   :  { %v1880_v47 = vadd.f32 %v1468_v43, %v580_v45  ;;  %v1387_v48 = vpop.f32.mrb[8].mxu0  ;;  %v914_v53 = vmul.f32 %v1875_v44, %v1875_v44  ;;  %v887_v61 = vadd.f32 %v886_v52, %v1875_v44 }
 0x107   :  { %v1469_v49 = vpop.f32.mrb[8].mxu1  ;;  %v1388_v50 = vpop.f32.mrb[9].mxu0 }
 0x108   :  { %v1389_v54 = vadd.f32 %v1388_v50, %v1387_v48  ;;  %v1470_v55 = vpop.f32.mrb[9].mxu1  ;;  %v1390_v56 = vpop.f32.mrb[10].mxu0  ;;  %v934_v2 = vadd.f32 %v933_v60, %v914_v53  ;;  %v915_v3 = vmul.f32 %v1880_v47, %v1880_v47  ;;  %v888_v6 = vadd.f32 %v887_v61, %v1880_v47 }
 0x109   :  { %v1471_v57 = vadd.f32 %v1470_v55, %v1469_v49  ;;  %v1472_v58 = vpop.f32.mrb[10].mxu1  ;;  %v1391_v59 = vpop.f32.mrb[11].mxu0 }
 0x10a   :  { %v585_v62 = vadd.f32 %v1389_v54, %v1866_v16  ;;  %v1392_v63 = vadd.f32 %v1391_v59, %v1390_v56  ;;  %v1473_v0 = vpop.f32.mrb[11].mxu1  ;;  %v935_v12 = vadd.f32 %v934_v2, %v915_v3 }
 0x10b   :  { %v1474_v1 = vadd.f32 %v1473_v0, %v1472_v58 }
 0x10c   :  { %v1892_v4 = vadd.f32 %v1471_v57, %v585_v62  ;;  %v588_v5 = vadd.f32 %v1392_v63, %v1866_v16 }
 0x10e   :  { %v916_v7 = vmul.f32 %v1892_v4, %v1892_v4  ;;  %v1898_v8 = vadd.f32 %v1474_v1, %v588_v5  ;;  %v1393_v9 = vpop.f32.mrb[12].mxu0  ;;  %v889_v13 = vadd.f32 %v888_v6, %v1892_v4 }
 0x10f   :  { %v1475_v10 = vpop.f32.mrb[12].mxu1  ;;  %v1394_v11 = vpop.f32.mrb[13].mxu0 }
 0x110   :  { %v1395_v14 = vadd.f32 %v1394_v11, %v1393_v9  ;;  %v1476_v15 = vpop.f32.mrb[13].mxu1  ;;  %v1396_v17 = vpop.f32.mrb[14].mxu0  ;;  %v936_v21 = vadd.f32 %v935_v12, %v916_v7  ;;  %v917_v22 = vmul.f32 %v1898_v8, %v1898_v8  ;;  %v890_v27 = vadd.f32 %v889_v13, %v1898_v8 }
 0x111   :  { %v1477_v18 = vadd.f32 %v1476_v15, %v1475_v10  ;;  %v1478_v19 = vpop.f32.mrb[14].mxu1  ;;  %v1397_v20 = vpop.f32.mrb[15].mxu0 }
 0x112   :  { %v593_v23 = vadd.f32 %v1395_v14, %v1866_v16  ;;  %v1398_v24 = vadd.f32 %v1397_v20, %v1396_v17  ;;  %v1479_v25 = vpop.f32.mrb[15].mxu1  ;;  %v937_v32 = vadd.f32 %v936_v21, %v917_v22 }
 0x113   :  { %v1480_v26 = vadd.f32 %v1479_v25, %v1478_v19 }
 0x114   :  { %v1905_v29 = vadd.f32 %v1477_v18, %v593_v23  ;;  %v596_v31 = vadd.f32 %v1398_v24, %v1866_v16 }
 0x116   :  { %v891_v33 = vadd.f32 %v890_v27, %v1905_v29  ;;  %v918_v34 = vmul.f32 %v1905_v29, %v1905_v29  ;;  %v1911_v35 = vadd.f32 %v1480_v26, %v596_v31  ;;  %v1399_v36 = vpop.f32.mrb[16].mxu0 }
 0x117   :  { %v1481_v37 = vpop.f32.mrb[16].mxu1  ;;  %v1400_v38 = vpop.f32.mrb[17].mxu0 }
 0x118   :  { %v938_v39 = vadd.f32 %v937_v32, %v918_v34  ;;  %v892_v40 = vadd.f32 %v891_v33, %v1911_v35  ;;  %v919_v41 = vmul.f32 %v1911_v35, %v1911_v35  ;;  %v1401_v42 = vadd.f32 %v1400_v38, %v1399_v36  ;;  %v1482_v43 = vpop.f32.mrb[17].mxu1  ;;  %v1402_v45 = vpop.f32.mrb[18].mxu0 }
 0x119   :  { %v1483_v46 = vadd.f32 %v1482_v43, %v1481_v37  ;;  %v1484_v48 = vpop.f32.mrb[18].mxu1  ;;  %v1403_v49 = vpop.f32.mrb[19].mxu0 }
 0x11a   :  { %v939_v50 = vadd.f32 %v938_v39, %v919_v41  ;;  %v601_v51 = vadd.f32 %v1401_v42, %v1866_v16  ;;  %v1404_v52 = vadd.f32 %v1403_v49, %v1402_v45  ;;  %v1485_v53 = vpop.f32.mrb[19].mxu1 }
 0x11b   :  { %v1486_v54 = vadd.f32 %v1485_v53, %v1484_v48 }
 0x11c   :  { %v1917_v55 = vadd.f32 %v1483_v46, %v601_v51  ;;  %v604_v56 = vadd.f32 %v1404_v52, %v1866_v16 }
 0x11e   :  { %v893_v57 = vadd.f32 %v892_v40, %v1917_v55  ;;  %v920_v58 = vmul.f32 %v1917_v55, %v1917_v55  ;;  %v1923_v59 = vadd.f32 %v1486_v54, %v604_v56  ;;  %v1405_v60 = vpop.f32.mrb[20].mxu0 }
 0x11f   :  { %v1487_v61 = vpop.f32.mrb[20].mxu1  ;;  %v1406_v62 = vpop.f32.mrb[21].mxu0 }
 0x120   :  { %v940_v63 = vadd.f32 %v939_v50, %v920_v58  ;;  %v894_v0 = vadd.f32 %v893_v57, %v1923_v59  ;;  %v921_v1 = vmul.f32 %v1923_v59, %v1923_v59  ;;  %v1407_v2 = vadd.f32 %v1406_v62, %v1405_v60  ;;  %v1488_v3 = vpop.f32.mrb[21].mxu1  ;;  %v1408_v5 = vpop.f32.mrb[22].mxu0 }
 0x121   :  { %v1489_v6 = vadd.f32 %v1488_v3, %v1487_v61  ;;  %v1490_v7 = vpop.f32.mrb[22].mxu1  ;;  %v1409_v9 = vpop.f32.mrb[23].mxu0 }
 0x122   :  { %v941_v10 = vadd.f32 %v940_v63, %v921_v1  ;;  %v609_v11 = vadd.f32 %v1407_v2, %v1866_v16  ;;  %v1410_v12 = vadd.f32 %v1409_v9, %v1408_v5  ;;  %v1491_v13 = vpop.f32.mrb[23].mxu1 }
 0x123   :  { %v1492_v14 = vadd.f32 %v1491_v13, %v1490_v7 }
 0x124   :  { %v1929_v15 = vadd.f32 %v1489_v6, %v609_v11  ;;  %v612_v17 = vadd.f32 %v1410_v12, %v1866_v16 }
 0x126   :  { %v895_v18 = vadd.f32 %v894_v0, %v1929_v15  ;;  %v922_v19 = vmul.f32 %v1929_v15, %v1929_v15  ;;  %v1935_v20 = vadd.f32 %v1492_v14, %v612_v17  ;;  %v1411_v21 = vpop.f32.mrb[24].mxu0 }
 0x127   :  { %v1493_v22 = vpop.f32.mrb[24].mxu1  ;;  %v1412_v23 = vpop.f32.mrb[25].mxu0 }
 0x128   :  { %v942_v24 = vadd.f32 %v941_v10, %v922_v19  ;;  %v896_v25 = vadd.f32 %v895_v18, %v1935_v20  ;;  %v923_v26 = vmul.f32 %v1935_v20, %v1935_v20  ;;  %v1413_v27 = vadd.f32 %v1412_v23, %v1411_v21  ;;  %v1494_v31 = vpop.f32.mrb[25].mxu1  ;;  %v1414_v32 = vpop.f32.mrb[26].mxu0 }
 0x129   :  { %v1495_v33 = vadd.f32 %v1494_v31, %v1493_v22  ;;  %v1496_v34 = vpop.f32.mrb[26].mxu1  ;;  %v1415_v36 = vpop.f32.mrb[27].mxu0 }
 0x12a   :  { %v943_v37 = vadd.f32 %v942_v24, %v923_v26  ;;  %v617_v38 = vadd.f32 %v1413_v27, %v1866_v16  ;;  %v1416_v39 = vadd.f32 %v1415_v36, %v1414_v32  ;;  %v1497_v40 = vpop.f32.mrb[27].mxu1 }
 0x12b   :  { %v1498_v41 = vadd.f32 %v1497_v40, %v1496_v34 }
 0x12c   :  { %v1941_v42 = vadd.f32 %v1495_v33, %v617_v38  ;;  %v620_v43 = vadd.f32 %v1416_v39, %v1866_v16 }
 0x12e   :  { %v897_v45 = vadd.f32 %v896_v25, %v1941_v42  ;;  %v924_v46 = vmul.f32 %v1941_v42, %v1941_v42  ;;  %v1947_v48 = vadd.f32 %v1498_v41, %v620_v43  ;;  %v1417_v49 = vpop.f32.mrb[28].mxu0 }
 0x12f   :  { %v1499_v50 = vpop.f32.mrb[28].mxu1  ;;  %v1418_v51 = vpop.f32.mrb[29].mxu0 }
 0x130   :  { %v944_v52 = vadd.f32 %v943_v37, %v924_v46  ;;  %v898_v53 = vadd.f32 %v897_v45, %v1947_v48  ;;  %v925_v54 = vmul.f32 %v1947_v48, %v1947_v48  ;;  %v1419_v56 = vadd.f32 %v1418_v51, %v1417_v49  ;;  %v1500_v57 = vpop.f32.mrb[29].mxu1  ;;  %v1420_v58 = vpop.f32.mrb[30].mxu0 }
 0x131   :  { %v1501_v60 = vadd.f32 %v1500_v57, %v1499_v50  ;;  %v1502_v61 = vpop.f32.mrb[30].mxu1  ;;  %v1421_v62 = vpop.f32.mrb[31].mxu0  ;;  %v822_v45 = vlaneseq }
 0x132   :  { %v945_v63 = vadd.f32 %v944_v52, %v925_v54  ;;  %v625_v0 = vadd.f32 %v1419_v56, %v1866_v16  ;;  %v1422_v1 = vadd.f32 %v1421_v62, %v1420_v58  ;;  %v1503_v2 = vpop.f32.mrb[31].mxu1 }
 0x133   :  { %v1504_v3 = vadd.f32 %v1503_v2, %v1502_v61 }
 0x134   :  { %v1953_v5 = vadd.f32 %v1501_v60, %v625_v0  ;;  %v628_v6 = vadd.f32 %v1422_v1, %v1866_v16  ;;  %v823_v0 = vshrl.u32 %v822_v45, 7 }
 0x136   :  { %v899_v7 = vadd.f32 %v898_v53, %v1953_v5  ;;  %v926_v9 = vmul.f32 %v1953_v5, %v1953_v5  ;;  %v1959_v10 = vadd.f32 %v1504_v3, %v628_v6  ;;  %v1423_v11 = vpop.f32.mrb[32].mxu0 }
 0x137   :  { %v1505_v12 = vpop.f32.mrb[32].mxu1  ;;  %v1424_v13 = vpop.f32.mrb[33].mxu0 }
 0x138   :  { %v946_v14 = vadd.f32 %v945_v63, %v926_v9  ;;  %v900_v17 = vadd.f32 %v899_v7, %v1959_v10  ;;  %v927_v18 = vmul.f32 %v1959_v10, %v1959_v10  ;;  %v1425_v19 = vadd.f32 %v1424_v13, %v1423_v11  ;;  %v1506_v21 = vpop.f32.mrb[33].mxu1  ;;  %v1426_v22 = vpop.f32.mrb[34].mxu0 }
 0x139   :  { %v1507_v23 = vadd.f32 %v1506_v21, %v1505_v12  ;;  %v1508_v24 = vpop.f32.mrb[34].mxu1  ;;  %v1427_v25 = vpop.f32.mrb[35].mxu0  ;;  %v843_v13 = vadd.s32 160, %v823_v0 }
 0x13a   :  { %v947_v26 = vadd.f32 %v946_v14, %v927_v18  ;;  %v633_v27 = vadd.f32 %v1425_v19, %v1866_v16  ;;  %v1428_v31 = vadd.f32 %v1427_v25, %v1426_v22  ;;  %v1509_v32 = vpop.f32.mrb[35].mxu1 }
 0x13b   :  { %v1510_v33 = vadd.f32 %v1509_v32, %v1508_v24  ;;  %vm864_vm0 = vcmp.lt.s32.totalorder %v843_v13, 162 }
 0x13c   :  { %v1965_v34 = vadd.f32 %v1507_v23, %v633_v27  ;;  %v636_v36 = vadd.f32 %v1428_v31, %v1866_v16 }
 0x13e   :  { %v901_v37 = vadd.f32 %v900_v17, %v1965_v34  ;;  %v928_v38 = vmul.f32 %v1965_v34, %v1965_v34  ;;  %v1971_v39 = vadd.f32 %v1510_v33, %v636_v36  ;;  %v1429_v40 = vpop.f32.mrb[36].mxu0 }
 0x13f   :  { %v1511_v41 = vpop.f32.mrb[36].mxu1  ;;  %v1430_v43 = vpop.f32.mrb[37].mxu0 }
 0x140   :  { %v948_v46 = vadd.f32 %v947_v26, %v928_v38  ;;  %v902_v49 = vadd.f32 %v901_v37, %v1971_v39  ;;  %v929_v50 = vmul.f32 %v1971_v39, %v1971_v39  ;;  %v1431_v51 = vadd.f32 %v1430_v43, %v1429_v40  ;;  %v1512_v52 = vpop.f32.mrb[37].mxu1  ;;  %v1432_v53 = vpop.f32.mrb[38].mxu0 }
 0x141   :  { %v1513_v54 = vadd.f32 %v1512_v52, %v1511_v41  ;;  %v1514_v56 = vpop.f32.mrb[38].mxu1  ;;  %v1433_v57 = vpop.f32.mrb[39].mxu0 }
 0x142   :  { %v949_v58 = vadd.f32 %v948_v46, %v929_v50  ;;  %v641_v60 = vadd.f32 %v1431_v51, %v1866_v16  ;;  %v1434_v61 = vadd.f32 %v1433_v57, %v1432_v53  ;;  %v1515_v62 = vpop.f32.mrb[39].mxu1 }
 0x143   :  { %v1516_v63 = vadd.f32 %v1515_v62, %v1514_v56 }
 0x144   :  { %v1977_v1 = vadd.f32 %v1513_v54, %v641_v60  ;;  %v644_v2 = vadd.f32 %v1434_v61, %v1866_v16 }
 0x146   :  { %v903_v3 = vadd.f32 %v902_v49, %v1977_v1  ;;  %v930_v6 = vmul.f32 %v1977_v1, %v1977_v1  ;;  %v1983_v7 = vadd.f32 %v1516_v63, %v644_v2  ;;  %v1435_v9 = vpop.f32.mrb[40].mxu0 }
 0x147   :  { %v1517_v11 = vpop.f32.mrb[40].mxu1  ;;  %v1436_v12 = vpop.f32.mrb[41].mxu0 }
 0x148   :  { %v950_v14 = vadd.f32 %v949_v58, %v930_v6  ;;  %v904_v17 = vadd.f32 %v903_v3, %v1983_v7  ;;  %v931_v18 = vmul.f32 %v1983_v7, %v1983_v7  ;;  %v1437_v19 = vadd.f32 %v1436_v12, %v1435_v9  ;;  %v1518_v21 = vpop.f32.mrb[41].mxu1  ;;  %v1438_v22 = vpop.f32.mrb[42].mxu0 }
 0x149   :  { %v1519_v23 = vadd.f32 %v1518_v21, %v1517_v11  ;;  %v1520_v24 = vpop.f32.mrb[42].mxu1  ;;  %v1439_v25 = vpop.f32.mrb[43].mxu0 }
 0x14a   :  { %v951_v26 = vadd.f32 %v950_v14, %v931_v18  ;;  %v649_v27 = vadd.f32 %v1437_v19, %v1866_v16  ;;  %v1521_v31 = vpop.f32.mrb[43].mxu1 }
 0x14c   :  { %v1989_v32 = vadd.f32 %v1519_v23, %v649_v27 }
 0x14e   :  { %v885_v33 = vsel %vm864_vm0, %v1989_v32, 0.0 }
 0x14f   :  { %v905_v36 = vadd.f32 %v904_v17, %v885_v33  ;;  %v932_v37 = vmul.f32 %v885_v33, %v885_v33 }
 0x151   :  { %v906_v38 = vrot.slane %v905_v36, 4  ;;  %v952_v40 = vadd.f32 %v951_v26, %v932_v37 }
 0x153   :  { %v907_v41 = vadd.f32 %v906_v38, %v905_v36  ;;  %v953_v43 = vrot.slane %v952_v40, 4 }
 0x155   :  { %v908_v45 = vrot.slane %v907_v41, 2  ;;  %v954_v46 = vadd.f32 %v953_v43, %v952_v40 }
 0x157   :  { %v909_v49 = vadd.f32 %v908_v45, %v907_v41  ;;  %v955_v50 = vrot.slane %v954_v46, 2 }
 0x159   :  { %v910_v51 = vrot.slane %v909_v49, 1  ;;  %v956_v52 = vadd.f32 %v955_v50, %v954_v46 }
 0x15b   :  { %v911_v53 = vadd.f32 %v910_v51, %v909_v49  ;;  %v957_v16 = vrot.slane %v956_v52, 1 }
 0x15d   :  { %v958_v54 = vadd.f32 %v957_v16, %v956_v52  ;;  %v959_v56 = vmul.f32 0.0061728396, %v911_v53 }
 0x15f   :  { %v960_v57 = vmul.f32 0.0061728396, %v958_v54  ;;  %v961_v58 = vmul.f32 %v959_v56, %v959_v56  ;;  %v969_v60 = vsub.f32 %v1898_v8, %v959_v56  ;;  %v970_v62 = vsub.f32 %v1905_v29, %v959_v56 }
 0x160   :  { %v971_v63 = vsub.f32 %v1911_v35, %v959_v56  ;;  %v972_v0 = vsub.f32 %v1917_v55, %v959_v56  ;;  %v973_v2 = vsub.f32 %v1923_v59, %v959_v56  ;;  %v974_v3 = vsub.f32 %v1929_v15, %v959_v56 }
 0x161   :  { %v962_v61 = vsub.f32 %v960_v57, %v961_v58  ;;  %v975_v6 = vsub.f32 %v1935_v20, %v959_v56  ;;  %v976_v9 = vsub.f32 %v1941_v42, %v959_v56  ;;  %v977_v12 = vsub.f32 %v1947_v48, %v959_v56 }
 0x162   :  { %v978_v8 = vsub.f32 %v1953_v5, %v959_v56  ;;  %v979_v13 = vsub.f32 %v1959_v10, %v959_v56  ;;  %v980_v29 = vsub.f32 %v1965_v34, %v959_v56  ;;  %v981_v35 = vsub.f32 %v1971_v39, %v959_v56 }
 0x163   :  { %v963_v11 = vmax.f32 %v962_v61, 0.0  ;;  %v982_v55 = vsub.f32 %v1977_v1, %v959_v56  ;;  %v983_v59 = vsub.f32 %v1983_v7, %v959_v56  ;;  %v984_v15 = vsub.f32 %v1989_v32, %v959_v56 }
 0x164   :  { %v964_v42 = vsub.f32 %v1869_v28, %v959_v56  ;;  %v965_v48 = vsub.f32 %v1872_v30, %v959_v56  ;;  %v966_v5 = vsub.f32 %v1875_v44, %v959_v56  ;;  %v967_v10 = vsub.f32 %v1880_v47, %v959_v56 }
 0x165   :  { %v985_v20 = vadd.f32 1e-05, %v963_v11  ;;  %v968_v34 = vsub.f32 %v1892_v4, %v959_v56 }
 0x167   :  { %1619 = vrsqrt.f32 %v985_v20 }
 0x171   :  { %v1620_v14 = vpop.eup %1619 }
 0x172   :  { %v987_v39 = vmul.f32 %v1620_v14, %v964_v42  ;;  %v988_v17 = vmul.f32 %v1620_v14, %v965_v48  ;;  %v989_v1 = vmul.f32 %v1620_v14, %v966_v5  ;;  %v990_v18 = vmul.f32 %v1620_v14, %v967_v10 }
 0x173   :  { %v2013_v7 = vmul.f32 %v1620_v14, %v968_v34  ;;  %v2015_v19 = vmul.f32 %v1620_v14, %v969_v60  ;;  %v2017_v21 = vmul.f32 %v1620_v14, %v970_v62  ;;  %v2019_v28 = vmul.f32 %v1620_v14, %v971_v63 }
 0x174   :  { %v2021_v30 = vmul.f32 %v1620_v14, %v972_v0  ;;  %v2023_v44 = vmul.f32 %v1620_v14, %v973_v2  ;;  %v2025_v47 = vmul.f32 %v1620_v14, %v974_v3  ;;  %v2027_v22 = vmul.f32 %v1620_v14, %v975_v6 }
 0x175   :  { %v2029_v4 = vmul.f32 %v1620_v14, %v976_v9  ;;  %v2031_v23 = vmul.f32 %v1620_v14, %v977_v12  ;;  %v2033_v24 = vmul.f32 %v1620_v14, %v978_v8  ;;  %v2035_v25 = vmul.f32 %v1620_v14, %v979_v13 }
 0x176   :  { %v2037_v26 = vmul.f32 %v1620_v14, %v980_v29  ;;  %v2039_v27 = vmul.f32 %v1620_v14, %v981_v35  ;;  %v2041_v31 = vmul.f32 %v1620_v14, %v982_v55  ;;  %v2043_v32 = vmul.f32 %v1620_v14, %v983_v59 }
 0x177   :  { %v2045_v33 = vmul.f32 %v1620_v14, %v984_v15  ;;  %vm1008_vm1 = vcmp.ge.f32.partialorder %v987_v39, 0.0  ;;  %vm1009_vm2 = vcmp.ge.f32.partialorder %v988_v17, 0.0  ;;  %vm1010_vm3 = vcmp.ge.f32.partialorder %v989_v1, 0.0 }
 0x178   :  { %vm1011_vm4 = vcmp.ge.f32.partialorder %v990_v18, 0.0  ;;  %vm1012_vm5 = vcmp.ge.f32.partialorder %v2013_v7, 0.0  ;;  %vm1013_vm6 = vcmp.ge.f32.partialorder %v2015_v19, 0.0  ;;  %vm1019_vm12 = vcmp.ge.f32.partialorder %v2027_v22, 0.0 }
 0x179   :  { %vm1020_vm13 = vcmp.ge.f32.partialorder %v2029_v4, 0.0  ;;  %vm1021_vm14 = vcmp.ge.f32.partialorder %v2031_v23, 0.0  ;;  %vm1022_vm15 = vcmp.ge.f32.partialorder %v2033_v24, 0.0  ;;  %vm1023_vm0 = vcmp.ge.f32.partialorder %v2035_v25, 0.0 }
 0x17a   :  { %vm1024_vm7 = vcmp.ge.f32.partialorder %v2037_v26, 0.0  ;;  %vm1025_vm8 = vcmp.ge.f32.partialorder %v2039_v27, 0.0  ;;  %vm1026_vm9 = vcmp.ge.f32.partialorder %v2041_v31, 0.0  ;;  %vm1027_vm10 = vcmp.ge.f32.partialorder %v2043_v32, 0.0 }
 0x17b   :  { %vm1028_vm11 = vcmp.ge.f32.partialorder %v2045_v33, 0.0  ;;  %v1029_v36 = vmul.f32 0.01, %v987_v39  ;;  %v1030_v37 = vmul.f32 0.01, %v988_v17 }
 0x17c   :  { %v1031_v38 = vmul.f32 0.01, %v989_v1  ;;  %v1032_v40 = vmul.f32 0.01, %v990_v18  ;;  %v1033_v41 = vmul.f32 0.01, %v2013_v7 }
 0x17d   :  { %v1034_v43 = vmul.f32 0.01, %v2015_v19  ;;  %v1035_v45 = vmul.f32 0.01, %v2017_v21  ;;  %v1036_v46 = vmul.f32 0.01, %v2019_v28  ;;  %v1050_v49 = vsel %vm1008_vm1, %v987_v39, %v1029_v36 }
 0x17e   :  { %v1037_v50 = vmul.f32 0.01, %v2021_v30  ;;  %v1038_v51 = vmul.f32 0.01, %v2023_v44  ;;  %v1039_v52 = vmul.f32 0.01, %v2025_v47  ;;  %v1051_v53 = vsel %vm1009_vm2, %v988_v17, %v1030_v37 }
 0x17f   :  { %v1040_v16 = vmul.f32 0.01, %v2027_v22  ;;  %v1041_v54 = vmul.f32 0.01, %v2029_v4  ;;  %v1042_v56 = vmul.f32 0.01, %v2031_v23  ;;  %v1052_v57 = vsel %vm1010_vm3, %v989_v1, %v1031_v38 }
 0x180   :  { %v1043_v58 = vmul.f32 0.01, %v2033_v24  ;;  %v1044_v60 = vmul.f32 0.01, %v2035_v25  ;;  %v1045_v61 = vmul.f32 0.01, %v2037_v26  ;;  %v1053_v62 = vsel %vm1011_vm4, %v990_v18, %v1032_v40 }
 0x181   :  { %v1046_v63 = vmul.f32 0.01, %v2039_v27  ;;  %v1047_v0 = vmul.f32 0.01, %v2041_v31  ;;  %v1048_v2 = vmul.f32 0.01, %v2043_v32  ;;  %v1054_v3 = vsel %vm1012_vm5, %v2013_v7, %v1033_v41 }
 0x182   :  { %v1049_v6 = vmul.f32 0.01, %v2045_v33  ;;  %v1055_v9 = vsel %vm1013_vm6, %v2015_v19, %v1034_v43  ;;  %vm2173_vm1 = vcmp.ge.f32.partialorder %v2017_v21, 0.0  ;;  %vm2174_vm2 = vcmp.ge.f32.partialorder %v2019_v28, 0.0 }
 0x183   :  { %v1056_v11 = vsel %vm2173_vm1, %v2017_v21, %v1035_v45  ;;  %v1057_v12 = vsel %vm2174_vm2, %v2019_v28, %v1036_v46  ;;  %vm2175_vm3 = vcmp.ge.f32.partialorder %v2021_v30, 0.0  ;;  %vm2176_vm4 = vcmp.ge.f32.partialorder %v2023_v44, 0.0 }
 0x184   :  { %v1058_v8 = vsel %vm2175_vm3, %v2021_v30, %v1037_v50  ;;  %v1059_v13 = vsel %vm2176_vm4, %v2023_v44, %v1038_v51  ;;  %vm2177_vm5 = vcmp.ge.f32.partialorder %v2025_v47, 0.0  ;;  %v1061_v35 = vsel %vm1019_vm12, %v2027_v22, %v1040_v16 }
 0x185   :  { %v1060_v29 = vsel %vm2177_vm5, %v2025_v47, %v1039_v52  ;;  %v1062_v55 = vsel %vm1020_vm13, %v2029_v4, %v1041_v54  ;;  %v1063_v59 = vsel %vm1021_vm14, %v2031_v23, %v1042_v56  ;;  %v1064_v15 = vsel %vm1022_vm15, %v2033_v24, %v1043_v58 }
 0x186   :  { %v1065_v20 = vsel %vm1023_vm0, %v2035_v25, %v1044_v60  ;;  %v1066_v42 = vsel %vm1024_vm7, %v2037_v26, %v1045_v61  ;;  %v1067_v48 = vsel %vm1025_vm8, %v2039_v27, %v1046_v63  ;;  %v1068_v5 = vsel %vm1026_vm9, %v2041_v31, %v1047_v0 }
 0x187   :  { %v1069_v10 = vsel %vm1027_vm10, %v2043_v32, %v1048_v2  ;;  %v1070_v14 = vsel %vm1028_vm11, %v2045_v33, %v1049_v6  ;;  %v1303_v34 = vpack.c.bf16 %v1051_v53, %v1050_v49  ;;  %v1308_v39 = vpack.c.bf16 %v1053_v62, %v1052_v57 }
 0x188   :  { %v1313_v17 = vpack.c.bf16 %v1055_v9, %v1054_v3  ;;  %v1299_v1 = vpack.c.bf16 %v1070_v14, %v1070_v14  ;;  %v1318_v18 = vpack.c.bf16 %v1057_v12, %v1056_v11  ;;  %v1323_v7 = vpack.c.bf16 %v1059_v13, %v1058_v8 }
 0x189   :  { %v1328_v19 = vpack.c.bf16 %v1061_v35, %v1060_v29  ;;  %1304 = vst [vmem:[%s2172_s3] sm:$0xff] %v1303_v34   ;;  %1350 = vst [vmem:[%s2172_s3 + $0x8] sm:$0xff] %v1308_v39   ;;  %v1333_v21 = vpack.c.bf16 %v1063_v59, %v1062_v55  ;;  %v1338_v28 = vpack.c.bf16 %v1065_v20, %v1064_v15 }
 0x18a   :  { %1351 = vst [vmem:[%s2172_s3 + $0x10] sm:$0xff] %v1313_v17   ;;  %v1343_v30 = vpack.c.bf16 %v1067_v48, %v1066_v42  ;;  %v1348_v44 = vpack.c.bf16 %v1069_v10, %v1068_v5  ;;  %1352 = vst [vmem:[%s2172_s3 + $0x18] sm:$0xff] %v1318_v18  }
 0x18b   :  { %1353 = vst [vmem:[%s2172_s3 + $0x20] sm:$0xff] %v1323_v7   ;;  %1354 = vst [vmem:[%s2172_s3 + $0x28] sm:$0xff] %v1328_v19  }
 0x18c   :  { %1176 = vst [vmem:[%s2172_s3 + $0x50] sm:$0xf] %v1299_v1  ;;  %1355 = vst [vmem:[%s2172_s3 + $0x30] sm:$0xff] %v1333_v21  }
 0x18d   :  { %1356 = vst [vmem:[%s2172_s3 + $0x38] sm:$0xff] %v1338_v28   ;;  %1357 = vst [vmem:[%s2172_s3 + $0x40] sm:$0xff] %v1343_v30  }
 0x18e   :  { %1358 = vst [vmem:[%s2172_s3 + $0x48] sm:$0xff] %v1348_v44  }

// kernel: actor_forward.6
= control target key start
LH: loop header
LB: loop body
LE: loop exit
PB: predicated region body
PF: predicated region fallthrough
CT: control target
= control target key end

     0   :  { %vm372_vm0 = vcmask 523264   ;;  %s974_s1 = inlined_call_operand.vmem [shape: bf16[576,128], index: 1, kind: input, shape index: {}]   ;;  %s975_s0 = inlined_call_operand.vmem [shape: bf16[32,576], index: 0, kind: input, shape index: {}]   ;;  %s976_s2 = inlined_call_operand.vmem [shape: f32[1,128], index: 2, kind: input, shape index: {}]   ;;  %s977_s3 = inlined_call_operand.vmem [shape: bf16[32,128], index: 3, kind: output, shape index: {}]  }
   0x1   :  { %v755_v0 = vld [vmem:[%s974_s1 + $0x40] sm:$0xff]   ;;  %v759_v4 = vld [vmem:[%s974_s1 + $0x48] sm:$0xff]   ;;  %v763_v8 = vld [vmem:[%s974_s1 + $0x50] sm:$0xff]  }
   0x2   :  { %v756_v1 = vld [vmem:[%s974_s1] sm:$0xff]   ;;  %681 = vmatprep.subr.bf16.mxu0 %v755_v0  ;;  %v760_v5 = vld [vmem:[%s974_s1 + $0x8] sm:$0xff]   ;;  %v764_v9 = vld [vmem:[%s974_s1 + $0x10] sm:$0xff]  }
   0x3   :  { %v757_v2 = vld [vmem:[%s974_s1 + $0xc0] sm:$0xff]   ;;  %682 = vmatpush3.bf16.msra.mxu0 %v756_v1  ;;  %v761_v6 = vld [vmem:[%s974_s1 + $0xc8] sm:$0xff]   ;;  %v765_v10 = vld [vmem:[%s974_s1 + $0xd0] sm:$0xff]  }
   0x4   :  { %v758_v3 = vld [vmem:[%s974_s1 + $0x80] sm:$0xff]   ;;  %709 = vmatprep.subr.bf16.mxu1 %v757_v2  ;;  %683 = vmatprep.subr.bf16.mxu0 %v759_v4  ;;  %v762_v7 = vld [vmem:[%s974_s1 + $0x88] sm:$0xff]   ;;  %v766_v11 = vld [vmem:[%s974_s1 + $0x90] sm:$0xff]  }
   0x5   :  { %710 = vmatpush3.bf16.msra.mxu1 %v758_v3  ;;  %v767_v12 = vld [vmem:[%s974_s1 + $0x58] sm:$0xff]   ;;  %v771_v16 = vld [vmem:[%s974_s1 + $0x60] sm:$0xff]   ;;  %v775_v20 = vld [vmem:[%s974_s1 + $0x68] sm:$0xff]  }
   0x6   :  { %711 = vmatprep.subr.bf16.mxu1 %v761_v6  ;;  %v768_v13 = vld [vmem:[%s974_s1 + $0x18] sm:$0xff]   ;;  %v772_v17 = vld [vmem:[%s974_s1 + $0x20] sm:$0xff]   ;;  %v776_v21 = vld [vmem:[%s974_s1 + $0x28] sm:$0xff]  }
   0x7   :  { %684 = vmatpush3.bf16.msra.mxu0 %v760_v5  ;;  %v769_v14 = vld [vmem:[%s974_s1 + $0xd8] sm:$0xff]   ;;  %v773_v18 = vld [vmem:[%s974_s1 + $0xe0] sm:$0xff]   ;;  %v777_v22 = vld [vmem:[%s974_s1 + $0xe8] sm:$0xff]  }
   0x8   :  { %685 = vmatprep.subr.bf16.mxu0 %v763_v8  ;;  %v770_v15 = vld [vmem:[%s974_s1 + $0x98] sm:$0xff]   ;;  %v774_v19 = vld [vmem:[%s974_s1 + $0xa0] sm:$0xff]   ;;  %v778_v23 = vld [vmem:[%s974_s1 + $0xa8] sm:$0xff]  }
   0x9   :  { %712 = vmatpush3.bf16.msra.mxu1 %v762_v7  ;;  %v779_v24 = vld [vmem:[%s974_s1 + $0x70] sm:$0xff]   ;;  %v783_v28 = vld [vmem:[%s974_s1 + $0x78] sm:$0xff]   ;;  %v790_v34 = vld [vmem:[%s974_s1 + $0x100] sm:$0xff]  }
   0xa   :  { %713 = vmatprep.subr.bf16.mxu1 %v765_v10  ;;  %v780_v25 = vld [vmem:[%s974_s1 + $0x30] sm:$0xff]   ;;  %v784_v29 = vld [vmem:[%s974_s1 + $0x38] sm:$0xff]   ;;  %v793_v36 = vld [vmem:[%s975_s0 + $0xc] ss:$20 sps:$4 sm:$0xff]  }
   0xb   :  { %686 = vmatpush3.bf16.msra.mxu0 %v764_v9  ;;  %v781_v26 = vld [vmem:[%s974_s1 + $0xf0] sm:$0xff]   ;;  %v785_v30 = vld [vmem:[%s974_s1 + $0xf8] sm:$0xff]   ;;  %v794_v37 = vld [vmem:[%s974_s1 + $0x108] sm:$0xff]   ;;  %460 = vmatprep.mubr.bf16.mxu1 %v793_v36 }
   0xc   :  { %687 = vmatprep.subr.bf16.mxu0 %v767_v12  ;;  %v782_v27 = vld [vmem:[%s974_s1 + $0xb0] sm:$0xff]   ;;  %v788_v32 = vld [vmem:[%s975_s0 + $0x4] ss:$20 sps:$4 sm:$0xff]   ;;  %v791_v35 = vld [vmem:[%s975_s0 + $0x8] ss:$20 sps:$4 sm:$0xff]  }
   0xd   :  { %714 = vmatpush3.bf16.msra.mxu1 %v766_v11  ;;  %v786_v31 = vld [vmem:[%s975_s0] ss:$20 sps:$4 sm:$0xff]   ;;  %v789_v33 = vld [vmem:[%s974_s1 + $0xb8] sm:$0xff]   ;;  %411 = vmatprep.mubr.bf16.mxu0 %v788_v32  ;;  %v801_v42 = vld [vmem:[%s975_s0 + $0x30] ss:$20 sps:$4 sm:$0xff]  }
   0xe   :  { %715 = vmatprep.subr.bf16.mxu1 %v769_v14  ;;  %v795_v38 = vld [vmem:[%s975_s0 + $0x2c] ss:$20 sps:$4 sm:$0xff]   ;;  %v797_v39 = vld [vmem:[%s975_s0 + $0x28] ss:$20 sps:$4 sm:$0xff]   ;;  %v798_v40 = vld [vmem:[%s974_s1 + $0x110] sm:$0xff]  }
   0xf   :  { %688 = vmatpush3.bf16.msra.mxu0 %v768_v13  ;;  %v799_v41 = vld [vmem:[%s975_s0 + $0x34] ss:$20 sps:$4 sm:$0xff]   ;;  %v802_v43 = vld [vmem:[%s974_s1 + $0x118] sm:$0xff]   ;;  %v803_v44 = vld [vmem:[%s975_s0 + $0x10] ss:$20 sps:$4 sm:$0xff]  }
  0x10   :  { %689 = vmatprep.subr.bf16.mxu0 %v771_v16  ;;  %v804_v45 = vld [vmem:[%s975_s0 + $0x38] ss:$20 sps:$4 sm:$0xff]   ;;  %v613_v47 = vld [vmem:[%s976_s2] ss:$0 sm:$0xff] }
  0x11   :  { %716 = vmatpush3.bf16.msra.mxu1 %v770_v15 }
  0x12   :  { %717 = vmatprep.subr.bf16.mxu1 %v773_v18 }
  0x13   :  { %690 = vmatpush3.bf16.msra.mxu0 %v772_v17 }
  0x14   :  { %691 = vmatprep.subr.bf16.mxu0 %v775_v20 }
  0x15   :  { %718 = vmatpush3.bf16.msra.mxu1 %v774_v19 }
  0x16   :  { %719 = vmatprep.subr.bf16.mxu1 %v777_v22 }
  0x17   :  { %692 = vmatpush3.bf16.msra.mxu0 %v776_v21 }
  0x18   :  { %693 = vmatprep.subr.bf16.mxu0 %v779_v24 }
  0x19   :  { %720 = vmatpush3.bf16.msra.mxu1 %v778_v23 }
  0x1a   :  { %721 = vmatprep.subr.bf16.mxu1 %v781_v26 }
  0x1b   :  { %694 = vmatpush3.bf16.msra.mxu0 %v780_v25 }
  0x1c   :  { %695 = vmatprep.subr.bf16.mxu0 %v783_v28 }
  0x1d   :  { %722 = vmatpush3.bf16.msra.mxu1 %v782_v27 }
  0x1e   :  { %723 = vmatprep.subr.bf16.mxu1 %v785_v30 }
  0x1f   :  { %696 = vmatpush3.bf16.msra.mxu0 %v784_v29 }
  0x20   :  { %743 = vmatprep.subr.bf16.mxu0 %v790_v34 }
  0x21   :  { %724 = vmatpush3.bf16.msra.mxu1 %v789_v33 }
  0x22   :  { %412 = vmatmul.mubr.bf16.vlgmr.msra.gmra.mrb[0].mxu0 %v786_v31 }
  0x23   :  { %744 = vmatpush3.bf16.msra.mxu0 %v790_v34  ;;  %419 = vmatprep.mubr.bf16.mxu0 %v795_v38 }
  0x24   :  { %461 = vmatmul.mubr.bf16.vlgmr.msra.gmra.mrb[0].mxu1 %v791_v35  ;;  %745 = vmatprep.subr.bf16.mxu0 %v794_v37 }
  0x25   :  { %468 = vmatprep.mubr.bf16.mxu1 %v799_v41 }
  0x27   :  { %746 = vmatpush3.bf16.msra.mxu0 %v794_v37 }
  0x28   :  { %747 = vmatprep.subr.bf16.mxu0 %v798_v40 }
  0x2a   :  { %420 = vmatmul.mubr.bf16.gmra.mrb[4].mxu0 %v797_v39 }
  0x2b   :  { %751 = vmatprep.mubr.msk.bf16.mxu0 %vm372_vm0, %v803_v44  ;;  %748 = vmatpush3.bf16.msra.mxu0 %v798_v40 }
  0x2c   :  { %469 = vmatmul.mubr.bf16.gmra.mrb[4].mxu1 %v801_v42  ;;  %749 = vmatprep.subr.bf16.mxu0 %v802_v43 }
  0x2f   :  { %750 = vmatpush3.bf16.msra.mxu0 %v802_v43 }
  0x32   :  { %752 = vmatmul.mubr.msk.bf16.vlgmr.msra.gmra.mrb[8].mxu0 %vm372_vm0, %v804_v45 }
  0xf5   :  { %v697_v46 = vpop.f32.mrb[0].mxu0 }
  0xf6   :  { %v698_v48 = vpop.f32.mrb[1].mxu0 }
  0xf7   :  { %v699_v49 = vadd.f32 %v698_v48, %v697_v46  ;;  %v700_v50 = vpop.f32.mrb[2].mxu0  ;;  %v725_v51 = vpop.f32.mrb[0].mxu1 }
  0xf8   :  { %v701_v52 = vpop.f32.mrb[3].mxu0  ;;  %v726_v55 = vpop.f32.mrb[1].mxu1 }
  0xf9   :  { %v414_v53 = vadd.f32 %v699_v49, %v613_v47  ;;  %v702_v54 = vadd.f32 %v701_v52, %v700_v50  ;;  %v727_v56 = vadd.f32 %v726_v55, %v725_v51  ;;  %v728_v57 = vpop.f32.mrb[2].mxu1 }
  0xfa   :  { %v729_v59 = vpop.f32.mrb[3].mxu1 }
  0xfb   :  { %v417_v58 = vadd.f32 %v702_v54, %v613_v47  ;;  %v730_v60 = vadd.f32 %v729_v59, %v728_v57  ;;  %v463_v61 = vadd.f32 %v727_v56, %v414_v53 }
  0xfd   :  { %v703_v62 = vpop.f32.mrb[4].mxu0  ;;  %v466_v0 = vadd.f32 %v730_v60, %v417_v58 }
  0xfe   :  { %v704_v63 = vpop.f32.mrb[5].mxu0 }
  0xff   :  { %v705_v1 = vadd.f32 %v704_v63, %v703_v62  ;;  %v706_v2 = vpop.f32.mrb[6].mxu0  ;;  %v731_v3 = vpop.f32.mrb[4].mxu1 }
 0x100   :  { %v707_v4 = vpop.f32.mrb[7].mxu0  ;;  %v732_v7 = vpop.f32.mrb[5].mxu1 }
 0x101   :  { %v422_v5 = vadd.f32 %v705_v1, %v613_v47  ;;  %v708_v6 = vadd.f32 %v707_v4, %v706_v2  ;;  %v733_v8 = vadd.f32 %v732_v7, %v731_v3  ;;  %v734_v9 = vpop.f32.mrb[6].mxu1 }
 0x102   :  { %v735_v11 = vpop.f32.mrb[7].mxu1 }
 0x103   :  { %v425_v10 = vadd.f32 %v708_v6, %v613_v47  ;;  %v736_v12 = vadd.f32 %v735_v11, %v734_v9  ;;  %v471_v13 = vadd.f32 %v733_v8, %v422_v5 }
 0x105   :  { %v753_v14 = vpop.f32.mrb[8].mxu0  ;;  %v474_v15 = vadd.f32 %v736_v12, %v425_v10 }
 0x106   :  { %v520_v16 = vadd.f32 %v753_v14, %v471_v13  ;;  %v511_v17 = vpop.f32.mrb[9].mxu0 }
 0x107   :  { %v512_v18 = vadd.f32 %v511_v17, %v463_v61  ;;  %v754_v19 = vpop.f32.mrb[10].mxu0 }
 0x108   :  { %v523_v20 = vadd.f32 %v754_v19, %v474_v15  ;;  %v514_v21 = vpop.f32.mrb[11].mxu0  ;;  %v551_v26 = vmul.f32 %v520_v16, %v520_v16 }
 0x109   :  { %v515_v22 = vadd.f32 %v514_v21, %v466_v0  ;;  %v549_v23 = vmul.f32 %v512_v18, %v512_v18 }
 0x10a   :  { %v552_v29 = vmul.f32 %v523_v20, %v523_v20 }
 0x10b   :  { %v540_v24 = vadd.f32 %v515_v22, %v512_v18  ;;  %v550_v25 = vmul.f32 %v515_v22, %v515_v22 }
 0x10d   :  { %v541_v27 = vadd.f32 %v540_v24, %v520_v16  ;;  %v553_v28 = vadd.f32 %v550_v25, %v549_v23 }
 0x10f   :  { %v542_v30 = vadd.f32 %v541_v27, %v523_v20  ;;  %v554_v31 = vadd.f32 %v553_v28, %v551_v26 }
 0x111   :  { %v543_v32 = vrot.slane %v542_v30, 4  ;;  %v555_v33 = vadd.f32 %v554_v31, %v552_v29 }
 0x113   :  { %v544_v34 = vadd.f32 %v543_v32, %v542_v30  ;;  %v556_v35 = vrot.slane %v555_v33, 4 }
 0x115   :  { %v545_v36 = vrot.slane %v544_v34, 2  ;;  %v557_v37 = vadd.f32 %v556_v35, %v555_v33 }
 0x117   :  { %v546_v38 = vadd.f32 %v545_v36, %v544_v34  ;;  %v558_v39 = vrot.slane %v557_v37, 2 }
 0x119   :  { %v547_v40 = vrot.slane %v546_v38, 1  ;;  %v559_v41 = vadd.f32 %v558_v39, %v557_v37 }
 0x11b   :  { %v548_v42 = vadd.f32 %v547_v40, %v546_v38  ;;  %v560_v43 = vrot.slane %v559_v41, 1 }
 0x11d   :  { %v561_v44 = vadd.f32 %v560_v43, %v559_v41  ;;  %v562_v45 = vmul.f32 0.03125, %v548_v42 }
 0x11f   :  { %v563_v46 = vmul.f32 0.03125, %v561_v44  ;;  %v564_v47 = vmul.f32 %v562_v45, %v562_v45  ;;  %v567_v48 = vsub.f32 %v512_v18, %v562_v45  ;;  %v568_v49 = vsub.f32 %v515_v22, %v562_v45 }
 0x120   :  { %v569_v50 = vsub.f32 %v520_v16, %v562_v45  ;;  %v570_v51 = vsub.f32 %v523_v20, %v562_v45 }
 0x121   :  { %v565_v52 = vsub.f32 %v563_v46, %v564_v47 }
 0x123   :  { %v566_v53 = vmax.f32 %v565_v52, 0.0 }
 0x125   :  { %v571_v54 = vadd.f32 1e-05, %v566_v53 }
 0x127   :  { %805 = vrsqrt.f32 %v571_v54 }
 0x131   :  { %v806_v55 = vpop.eup %805 }
 0x132   :  { %v573_v56 = vmul.f32 %v806_v55, %v567_v48  ;;  %v574_v57 = vmul.f32 %v806_v55, %v568_v49  ;;  %v575_v58 = vmul.f32 %v806_v55, %v569_v50  ;;  %v576_v59 = vmul.f32 %v806_v55, %v570_v51 }
 0x134   :  { %vm577_vm1 = vcmp.ge.f32.partialorder %v573_v56, 0.0  ;;  %vm578_vm2 = vcmp.ge.f32.partialorder %v574_v57, 0.0  ;;  %vm579_vm3 = vcmp.ge.f32.partialorder %v575_v58, 0.0  ;;  %vm580_vm4 = vcmp.ge.f32.partialorder %v576_v59, 0.0 }
 0x135   :  { %v581_v60 = vmul.f32 0.01, %v573_v56  ;;  %v582_v61 = vmul.f32 0.01, %v574_v57  ;;  %v583_v62 = vmul.f32 0.01, %v575_v58 }
 0x136   :  { %v584_v63 = vmul.f32 0.01, %v576_v59 }
 0x137   :  { %v585_v0 = vsel %vm577_vm1, %v573_v56, %v581_v60  ;;  %v586_v1 = vsel %vm578_vm2, %v574_v57, %v582_v61  ;;  %v587_v2 = vsel %vm579_vm3, %v575_v58, %v583_v62 }
 0x138   :  { %v588_v3 = vsel %vm580_vm4, %v576_v59, %v584_v63  ;;  %v673_v4 = vpack.c.bf16 %v586_v1, %v585_v0 }
 0x139   :  { %v678_v5 = vpack.c.bf16 %v588_v3, %v587_v2 }
 0x13a   :  { %674 = vst [vmem:[%s977_s3] sm:$0xff] %v673_v4  }
 0x13b   :  { %680 = vst [vmem:[%s977_s3 + $0x8] sm:$0xff] %v678_v5  }

// kernel: actor_forward.7
= control target key start
LH: loop header
LB: loop body
LE: loop exit
PB: predicated region body
PF: predicated region fallthrough
CT: control target
= control target key end

     0   :  { %s3473_s0 = inlined_call_operand.vmem [shape: bf16[2,1024], index: 0, kind: input, shape index: {}]   ;;  %s3474_s1 = inlined_call_operand.vmem [shape: bf16[2,18], index: 1, kind: input, shape index: {}]   ;;  %s3475_s2 = inlined_call_operand.vmem [shape: bf16[1024,256], index: 2, kind: input, shape index: {}]   ;;  %s3476_s3 = inlined_call_operand.vmem [shape: f32[1,256], index: 3, kind: input, shape index: {}]   ;;  %s3477_s4 = inlined_call_operand.vmem [shape: bf16[256,128], index: 4, kind: input, shape index: {}]   ;;  %s3478_s5 = inlined_call_operand.vmem [shape: f32[1,128], index: 5, kind: input, shape index: {}]   ;;  %s3479_s6 = inlined_call_operand.vmem [shape: bf16[18,128], index: 6, kind: input, shape index: {}]   ;;  %s3480_s7 = inlined_call_operand.vmem [shape: f32[1,128], index: 7, kind: input, shape index: {}]   ;;  %s3481_s8 = inlined_call_operand.vmem [shape: bf16[128,128], index: 8, kind: input, shape index: {}]   ;;  %s3482_s9 = inlined_call_operand.vmem [shape: f32[1,128], index: 9, kind: input, shape index: {}]   ;;  %s3483_s10 = inlined_call_operand.vmem [shape: bf16[128,256], index: 10, kind: input, shape index: {}]   ;;  %s3484_s11 = inlined_call_operand.vmem [shape: bf16[128,256], index: 11, kind: input, shape index: {}]   ;;  %s3485_s12 = inlined_call_operand.vmem [shape: f32[1,256], index: 12, kind: input, shape index: {}]   ;;  %s3486_s13 = inlined_call_operand.vmem [shape: bf16[256,64], index: 13, kind: input, shape index: {}]   ;;  %s3487_s14 = inlined_call_operand.vmem [shape: f32[1,64], index: 14, kind: input, shape index: {}]   ;;  %s3488_s15 = inlined_call_operand.vmem [shape: bf16[64,2], index: 15, kind: input, shape index: {}]   ;;  %s3489_s16 = inlined_call_operand.vmem [shape: f32[1,2], index: 16, kind: input, shape index: {}]   ;;  %s3490_s17 = inlined_call_operand.hbm [shape: f32[2,2], index: 17, kind: output, shape index: {}]  }
   0x1   :  { %3491 = sst [smem:[#allocation5_spill]] %s3473_s0 }
   0x2   :  { %3492 = sst [smem:[#allocation6_spill]] %s3474_s1 }
   0x3   :  { %v2341_v0 = vld [vmem:[%s3475_s2 + $0x104] ss:$8 sps:$4 sm:$0xff]   ;;  %v2343_v1 = vld [vmem:[%s3475_s2 + $0x100] ss:$8 sps:$4 sm:$0xff]   ;;  %v2344_v2 = vld [vmem:[%s3475_s2 + $0x114] ss:$8 sps:$4 sm:$0xff]   ;;  %v189_v7 = vlaneseq }
   0x4   :  { %938 = vmatprep.subr.bf16.mxu0 %v2341_v0  ;;  %v2346_v3 = vld [vmem:[%s3475_s2 + $0x110] ss:$8 sps:$4 sm:$0xff]   ;;  %v2347_v4 = vld [vmem:[%s3475_s2 + $0x124] ss:$8 sps:$4 sm:$0xff]   ;;  %v2349_v5 = vld [vmem:[%s3475_s2 + $0x120] ss:$8 sps:$4 sm:$0xff]  }
   0x5   :  { %939 = vmatpush1.bf16.msra.mxu0 %v2343_v1  ;;  %v2350_v6 = vld [vmem:[%s3475_s2 + $0x134] ss:$8 sps:$4 sm:$0xff]   ;;  %v2654_v8 = vmov 1966171168   ;;  %v2352_v10 = vld [vmem:[%s3475_s2 + $0x130] ss:$8 sps:$4 sm:$0xff]  }
   0x6   :  { %940 = vmatprep.subr.bf16.mxu0 %v2344_v2  ;;  %v202_v9 = vunpack.c.l.s4 %v2654_v8  ;;  %v2353_v11 = vld [vmem:[%s3475_s2 + $0x144] ss:$8 sps:$4 sm:$0xff]   ;;  %v2776_v12 = vshrl.u32 %v189_v7, 7  ;;  %v2355_v14 = vld [vmem:[%s3475_s2 + $0x140] ss:$8 sps:$4 sm:$0xff]   ;;  %s3493_s22 = sld [smem:[#allocation5_spill]] }
   0x7   :  { %v2356_v15 = vld [vmem:[%s3475_s2 + $0x154] ss:$8 sps:$4 sm:$0xff]   ;;  %v2358_v17 = vld [vmem:[%s3475_s2 + $0x150] ss:$8 sps:$4 sm:$0xff]   ;;  %v2359_v18 = vld [vmem:[%s3475_s2 + $0x164] ss:$8 sps:$4 sm:$0xff]  }
   0x8   :  { %v203_v13 = vunpack.c.0.s8 %v202_v9  ;;  %v2361_v22 = vld [vmem:[%s3475_s2 + $0x160] ss:$8 sps:$4 sm:$0xff]   ;;  %v2362_v23 = vld [vmem:[%s3475_s2 + $0x174] ss:$8 sps:$4 sm:$0xff]   ;;  %v2364_v28 = vld [vmem:[%s3475_s2 + $0x170] ss:$8 sps:$4 sm:$0xff]  }
   0x9   :  { %941 = vmatpush1.bf16.msra.mxu0 %v2346_v3  ;;  %v2365_v29 = vld [vmem:[%s3475_s2 + $0x184] ss:$8 sps:$4 sm:$0xff]   ;;  %v2410_v32 = vld [vmem:[%s3475_s2] ss:$8 sps:$4 sm:$0xff]   ;;  %v2368_v34 = vld [vmem:[%s3475_s2 + $0x194] ss:$8 sps:$4 sm:$0xff]  }
   0xa   :  { %942 = vmatprep.subr.bf16.mxu0 %v2347_v4  ;;  %v2785_v16 = vsub.s32 %v203_v13, %v2776_v12  ;;  %v2408_v31 = vld [vmem:[%s3475_s2 + $0x4] ss:$8 sps:$4 sm:$0xff]   ;;  %v2367_v33 = vld [vmem:[%s3475_s2 + $0x180] ss:$8 sps:$4 sm:$0xff]   ;;  %v2414_v35 = vld [vmem:[%s3475_s2 + $0x14] ss:$8 sps:$4 sm:$0xff]  }
   0xb   :  { %897 = vmatprep.subr.bf16.mxu1 %v2408_v31  ;;  %v2416_v36 = vld [vmem:[%s3475_s2 + $0x10] ss:$8 sps:$4 sm:$0xff]   ;;  %v2420_v38 = vld [vmem:[%s3475_s2 + $0x24] ss:$8 sps:$4 sm:$0xff]   ;;  %v2422_v40 = vld [vmem:[%s3475_s2 + $0x20] ss:$8 sps:$4 sm:$0xff]  }
   0xc   :  { %v58_v19 = vld [vmem:[%s3493_s22] sm:$0xff]  ;;  %898 = vmatpush1.bf16.msra.mxu1 %v2410_v32  ;;  %v2370_v37 = vld [vmem:[%s3475_s2 + $0x190] ss:$8 sps:$4 sm:$0xff]   ;;  %v2426_v41 = vld [vmem:[%s3475_s2 + $0x34] ss:$8 sps:$4 sm:$0xff]   ;;  %vm1271_vm0 = vcmask 1040384  }
   0xd   :  { %943 = vmatpush1.bf16.msra.mxu0 %v2349_v5  ;;  %v200_v20 = vcombine.high %v58_v19, %v58_v19  ;;  %v2797_v21 = vrot.slane %v58_v19, %v2785_v16  ;;  %899 = vmatprep.subr.bf16.mxu1 %v2414_v35  ;;  %v2371_v39 = vld [vmem:[%s3475_s2 + $0x1a4] ss:$8 sps:$4 sm:$0xff]   ;;  %v2373_v42 = vld [vmem:[%s3475_s2 + $0x1a0] ss:$8 sps:$4 sm:$0xff]   ;;  %v2374_v43 = vld [vmem:[%s3475_s2 + $0x1b4] ss:$8 sps:$4 sm:$0xff]  }
   0xe   :  { %944 = vmatprep.subr.bf16.mxu0 %v2350_v6  ;;  %v2428_v44 = vld [vmem:[%s3475_s2 + $0x30] ss:$8 sps:$4 sm:$0xff]   ;;  %v2432_v45 = vld [vmem:[%s3475_s2 + $0x44] ss:$8 sps:$4 sm:$0xff]   ;;  %v2434_v48 = vld [vmem:[%s3475_s2 + $0x40] ss:$8 sps:$4 sm:$0xff]  }
   0xf   :  { %v215_v24 = vcombine.high %v2797_v21, %v2797_v21  ;;  %v2808_v25 = vrot.slane %v200_v20, %v2785_v16  ;;  %v2376_v46 = vld [vmem:[%s3475_s2 + $0x1b0] ss:$8 sps:$4 sm:$0xff]   ;;  %v2377_v47 = vld [vmem:[%s3475_s2 + $0x1c4] ss:$8 sps:$4 sm:$0xff]   ;;  %v2438_v49 = vld [vmem:[%s3475_s2 + $0x54] ss:$8 sps:$4 sm:$0xff]   ;;  %v2913_v61 = vrot.slane %v2797_v21, %v2785_v16 }
  0x10   :  { %900 = vmatpush1.bf16.msra.mxu1 %v2416_v36  ;;  %v2379_v50 = vld [vmem:[%s3475_s2 + $0x1c0] ss:$8 sps:$4 sm:$0xff]   ;;  %v2380_v51 = vld [vmem:[%s3475_s2 + $0x1d4] ss:$8 sps:$4 sm:$0xff]   ;;  %v2440_v52 = vld [vmem:[%s3475_s2 + $0x50] ss:$8 sps:$4 sm:$0xff]  }
  0x11   :  { %945 = vmatpush1.bf16.msra.mxu0 %v2352_v10  ;;  %v237_v26 = vrot.slane %v215_v24, %v2785_v16  ;;  %v2813_v27 = vrot.slane %v2808_v25, %v2785_v16  ;;  %901 = vmatprep.subr.bf16.mxu1 %v2420_v38  ;;  %v2444_v53 = vld [vmem:[%s3475_s2 + $0x64] ss:$8 sps:$4 sm:$0xff]   ;;  %v2382_v54 = vld [vmem:[%s3475_s2 + $0x1d0] ss:$8 sps:$4 sm:$0xff]   ;;  %v2446_v56 = vld [vmem:[%s3475_s2 + $0x60] ss:$8 sps:$4 sm:$0xff]   ;;  %v216_v0 = vcombine.high %v2808_v25, %v2808_v25 }
  0x12   :  { %946 = vmatprep.subr.bf16.mxu0 %v2353_v11  ;;  %v2383_v55 = vld [vmem:[%s3475_s2 + $0x1e4] ss:$8 sps:$4 sm:$0xff]   ;;  %v2450_v57 = vld [vmem:[%s3475_s2 + $0x74] ss:$8 sps:$4 sm:$0xff]   ;;  %v2385_v58 = vld [vmem:[%s3475_s2 + $0x1e0] ss:$8 sps:$4 sm:$0xff]   ;;  %v245_v3 = vcombine.high %v2913_v61, %v2913_v61 }
  0x13   :  { %v247_v30 = vcombine.high %v237_v26, %v237_v26  ;;  %929 = vmatprep.mubr.bf16.mxu1 %v237_v26  ;;  %v2386_v59 = vld [vmem:[%s3475_s2 + $0x1f4] ss:$8 sps:$4 sm:$0xff]   ;;  %v2452_v60 = vld [vmem:[%s3475_s2 + $0x70] ss:$8 sps:$4 sm:$0xff]   ;;  %v2456_v62 = vld [vmem:[%s3475_s2 + $0x84] ss:$8 sps:$4 sm:$0xff]   ;;  %v2938_v6 = vrot.slane %v216_v0, %v2785_v16 }
  0x14   :  { %902 = vmatpush1.bf16.msra.mxu1 %v2422_v40  ;;  %v2388_v63 = vld [vmem:[%s3475_s2 + $0x1f0] ss:$8 sps:$4 sm:$0xff]   ;;  %v2392_v1 = vld [vmem:[%s3475_s2 + $0x204] ss:$8 sps:$4 sm:$0xff]   ;;  %v2458_v2 = vld [vmem:[%s3475_s2 + $0x80] ss:$8 sps:$4 sm:$0xff]  }
  0x15   :  { %947 = vmatpush1.bf16.msra.mxu0 %v2355_v14  ;;  %970 = vmatprep.mubr.bf16.mxu0 %v247_v30  ;;  %v2462_v4 = vld [vmem:[%s3475_s2 + $0x94] ss:$8 sps:$4 sm:$0xff]   ;;  %v2390_v5 = vld [vmem:[%s3475_s2 + $0x200] ss:$8 sps:$4 sm:$0xff]   ;;  %v2464_v8 = vld [vmem:[%s3475_s2 + $0x90] ss:$8 sps:$4 sm:$0xff]  }
  0x16   :  { %948 = vmatprep.subr.bf16.mxu0 %v2356_v15  ;;  %903 = vmatprep.subr.bf16.mxu1 %v2426_v41  ;;  %v2395_v7 = vld [vmem:[%s3475_s2 + $0x214] ss:$8 sps:$4 sm:$0xff]   ;;  %v2468_v9 = vld [vmem:[%s3475_s2 + $0xa4] ss:$8 sps:$4 sm:$0xff]   ;;  %v2393_v10 = vld [vmem:[%s3475_s2 + $0x210] ss:$8 sps:$4 sm:$0xff]  }
  0x17   :  { %v2398_v11 = vld [vmem:[%s3475_s2 + $0x224] ss:$8 sps:$4 sm:$0xff]   ;;  %v2470_v13 = vld [vmem:[%s3475_s2 + $0xa0] ss:$8 sps:$4 sm:$0xff]   ;;  %v2474_v14 = vld [vmem:[%s3475_s2 + $0xb4] ss:$8 sps:$4 sm:$0xff]  }
  0x18   :  { %904 = vmatpush1.bf16.msra.mxu1 %v2428_v44  ;;  %v2396_v15 = vld [vmem:[%s3475_s2 + $0x220] ss:$8 sps:$4 sm:$0xff]   ;;  %v2401_v16 = vld [vmem:[%s3475_s2 + $0x234] ss:$8 sps:$4 sm:$0xff]   ;;  %v2399_v19 = vld [vmem:[%s3475_s2 + $0x230] ss:$8 sps:$4 sm:$0xff]  }
  0x19   :  { %949 = vmatpush1.bf16.msra.mxu0 %v2358_v17  ;;  %905 = vmatprep.subr.bf16.mxu1 %v2432_v45  ;;  %v2476_v17 = vld [vmem:[%s3475_s2 + $0xb0] ss:$8 sps:$4 sm:$0xff]   ;;  %v2404_v20 = vld [vmem:[%s3475_s2 + $0x244] ss:$8 sps:$4 sm:$0xff]   ;;  %v2482_v21 = vld [vmem:[%s3475_s2 + $0xc0] ss:$8 sps:$4 sm:$0xff]  }
  0x1a   :  { %950 = vmatprep.subr.bf16.mxu0 %v2359_v18  ;;  %v2480_v18 = vld [vmem:[%s3475_s2 + $0xc4] ss:$8 sps:$4 sm:$0xff]   ;;  %v2407_v24 = vld [vmem:[%s3475_s2 + $0x254] ss:$8 sps:$4 sm:$0xff]   ;;  %v2488_v25 = vld [vmem:[%s3475_s2 + $0xd0] ss:$8 sps:$4 sm:$0xff]  }
  0x1b   :  { %v2492_v26 = vld [vmem:[%s3475_s2 + $0xe4] ss:$8 sps:$4 sm:$0xff]   ;;  %v2411_v30 = vld [vmem:[%s3475_s2 + $0x260] ss:$8 sps:$4 sm:$0xff]   ;;  %v2498_v32 = vld [vmem:[%s3475_s2 + $0xf4] ss:$8 sps:$4 sm:$0xff]  }
  0x1c   :  { %906 = vmatpush1.bf16.msra.mxu1 %v2434_v48  ;;  %v2494_v31 = vld [vmem:[%s3475_s2 + $0xe0] ss:$8 sps:$4 sm:$0xff]   ;;  %v2500_v35 = vld [vmem:[%s3475_s2 + $0xf0] ss:$8 sps:$4 sm:$0xff]   ;;  %vm1267_vm1 = vcmask 146432   ;;  %vm2656_vm2 = vmmov 0  }
  0x1d   :  { %951 = vmatpush1.bf16.msra.mxu0 %v2361_v22  ;;  %907 = vmatprep.subr.bf16.mxu1 %v2438_v49  ;;  %v2486_v22 = vld [vmem:[%s3475_s2 + $0xd4] ss:$8 sps:$4 sm:$0xff]   ;;  %v2417_v36 = vld [vmem:[%s3475_s2 + $0x270] ss:$8 sps:$4 sm:$0xff]   ;;  %v2507_v38 = vld [vmem:[%s3479_s6] sm:$0xff]   ;;  %s3494_s22 = sld [smem:[#allocation6_spill]] }
  0x1e   :  { %952 = vmatprep.subr.bf16.mxu0 %v2362_v23  ;;  %v2402_v23 = vld [vmem:[%s3475_s2 + $0x240] ss:$8 sps:$4 sm:$0xff]   ;;  %v2431_v41 = vld [vmem:[%s3475_s2 + $0x294] ss:$8 sps:$4 sm:$0xff]   ;;  %v2437_v44 = vld [vmem:[%s3475_s2 + $0x2a4] ss:$8 sps:$4 sm:$0xff]  }
  0x1f   :  { %v2423_v40 = vld [vmem:[%s3475_s2 + $0x280] ss:$8 sps:$4 sm:$0xff]   ;;  %v2443_v48 = vld [vmem:[%s3475_s2 + $0x2b4] ss:$8 sps:$4 sm:$0xff]  }
  0x20   :  { %908 = vmatpush1.bf16.msra.mxu1 %v2440_v52  ;;  %v2537_v49 = vld [vmem:[%s3481_s8 + $0x8] sm:$0xff]   ;;  %v2538_v52 = vld [vmem:[%s3481_s8 + $0x10] sm:$0xff]  }
  0x21   :  { %953 = vmatpush1.bf16.msra.mxu0 %v2364_v28  ;;  %909 = vmatprep.subr.bf16.mxu1 %v2444_v53  ;;  %v2405_v28 = vld [vmem:[%s3475_s2 + $0x250] ss:$8 sps:$4 sm:$0xff]   ;;  %v2447_v53 = vld [vmem:[%s3475_s2 + $0x2c0] ss:$8 sps:$4 sm:$0xff]   ;;  %v2479_v0 = vld [vmem:[%s3475_s2 + $0x314] ss:$8 sps:$4 sm:$0xff]  }
  0x22   :  { %954 = vmatprep.subr.bf16.mxu0 %v2365_v29  ;;  %v2413_v29 = vld [vmem:[%s3475_s2 + $0x264] ss:$8 sps:$4 sm:$0xff]  }
  0x23   :  { %v1247_v45 = vld [vmem:[%s3494_s22] sm:$0x1] }
  0x24   :  { %910 = vmatpush1.bf16.msra.mxu1 %v2446_v56  ;;  %v2453_v56 = vld [vmem:[%s3475_s2 + $0x2d0] ss:$8 sps:$4 sm:$0xff]  }
  0x25   :  { %955 = vmatpush1.bf16.msra.mxu0 %v2367_v33  ;;  %911 = vmatprep.subr.bf16.mxu1 %v2450_v57  ;;  %v2511_v33 = vld [vmem:[%s3479_s6 + $0x8] ss:$0 sps:$4 sm:$0x11]   ;;  %v2461_v57 = vld [vmem:[%s3475_s2 + $0x2e4] ss:$8 sps:$4 sm:$0xff]  }
  0x26   :  { %956 = vmatprep.subr.bf16.mxu0 %v2368_v34  ;;  %v2419_v34 = vld [vmem:[%s3475_s2 + $0x274] ss:$8 sps:$4 sm:$0xff]  }
  0x28   :  { %912 = vmatpush1.bf16.msra.mxu1 %v2452_v60  ;;  %v2467_v60 = vld [vmem:[%s3475_s2 + $0x2f4] ss:$8 sps:$4 sm:$0xff]  }
  0x29   :  { %957 = vmatpush1.bf16.msra.mxu0 %v2370_v37  ;;  %913 = vmatprep.subr.bf16.mxu1 %v2456_v62  ;;  %v2425_v37 = vld [vmem:[%s3475_s2 + $0x284] ss:$8 sps:$4 sm:$0xff]  }
  0x2a   :  { %958 = vmatprep.subr.bf16.mxu0 %v2371_v39  ;;  %v1273_v39 = vsel %vm1271_vm0, %v2511_v33, 0  ;;  %v2473_v62 = vld [vmem:[%s3475_s2 + $0x304] ss:$8 sps:$4 sm:$0xff]  }
  0x2c   :  { %914 = vmatpush1.bf16.msra.mxu1 %v2458_v2 }
  0x2d   :  { %959 = vmatpush1.bf16.msra.mxu0 %v2373_v42  ;;  %915 = vmatprep.subr.bf16.mxu1 %v2462_v4  ;;  %v2655_v42 = vmov 0.0  }
  0x2e   :  { %960 = vmatprep.subr.bf16.mxu0 %v2374_v43  ;;  %v2429_v43 = vld [vmem:[%s3475_s2 + $0x290] ss:$8 sps:$4 sm:$0xff]  }
  0x30   :  { %916 = vmatpush1.bf16.msra.mxu1 %v2464_v8 }
  0x31   :  { %961 = vmatpush1.bf16.msra.mxu0 %v2376_v46  ;;  %917 = vmatprep.subr.bf16.mxu1 %v2468_v9  ;;  %v2536_v46 = vld [vmem:[%s3481_s8] sm:$0xff]  }
  0x32   :  { %962 = vmatprep.subr.bf16.mxu0 %v2377_v47  ;;  %v2435_v47 = vld [vmem:[%s3475_s2 + $0x2a0] ss:$8 sps:$4 sm:$0xff]  }
  0x34   :  { %918 = vmatpush1.bf16.msra.mxu1 %v2470_v13 }
  0x35   :  { %963 = vmatpush1.bf16.msra.mxu0 %v2379_v50  ;;  %919 = vmatprep.subr.bf16.mxu1 %v2474_v14  ;;  %v2441_v50 = vld [vmem:[%s3475_s2 + $0x2b0] ss:$8 sps:$4 sm:$0xff]  }
  0x36   :  { %964 = vmatprep.subr.bf16.mxu0 %v2380_v51  ;;  %v2449_v51 = vld [vmem:[%s3475_s2 + $0x2c4] ss:$8 sps:$4 sm:$0xff]  }
  0x38   :  { %920 = vmatpush1.bf16.msra.mxu1 %v2476_v17 }
  0x39   :  { %965 = vmatpush1.bf16.msra.mxu0 %v2382_v54  ;;  %921 = vmatprep.subr.bf16.mxu1 %v2480_v18  ;;  %v2455_v54 = vld [vmem:[%s3475_s2 + $0x2d4] ss:$8 sps:$4 sm:$0xff]  }
  0x3a   :  { %966 = vmatprep.subr.bf16.mxu0 %v2383_v55  ;;  %v2539_v55 = vld [vmem:[%s3481_s8 + $0x18] sm:$0xff]  }
  0x3c   :  { %922 = vmatpush1.bf16.msra.mxu1 %v2482_v21 }
  0x3d   :  { %967 = vmatpush1.bf16.msra.mxu0 %v2385_v58  ;;  %923 = vmatprep.subr.bf16.mxu1 %v2486_v22  ;;  %v2540_v58 = vld [vmem:[%s3481_s8 + $0x20] sm:$0xff]  }
  0x3e   :  { %968 = vmatprep.subr.bf16.mxu0 %v2386_v59  ;;  %v2459_v59 = vld [vmem:[%s3475_s2 + $0x2e0] ss:$8 sps:$4 sm:$0xff]  }
  0x40   :  { %924 = vmatpush1.bf16.msra.mxu1 %v2488_v25 }
  0x41   :  { %969 = vmatpush1.bf16.msra.mxu0 %v2388_v63  ;;  %925 = vmatprep.subr.bf16.mxu1 %v2492_v26  ;;  %v2471_v63 = vld [vmem:[%s3475_s2 + $0x300] ss:$8 sps:$4 sm:$0xff]  }
  0x42   :  { %979 = vmatprep.subr.bf16.mxu0 %v2392_v1  ;;  %v248_v1 = vcombine.high %v2938_v6, %v2938_v6 }
  0x44   :  { %971 = vmatmul.mubr.bf16.vlgmr.msra.gmra.mrb[0].mxu0 %v245_v3  ;;  %926 = vmatpush1.bf16.msra.mxu1 %v2494_v31 }
  0x45   :  { %980 = vmatpush1.bf16.msra.mxu0 %v2390_v5  ;;  %1011 = vmatprep.mubr.bf16.mxu0 %v2938_v6 }
  0x46   :  { %981 = vmatprep.subr.bf16.mxu0 %v2395_v7  ;;  %927 = vmatprep.subr.bf16.mxu1 %v2498_v32 }
  0x48   :  { %928 = vmatpush1.bf16.msra.mxu1 %v2500_v35 }
  0x49   :  { %982 = vmatpush1.bf16.msra.mxu0 %v2393_v10  ;;  %2284 = vmatprep.subr.bf16.mxu1 %v2655_v42 }
  0x4a   :  { %983 = vmatprep.subr.bf16.mxu0 %v2398_v11 }
  0x4b   :  { %930 = vmatmul.mubr.bf16.vlgmr.msra.gmra.mrb[0].mxu1 %v2913_v61  ;;  %v2465_v61 = vld [vmem:[%s3475_s2 + $0x2f0] ss:$8 sps:$4 sm:$0xff]  }
  0x4c   :  { %2285 = vmatpush3.bf16.msra.mxu1 %v2507_v38  ;;  %2288 = vmatprep.mubr.msk.bf16.mxu1 %vm2656_vm2, %v2655_v42 }
  0x4d   :  { %984 = vmatpush1.bf16.msra.mxu0 %v2396_v15  ;;  %2286 = vmatprep.subr.bf16.mxu1 %v2655_v42 }
  0x4e   :  { %985 = vmatprep.subr.bf16.mxu0 %v2401_v16 }
  0x50   :  { %2287 = vmatpush3.bf16.msra.mxu1 %v1273_v39 }
  0x51   :  { %986 = vmatpush1.bf16.msra.mxu0 %v2399_v19  ;;  %2292 = vmatprep.subr.bf16.mxu1 %v2655_v42 }
  0x52   :  { %987 = vmatprep.subr.bf16.mxu0 %v2404_v20 }
  0x53   :  { %2289 = vmatmul.mubr.msk.bf16.vlgmr.msra.gmra.mrb[4].mxu1 %vm1267_vm1, %v1247_v45 }
  0x54   :  { %2293 = vmatpush3.bf16.msra.mxu1 %v2536_v46  ;;  %2308 = vmatprep.mubr.msk.bf16.mxu1 %vm2656_vm2, %v2655_v42 }
  0x55   :  { %988 = vmatpush1.bf16.msra.mxu0 %v2402_v23  ;;  %2294 = vmatprep.subr.bf16.mxu1 %v2655_v42 }
  0x56   :  { %989 = vmatprep.subr.bf16.mxu0 %v2407_v24 }
  0x58   :  { %2295 = vmatpush3.bf16.msra.mxu1 %v2537_v49 }
  0x59   :  { %990 = vmatpush1.bf16.msra.mxu0 %v2405_v28  ;;  %2296 = vmatprep.subr.bf16.mxu1 %v2655_v42 }
  0x5a   :  { %991 = vmatprep.subr.bf16.mxu0 %v2413_v29 }
  0x5c   :  { %2297 = vmatpush3.bf16.msra.mxu1 %v2538_v52 }
  0x5d   :  { %992 = vmatpush1.bf16.msra.mxu0 %v2411_v30  ;;  %2298 = vmatprep.subr.bf16.mxu1 %v2655_v42 }
  0x5e   :  { %993 = vmatprep.subr.bf16.mxu0 %v2419_v34 }
  0x60   :  { %2299 = vmatpush3.bf16.msra.mxu1 %v2539_v55 }
  0x61   :  { %994 = vmatpush1.bf16.msra.mxu0 %v2417_v36  ;;  %2300 = vmatprep.subr.bf16.mxu1 %v2655_v42 }
  0x62   :  { %995 = vmatprep.subr.bf16.mxu0 %v2425_v37 }
  0x64   :  { %2301 = vmatpush3.bf16.msra.mxu1 %v2540_v58 }
  0x65   :  { %996 = vmatpush1.bf16.msra.mxu0 %v2423_v40  ;;  %2302 = vmatprep.subr.bf16.mxu1 %v2655_v42 }
  0x66   :  { %997 = vmatprep.subr.bf16.mxu0 %v2431_v41 }
  0x69   :  { %998 = vmatpush1.bf16.msra.mxu0 %v2429_v43 }
  0x6a   :  { %999 = vmatprep.subr.bf16.mxu0 %v2437_v44 }
  0x6d   :  { %1000 = vmatpush1.bf16.msra.mxu0 %v2435_v47 }
  0x6e   :  { %1001 = vmatprep.subr.bf16.mxu0 %v2443_v48 }
  0x71   :  { %1002 = vmatpush1.bf16.msra.mxu0 %v2441_v50 }
  0x72   :  { %1003 = vmatprep.subr.bf16.mxu0 %v2449_v51 }
  0x75   :  { %1004 = vmatpush1.bf16.msra.mxu0 %v2447_v53 }
  0x76   :  { %1005 = vmatprep.subr.bf16.mxu0 %v2455_v54 }
  0x79   :  { %1006 = vmatpush1.bf16.msra.mxu0 %v2453_v56 }
  0x7a   :  { %1007 = vmatprep.subr.bf16.mxu0 %v2461_v57 }
  0x7d   :  { %1008 = vmatpush1.bf16.msra.mxu0 %v2459_v59 }
  0x7e   :  { %1009 = vmatprep.subr.bf16.mxu0 %v2467_v60 }
  0x81   :  { %1010 = vmatpush1.bf16.msra.mxu0 %v2465_v61 }
  0x82   :  { %1020 = vmatprep.subr.bf16.mxu0 %v2473_v62 }
  0x83   :  { %22 = vsyncpa [#allocation3], 0  ;;  %v2477_v2 = vld [vmem:[%s3475_s2 + $0x310] ss:$8 sps:$4 sm:$0xff]   ;;  %v2485_v3 = vld [vmem:[%s3475_s2 + $0x324] ss:$8 sps:$4 sm:$0xff]   ;;  %v246_v34 = vcombine.high %v2813_v27, %v2813_v27 }
  0x84   :  { %1012 = vmatmul.mubr.bf16.vlgmr.msra.gmra.mrb[0].mxu0 %v2813_v27  ;;  %v2483_v4 = vld [vmem:[%s3475_s2 + $0x320] ss:$8 sps:$4 sm:$0xff]   ;;  %v2491_v5 = vld [vmem:[%s3475_s2 + $0x334] ss:$8 sps:$4 sm:$0xff]   ;;  %v2489_v6 = vld [vmem:[%s3475_s2 + $0x330] ss:$8 sps:$4 sm:$0xff]  }
  0x85   :  { %1021 = vmatpush1.bf16.msra.mxu0 %v2471_v63  ;;  %1052 = vmatprep.mubr.bf16.mxu0 %v248_v1  ;;  %v2497_v7 = vld [vmem:[%s3475_s2 + $0x344] ss:$8 sps:$4 sm:$0xff]   ;;  %v2495_v8 = vld [vmem:[%s3475_s2 + $0x340] ss:$8 sps:$4 sm:$0xff]   ;;  %v2503_v9 = vld [vmem:[%s3475_s2 + $0x354] ss:$8 sps:$4 sm:$0xff]  }
  0x86   :  { %1022 = vmatprep.subr.bf16.mxu0 %v2479_v0  ;;  %v2501_v10 = vld [vmem:[%s3475_s2 + $0x350] ss:$8 sps:$4 sm:$0xff]   ;;  %v2506_v11 = vld [vmem:[%s3475_s2 + $0x364] ss:$8 sps:$4 sm:$0xff]   ;;  %v2504_v13 = vld [vmem:[%s3475_s2 + $0x360] ss:$8 sps:$4 sm:$0xff]  }
  0x87   :  { %v2510_v14 = vld [vmem:[%s3475_s2 + $0x374] ss:$8 sps:$4 sm:$0xff]   ;;  %v2508_v15 = vld [vmem:[%s3475_s2 + $0x370] ss:$8 sps:$4 sm:$0xff]   ;;  %v2514_v16 = vld [vmem:[%s3475_s2 + $0x384] ss:$8 sps:$4 sm:$0xff]  }
  0x88   :  { %v2512_v17 = vld [vmem:[%s3475_s2 + $0x380] ss:$8 sps:$4 sm:$0xff]   ;;  %v2517_v18 = vld [vmem:[%s3475_s2 + $0x394] ss:$8 sps:$4 sm:$0xff]   ;;  %v2515_v19 = vld [vmem:[%s3475_s2 + $0x390] ss:$8 sps:$4 sm:$0xff]  }
  0x89   :  { %1023 = vmatpush1.bf16.msra.mxu0 %v2477_v2  ;;  %v2520_v20 = vld [vmem:[%s3475_s2 + $0x3a4] ss:$8 sps:$4 sm:$0xff]   ;;  %v2518_v21 = vld [vmem:[%s3475_s2 + $0x3a0] ss:$8 sps:$4 sm:$0xff]   ;;  %v2523_v22 = vld [vmem:[%s3475_s2 + $0x3b4] ss:$8 sps:$4 sm:$0xff]  }
  0x8a   :  { %1024 = vmatprep.subr.bf16.mxu0 %v2485_v3  ;;  %v2521_v23 = vld [vmem:[%s3475_s2 + $0x3b0] ss:$8 sps:$4 sm:$0xff]   ;;  %v2526_v24 = vld [vmem:[%s3475_s2 + $0x3c4] ss:$8 sps:$4 sm:$0xff]   ;;  %v2524_v25 = vld [vmem:[%s3475_s2 + $0x3c0] ss:$8 sps:$4 sm:$0xff]  }
  0x8b   :  { %v2529_v26 = vld [vmem:[%s3475_s2 + $0x3d4] ss:$8 sps:$4 sm:$0xff]   ;;  %v2527_v28 = vld [vmem:[%s3475_s2 + $0x3d0] ss:$8 sps:$4 sm:$0xff]   ;;  %v2532_v29 = vld [vmem:[%s3475_s2 + $0x3e4] ss:$8 sps:$4 sm:$0xff]  }
  0x8c   :  { %v2541_v30 = vld [vmem:[%s3481_s8 + $0x28] sm:$0xff]   ;;  %v2535_v32 = vld [vmem:[%s3475_s2 + $0x3f4] ss:$8 sps:$4 sm:$0xff]   ;;  %v2533_v33 = vld [vmem:[%s3475_s2 + $0x3f0] ss:$8 sps:$4 sm:$0xff]   ;;  %vm1949_vm11 = vcmask 523264  }
  0x8d   :  { %1025 = vmatpush1.bf16.msra.mxu0 %v2483_v4  ;;  %v2530_v31 = vld [vmem:[%s3475_s2 + $0x3e0] ss:$8 sps:$4 sm:$0xff]   ;;  %2303 = vmatpush3.bf16.msra.mxu1 %v2541_v30  ;;  %v2542_v35 = vld [vmem:[%s3481_s8 + $0x30] sm:$0xff]   ;;  %v2543_v36 = vld [vmem:[%s3481_s8 + $0x38] sm:$0xff]   ;;  %vm1994_vm12 = vcmask 9216  }
  0x8e   :  { %1026 = vmatprep.subr.bf16.mxu0 %v2491_v5  ;;  %2304 = vmatprep.subr.bf16.mxu1 %v2655_v42  ;;  %v2544_v37 = vld [vmem:[%s3477_s4 + $0x40] sm:$0xff]   ;;  %v2546_v27 = vld [vmem:[%s3477_s4 + $0x48] sm:$0xff]   ;;  %v2548_v40 = vld [vmem:[%s3477_s4 + $0x50] sm:$0xff]  }
  0x8f   :  { %v2545_v38 = vld [vmem:[%s3477_s4] sm:$0xff]   ;;  %v2547_v39 = vld [vmem:[%s3477_s4 + $0x8] sm:$0xff]   ;;  %v2549_v41 = vld [vmem:[%s3477_s4 + $0x10] sm:$0xff]  }
  0x90   :  { %v2550_v43 = vld [vmem:[%s3477_s4 + $0x58] sm:$0xff]   ;;  %v2552_v45 = vld [vmem:[%s3477_s4 + $0x60] sm:$0xff]   ;;  %v2554_v47 = vld [vmem:[%s3477_s4 + $0x68] sm:$0xff]  }
  0x91   :  { %1027 = vmatpush1.bf16.msra.mxu0 %v2489_v6  ;;  %2305 = vmatpush3.bf16.msra.mxu1 %v2542_v35  ;;  %v2551_v44 = vld [vmem:[%s3477_s4 + $0x18] sm:$0xff]   ;;  %v2553_v46 = vld [vmem:[%s3477_s4 + $0x20] sm:$0xff]   ;;  %v2555_v48 = vld [vmem:[%s3477_s4 + $0x28] sm:$0xff]  }
  0x92   :  { %1028 = vmatprep.subr.bf16.mxu0 %v2497_v7  ;;  %2306 = vmatprep.subr.bf16.mxu1 %v2655_v42  ;;  %v2556_v49 = vld [vmem:[%s3477_s4 + $0x70] sm:$0xff]   ;;  %v2558_v51 = vld [vmem:[%s3477_s4 + $0x78] sm:$0xff]   ;;  %v2562_v53 = vld [vmem:[%s3484_s11 + $0x4] ss:$8 sps:$4 sm:$0xff]  }
  0x93   :  { %v2557_v50 = vld [vmem:[%s3477_s4 + $0x30] sm:$0xff]   ;;  %v2559_v52 = vld [vmem:[%s3477_s4 + $0x38] sm:$0xff]   ;;  %v2155_v58 = vld [vmem:[%s3480_s7] ss:$0 sm:$0xff] }
  0x94   :  { %v2560_v2 = vld [vmem:[%s3484_s11] ss:$8 sps:$4 sm:$0xff]   ;;  %v2565_v4 = vld [vmem:[%s3484_s11 + $0x14] ss:$8 sps:$4 sm:$0xff]   ;;  %v2563_v5 = vld [vmem:[%s3484_s11 + $0x10] ss:$8 sps:$4 sm:$0xff]  }
  0x95   :  { %1029 = vmatpush1.bf16.msra.mxu0 %v2495_v8  ;;  %2307 = vmatpush3.bf16.msra.mxu1 %v2543_v36  ;;  %v2568_v6 = vld [vmem:[%s3484_s11 + $0x24] ss:$8 sps:$4 sm:$0xff]   ;;  %v2566_v7 = vld [vmem:[%s3484_s11 + $0x20] ss:$8 sps:$4 sm:$0xff]   ;;  %v2571_v8 = vld [vmem:[%s3484_s11 + $0x34] ss:$8 sps:$4 sm:$0xff]  }
  0x96   :  { %1030 = vmatprep.subr.bf16.mxu0 %v2503_v9  ;;  %1547 = vmatprep.subr.bf16.mxu1 %v2562_v53  ;;  %v2569_v9 = vld [vmem:[%s3484_s11 + $0x30] ss:$8 sps:$4 sm:$0xff]   ;;  %v2580_v35 = vld [vmem:[%s3484_s11 + $0x64] ss:$8 sps:$4 sm:$0xff]  }
  0x97   :  { %v2592_v53 = vld [vmem:[%s3483_s10 + $0x24] ss:$8 sps:$4 sm:$0xff]  }
  0x99   :  { %1031 = vmatpush1.bf16.msra.mxu0 %v2501_v10  ;;  %v2574_v10 = vld [vmem:[%s3484_s11 + $0x44] ss:$8 sps:$4 sm:$0xff]  }
  0x9a   :  { %1032 = vmatprep.subr.bf16.mxu0 %v2506_v11  ;;  %v2572_v11 = vld [vmem:[%s3484_s11 + $0x40] ss:$8 sps:$4 sm:$0xff]  }
  0x9d   :  { %1033 = vmatpush1.bf16.msra.mxu0 %v2504_v13  ;;  %v2577_v13 = vld [vmem:[%s3484_s11 + $0x54] ss:$8 sps:$4 sm:$0xff]  }
  0x9e   :  { %1034 = vmatprep.subr.bf16.mxu0 %v2510_v14  ;;  %v2575_v14 = vld [vmem:[%s3484_s11 + $0x50] ss:$8 sps:$4 sm:$0xff]  }
  0xa1   :  { %1035 = vmatpush1.bf16.msra.mxu0 %v2508_v15  ;;  %v191_v15 = vsub.s32 0, %v2776_v12 }
  0xa2   :  { %1036 = vmatprep.subr.bf16.mxu0 %v2514_v16  ;;  %v187_v16 = vld [vmem:[%s3476_s3] sm:$0x3] }
  0xa5   :  { %1037 = vmatpush1.bf16.msra.mxu0 %v2512_v17  ;;  %v195_v17 = vsub.s32 1, %v2776_v12 }
  0xa6   :  { %1038 = vmatprep.subr.bf16.mxu0 %v2517_v18  ;;  %v192_v18 = vrot.slane %v187_v16, %v191_v15 }
  0xa9   :  { %1039 = vmatpush1.bf16.msra.mxu0 %v2515_v19  ;;  %v196_v19 = vrot.slane %v187_v16, %v195_v17  ;;  %v2611_v16 = vld [vmem:[%s3486_s13 + $0x8] sm:$0xff]  }
  0xaa   :  { %1040 = vmatprep.subr.bf16.mxu0 %v2520_v20 }
  0xad   :  { %1041 = vmatpush1.bf16.msra.mxu0 %v2518_v21 }
  0xae   :  { %1042 = vmatprep.subr.bf16.mxu0 %v2523_v22 }
  0xb1   :  { %1043 = vmatpush1.bf16.msra.mxu0 %v2521_v23 }
  0xb2   :  { %1044 = vmatprep.subr.bf16.mxu0 %v2526_v24 }
  0xb5   :  { %1045 = vmatpush1.bf16.msra.mxu0 %v2524_v25 }
  0xb6   :  { %1046 = vmatprep.subr.bf16.mxu0 %v2529_v26 }
  0xb9   :  { %1047 = vmatpush1.bf16.msra.mxu0 %v2527_v28 }
  0xba   :  { %1048 = vmatprep.subr.bf16.mxu0 %v2532_v29 }
  0xbd   :  { %1049 = vmatpush1.bf16.msra.mxu0 %v2530_v31 }
  0xbe   :  { %1050 = vmatprep.subr.bf16.mxu0 %v2535_v32 }
  0xc1   :  { %1051 = vmatpush1.bf16.msra.mxu0 %v2533_v33 }
  0xc2   :  { %2223 = vmatprep.subr.bf16.mxu0 %v2544_v37  ;;  %v2583_v37 = vld [vmem:[%s3484_s11 + $0x74] ss:$8 sps:$4 sm:$0xff]  }
  0xc4   :  { %1053 = vmatmul.mubr.bf16.vlgmr.msra.gmra.mrb[0].mxu0 %v246_v34  ;;  %v2578_v34 = vld [vmem:[%s3484_s11 + $0x60] ss:$8 sps:$4 sm:$0xff]  }
  0xc5   :  { %2224 = vmatpush3.bf16.msra.mxu0 %v2545_v38  ;;  %v2581_v38 = vld [vmem:[%s3484_s11 + $0x70] ss:$8 sps:$4 sm:$0xff]  }
  0xc6   :  { %2225 = vmatprep.subr.bf16.mxu0 %v2546_v27  ;;  %v2657_v27 = vmov 0  }
  0xc9   :  { %2226 = vmatpush3.bf16.msra.mxu0 %v2547_v39  ;;  %v2586_v39 = vld [vmem:[%s3483_s10 + $0x4] ss:$8 sps:$4 sm:$0xff]  }
  0xca   :  { %2227 = vmatprep.subr.bf16.mxu0 %v2548_v40  ;;  %v2159_v40 = vld [vmem:[%s3482_s9] ss:$0 sm:$0xff] }
  0xcd   :  { %2228 = vmatpush3.bf16.msra.mxu0 %v2549_v41 }
  0xce   :  { %2229 = vmatprep.subr.bf16.mxu0 %v2550_v43 }
  0xd1   :  { %2230 = vmatpush3.bf16.msra.mxu0 %v2551_v44 }
  0xd2   :  { %2231 = vmatprep.subr.bf16.mxu0 %v2552_v45 }
  0xd5   :  { %2232 = vmatpush3.bf16.msra.mxu0 %v2553_v46 }
  0xd6   :  { %2233 = vmatprep.subr.bf16.mxu0 %v2554_v47 }
  0xd9   :  { %2234 = vmatpush3.bf16.msra.mxu0 %v2555_v48 }
  0xda   :  { %2235 = vmatprep.subr.bf16.mxu0 %v2556_v49  ;;  %v2584_v49 = vld [vmem:[%s3483_s10] ss:$8 sps:$4 sm:$0xff]  }
  0xdd   :  { %2236 = vmatpush3.bf16.msra.mxu0 %v2557_v50 }
  0xde   :  { %2237 = vmatprep.subr.bf16.mxu0 %v2558_v51  ;;  %v2589_v51 = vld [vmem:[%s3483_s10 + $0x14] ss:$8 sps:$4 sm:$0xff]  }
  0xe1   :  { %2238 = vmatpush3.bf16.msra.mxu0 %v2559_v52  ;;  %v2587_v52 = vld [vmem:[%s3483_s10 + $0x10] ss:$8 sps:$4 sm:$0xff]  }
 0x11e   :  { %v931_v54 = vpop.f32.mrb[0].mxu1 }
 0x11f   :  { %v933_v55 = vpop.f32.mrb[1].mxu1  ;;  %v932_v20 = vadd.f32 %v931_v54, %v192_v18  ;;  %v2590_v54 = vld [vmem:[%s3483_s10 + $0x20] ss:$8 sps:$4 sm:$0xff]   ;;  %v2612_v18 = vld [vmem:[%s3486_s13 + $0x50] sm:$0xff]  }
 0x120   :  { %v935_v56 = vpop.f32.mrb[2].mxu1  ;;  %v934_v21 = vadd.f32 %v933_v55, %v196_v19  ;;  %v2595_v55 = vld [vmem:[%s3483_s10 + $0x34] ss:$8 sps:$4 sm:$0xff]  }
 0x121   :  { %v936_v57 = vpop.f32.mrb[3].mxu1  ;;  %v2593_v56 = vld [vmem:[%s3483_s10 + $0x30] ss:$8 sps:$4 sm:$0xff]  }
 0x122   :  { %v2598_v57 = vld [vmem:[%s3483_s10 + $0x44] ss:$8 sps:$4 sm:$0xff]   ;;  %v2613_v19 = vld [vmem:[%s3486_s13 + $0x10] sm:$0xff]  }
 0x126   :  { %v1309_v59 = vpop.f32.mrb[4].mxu1 }
 0x127   :  { %v1310_v60 = vadd.f32 %v2155_v58, %v1309_v59  ;;  %v2290_v61 = vpop.f32.mrb[5].mxu1  ;;  %v2596_v58 = vld [vmem:[%s3483_s10 + $0x40] ss:$8 sps:$4 sm:$0xff]   ;;  %v2601_v59 = vld [vmem:[%s3483_s10 + $0x54] ss:$8 sps:$4 sm:$0xff]  }
 0x128   :  { %v1312_v62 = vpop.f32.mrb[6].mxu1  ;;  %v2604_v61 = vld [vmem:[%s3483_s10 + $0x64] ss:$8 sps:$4 sm:$0xff]  }
 0x129   :  { %vm1315_vm3 = vcmp.ge.f32.partialorder %v1310_v60, 0.0  ;;  %v1316_v63 = vmul.f32 0.01, %v1310_v60  ;;  %v2291_v0 = vpop.f32.mrb[7].mxu1  ;;  %v2602_v62 = vld [vmem:[%s3483_s10 + $0x60] ss:$8 sps:$4 sm:$0xff]  }
 0x12a   :  { %v2605_v0 = vld [vmem:[%s3483_s10 + $0x70] ss:$8 sps:$4 sm:$0xff]  }
 0x12b   :  { %v1317_v1 = vsel %vm1315_vm3, %v1310_v60, %v1316_v63  ;;  %v2599_v60 = vld [vmem:[%s3483_s10 + $0x50] ss:$8 sps:$4 sm:$0xff]   ;;  %v2607_v63 = vld [vmem:[%s3483_s10 + $0x74] ss:$8 sps:$4 sm:$0xff]  }
 0x12c   :  { %v1318_v3 = vpack.c.bf16 %v1317_v1, %v1317_v1 }
 0x12e   :  { %2309 = vmatmul.mubr.bf16.vlgmr.msra.gmra.mrb[8].mxu1 %v1318_v3 }
 0x12f   :  { %1548 = vmatpush1.bf16.msra.mxu1 %v2560_v2  ;;  %1579 = vmatprep.mubr.bf16.mxu1 %v2657_v27  ;;  %v2138_v2 = vld [vmem:[%s3478_s5] ss:$0 sm:$0xff] }
 0x130   :  { %1549 = vmatprep.subr.bf16.mxu1 %v2565_v4 }
 0x133   :  { %1550 = vmatpush1.bf16.msra.mxu1 %v2563_v5 }
 0x134   :  { %1551 = vmatprep.subr.bf16.mxu1 %v2568_v6  ;;  %v2608_v6 = vld [vmem:[%s3486_s13 + $0x40] sm:$0xff]  }
 0x137   :  { %1552 = vmatpush1.bf16.msra.mxu1 %v2566_v7 }
 0x138   :  { %1553 = vmatprep.subr.bf16.mxu1 %v2571_v8 }
 0x13b   :  { %1554 = vmatpush1.bf16.msra.mxu1 %v2569_v9 }
 0x13c   :  { %1555 = vmatprep.subr.bf16.mxu1 %v2574_v10 }
 0x13f   :  { %1556 = vmatpush1.bf16.msra.mxu1 %v2572_v11  ;;  %v2609_v11 = vld [vmem:[%s3486_s13] sm:$0xff]  }
 0x140   :  { %1557 = vmatprep.subr.bf16.mxu1 %v2577_v13 }
 0x143   :  { %1558 = vmatpush1.bf16.msra.mxu1 %v2575_v14  ;;  %v2610_v14 = vld [vmem:[%s3486_s13 + $0x48] sm:$0xff]  }
 0x144   :  { %1559 = vmatprep.subr.bf16.mxu1 %v2580_v35  ;;  %v1709_v35 = vld [vmem:[%s3485_s12] sm:$0x3] }
 0x147   :  { %1560 = vmatpush1.bf16.msra.mxu1 %v2578_v34 }
 0x148   :  { %1561 = vmatprep.subr.bf16.mxu1 %v2583_v37 }
 0x14b   :  { %1562 = vmatpush1.bf16.msra.mxu1 %v2581_v38  ;;  %v1718_v38 = vrot.slane %v1709_v35, %v195_v17  ;;  %v2625_v17 = vld [vmem:[%s3488_s15 + $0x8] sm:$0xff]  }
 0x14c   :  { %1668 = vmatprep.subr.bf16.mxu1 %v2586_v39 }
 0x197   :  { %v1054_v22 = vpop.f32.mrb[0].mxu0 }
 0x198   :  { %v2325_v23 = vadd.f32 %v1054_v22, %v932_v20  ;;  %v1056_v24 = vpop.f32.mrb[1].mxu0  ;;  %v2614_v20 = vld [vmem:[%s3486_s13 + $0x58] sm:$0xff]   ;;  %v2616_v22 = vld [vmem:[%s3486_s13 + $0x60] sm:$0xff]  }
 0x199   :  { %v2327_v25 = vadd.f32 %v1056_v24, %v934_v21  ;;  %v1058_v26 = vpop.f32.mrb[2].mxu0  ;;  %v2615_v21 = vld [vmem:[%s3486_s13 + $0x18] sm:$0xff]   ;;  %v2618_v24 = vld [vmem:[%s3486_s13 + $0x68] sm:$0xff]  }
 0x19a   :  { %vm1061_vm4 = vcmp.ge.f32.partialorder %v2325_v23, 0.0  ;;  %v1063_v28 = vmul.f32 0.01, %v2325_v23  ;;  %v1059_v29 = vpop.f32.mrb[3].mxu0  ;;  %v2620_v26 = vld [vmem:[%s3486_s13 + $0x70] sm:$0xff]  }
 0x19b   :  { %vm1062_vm5 = vcmp.ge.f32.partialorder %v2327_v25, 0.0  ;;  %v1064_v30 = vmul.f32 0.01, %v2327_v25  ;;  %v2622_v29 = vld [vmem:[%s3486_s13 + $0x78] sm:$0xff]  }
 0x19c   :  { %v1065_v31 = vsel %vm1061_vm4, %v2325_v23, %v1063_v28  ;;  %v2617_v23 = vld [vmem:[%s3486_s13 + $0x20] sm:$0xff]   ;;  %v2621_v28 = vld [vmem:[%s3486_s13 + $0x30] sm:$0xff]  }
 0x19d   :  { %v1066_v32 = vsel %vm1062_vm5, %v2327_v25, %v1064_v30  ;;  %v1067_v36 = vpack.c.bf16 %v1065_v31, %v1065_v31  ;;  %v2619_v25 = vld [vmem:[%s3486_s13 + $0x28] sm:$0xff]   ;;  %v2623_v30 = vld [vmem:[%s3486_s13 + $0x38] sm:$0xff]  }
 0x19e   :  { %v1068_v33 = vpack.c.bf16 %v1066_v32, %v1066_v32 }
 0x1a0   :  { %1236 = vmatprep.mubr.bf16.mxu0 %v1068_v33 }
 0x1a1   :  { %1237 = vmatmul.mubr.bf16.vlgmr.msra.gmra.mrb[4].mxu0 %v1067_v36  ;;  %v1714_v36 = vrot.slane %v1709_v35, %v191_v15  ;;  %v2624_v15 = vld [vmem:[%s3488_s15] sm:$0xff]  }
 0x201   :  { %v1424_v41 = vpop.f32.mrb[8].mxu1 }
 0x202   :  { %v1425_v43 = vadd.f32 %v2159_v40, %v1424_v41  ;;  %v2310_v44 = vpop.f32.mrb[9].mxu1 }
 0x203   :  { %v1427_v45 = vpop.f32.mrb[10].mxu1 }
 0x204   :  { %vm1430_vm6 = vcmp.ge.f32.partialorder %v1425_v43, 0.0  ;;  %v1431_v46 = vmul.f32 0.01, %v1425_v43  ;;  %v2311_v47 = vpop.f32.mrb[11].mxu1 }
 0x206   :  { %v1432_v48 = vsel %vm1430_vm6, %v1425_v43, %v1431_v46 }
 0x207   :  { %v1450_v50 = vpack.c.bf16 %v1432_v48, %v1432_v48 }
 0x209   :  { %1580 = vmatmul.mubr.bf16.vlgmr.msra.gmra.mrb[12].mxu1 %v1450_v50 }
 0x20a   :  { %1669 = vmatpush1.bf16.msra.mxu1 %v2584_v49  ;;  %1700 = vmatprep.mubr.bf16.mxu1 %v2657_v27 }
 0x20b   :  { %1670 = vmatprep.subr.bf16.mxu1 %v2589_v51  ;;  %v2626_v51 = vld [vmem:[%s3488_s15 + $0x10] sm:$0xff]  }
 0x20e   :  { %1671 = vmatpush1.bf16.msra.mxu1 %v2587_v52  ;;  %v2627_v52 = vld [vmem:[%s3488_s15 + $0x18] sm:$0xff]  }
 0x20f   :  { %1672 = vmatprep.subr.bf16.mxu1 %v2592_v53 }
 0x212   :  { %1673 = vmatpush1.bf16.msra.mxu1 %v2590_v54  ;;  %v2200_v54 = vld [vmem:[%s3487_s14] ss:$0 sm:$0xff]  ;;  %s2658_s14 = smov [#allocation2]  }
 0x213   :  { %1674 = vmatprep.subr.bf16.mxu1 %v2595_v55  ;;  %s2002_s15 = sshll.u32 %s2658_s14, 4  ;;  %s2003_s15 = int_to_ptr.vmem [resolvable:$true] %s2002_s15 }
 0x214   :  { %s2630_s26 = scalar_lea.vmem %s2003_s15, 32  ;;  %p2635_p1 = scmp.lt.s32.totalorder %s2003_s15, %s2003_s15 }
 0x215   :  { %p2631_p0 = scmp.ne.s32.totalorder %s2003_s15, %s2630_s26  ;;  %p2636_p2 = scmp.lt.s32.totalorder %s2630_s26, %s2630_s26 }
 0x216   :  { %1675 = vmatpush1.bf16.msra.mxu1 %v2593_v56 }
 0x217   :  { %1676 = vmatprep.subr.bf16.mxu1 %v2598_v57  ;;  %p2637_p3 = por %p2636_p2, %p2635_p1 }
 0x219   :  { %p2638_p4 = pnand %p2637_p3, %p2631_p0 }
 0x21a   :  { %1677 = vmatpush1.bf16.msra.mxu1 %v2596_v58 }
 0x21b   :  { %1678 = vmatprep.subr.bf16.mxu1 %v2601_v59 }
 0x21e   :  { %1679 = vmatpush1.bf16.msra.mxu1 %v2599_v60 }
 0x21f   :  { %1680 = vmatprep.subr.bf16.mxu1 %v2604_v61 }
 0x222   :  { %1681 = vmatpush1.bf16.msra.mxu1 %v2602_v62  ;;  %v2217_v62 = vld [vmem:[%s3489_s16] ss:$0 sm:$0xff] }
 0x223   :  { %1682 = vmatprep.subr.bf16.mxu1 %v2607_v63 }
 0x226   :  { %1683 = vmatpush1.bf16.msra.mxu1 %v2605_v0 }
 0x227   :  { %2257 = vmatprep.subr.bf16.mxu1 %v2608_v6 }
 0x274   :  { %v2239_v1 = vpop.f32.mrb[4].mxu0 }
 0x275   :  { %v2240_v3 = vpop.f32.mrb[5].mxu0 }
 0x276   :  { %v2241_v4 = vadd.f32 %v2240_v3, %v2239_v1  ;;  %v2242_v5 = vpop.f32.mrb[6].mxu0 }
 0x277   :  { %v2243_v7 = vpop.f32.mrb[7].mxu0 }
 0x278   :  { %v1239_v8 = vadd.f32 %v2241_v4, %v2138_v2 }
 0x27a   :  { %vm1244_vm7 = vcmp.ge.f32.partialorder %v1239_v8, 0.0  ;;  %v1245_v9 = vmul.f32 0.01, %v1239_v8 }
 0x27c   :  { %v1246_v10 = vsel %vm1244_vm7, %v1239_v8, %v1245_v9 }
 0x27d   :  { %v1433_v13 = vpack.c.bf16 %v1246_v10, %v1246_v10 }
 0x27f   :  { %1701 = vmatmul.mubr.bf16.vlgmr.msra.gmra.mrb[16].mxu1 %v1433_v13 }
 0x280   :  { %2258 = vmatpush3.bf16.msra.mxu1 %v2609_v11 }
 0x281   :  { %2259 = vmatprep.subr.bf16.mxu1 %v2610_v14 }
 0x284   :  { %2260 = vmatpush3.bf16.msra.mxu1 %v2611_v16 }
 0x285   :  { %2261 = vmatprep.subr.bf16.mxu1 %v2612_v18 }
 0x288   :  { %2262 = vmatpush3.bf16.msra.mxu1 %v2613_v19 }
 0x289   :  { %2263 = vmatprep.subr.bf16.mxu1 %v2614_v20 }
 0x28c   :  { %2264 = vmatpush3.bf16.msra.mxu1 %v2615_v21 }
 0x28d   :  { %2265 = vmatprep.subr.bf16.mxu1 %v2616_v22 }
 0x290   :  { %2266 = vmatpush3.bf16.msra.mxu1 %v2617_v23 }
 0x291   :  { %2267 = vmatprep.subr.bf16.mxu1 %v2618_v24 }
 0x294   :  { %2268 = vmatpush3.bf16.msra.mxu1 %v2619_v25 }
 0x295   :  { %2269 = vmatprep.subr.bf16.mxu1 %v2620_v26 }
 0x298   :  { %2270 = vmatpush3.bf16.msra.mxu1 %v2621_v28 }
 0x299   :  { %2271 = vmatprep.subr.bf16.mxu1 %v2622_v29 }
 0x29c   :  { %2272 = vmatpush3.bf16.msra.mxu1 %v2623_v30 }
 0x29d   :  { %2312 = vmatprep.subr.bf16.mxu1 %v2655_v42 }
 0x2dc   :  { %v1581_v31 = vpop.f32.mrb[12].mxu1 }
 0x2dd   :  { %v1583_v32 = vpop.f32.mrb[13].mxu1 }
 0x2de   :  { %v1585_v33 = vpop.f32.mrb[14].mxu1 }
 0x2df   :  { %v1586_v34 = vpop.f32.mrb[15].mxu1 }
 0x352   :  { %v1702_v37 = vpop.f32.mrb[16].mxu1 }
 0x353   :  { %v1703_v27 = vadd.f32 %v1702_v37, %v1581_v31  ;;  %v1704_v39 = vpop.f32.mrb[17].mxu1 }
 0x354   :  { %v1705_v40 = vadd.f32 %v1704_v39, %v1583_v32  ;;  %v1706_v41 = vpop.f32.mrb[18].mxu1 }
 0x355   :  { %v1721_v43 = vadd.f32 %v1714_v36, %v1703_v27  ;;  %v1707_v44 = vpop.f32.mrb[19].mxu1 }
 0x356   :  { %v1722_v45 = vadd.f32 %v1718_v38, %v1705_v40 }
 0x357   :  { %vm1723_vm8 = vcmp.ge.f32.partialorder %v1721_v43, 0.0  ;;  %v1725_v46 = vmul.f32 0.01, %v1721_v43 }
 0x358   :  { %v1726_v47 = vmul.f32 0.01, %v1722_v45  ;;  %vm1724_vm9 = vcmp.ge.f32.partialorder %v1722_v45, 0.0 }
 0x359   :  { %v1727_v48 = vsel %vm1723_vm8, %v1721_v43, %v1725_v46 }
 0x35a   :  { %v1728_v49 = vsel %vm1724_vm9, %v1722_v45, %v1726_v47  ;;  %v1729_v12 = vpack.c.bf16 %v1727_v48, %v1727_v48 }
 0x35b   :  { %v1730_v50 = vpack.c.bf16 %v1728_v49, %v1728_v49 }
 0x35d   :  { %1898 = vmatprep.mubr.bf16.mxu1 %v1730_v50 }
 0x35e   :  { %1899 = vmatmul.mubr.bf16.vlgmr.msra.gmra.mrb[20].mxu1 %v1729_v12 }
 0x35f   :  { %2313 = vmatpush3.bf16.msra.mxu1 %v2624_v15  ;;  %2320 = vmatprep.mubr.msk.bf16.mxu1 %vm2656_vm2, %v2655_v42 }
 0x360   :  { %2314 = vmatprep.subr.bf16.mxu1 %v2655_v42 }
 0x363   :  { %2315 = vmatpush3.bf16.msra.mxu1 %v2625_v17 }
 0x364   :  { %2316 = vmatprep.subr.bf16.mxu1 %v2655_v42 }
 0x367   :  { %2317 = vmatpush3.bf16.msra.mxu1 %v2626_v51 }
 0x368   :  { %2318 = vmatprep.subr.bf16.mxu1 %v2655_v42 }
 0x36b   :  { %2319 = vmatpush3.bf16.msra.mxu1 %v2627_v52 }
 0x431   :  { %v2273_v53 = vpop.f32.mrb[20].mxu1 }
 0x432   :  { %v2274_v55 = vpop.f32.mrb[21].mxu1 }
 0x433   :  { %v2275_v56 = vadd.f32 %v2274_v55, %v2273_v53  ;;  %v2276_v57 = vpop.f32.mrb[22].mxu1 }
 0x434   :  { %v2277_v58 = vpop.f32.mrb[23].mxu1 }
 0x435   :  { %v1901_v59 = vadd.f32 %v2275_v56, %v2200_v54 }
 0x437   :  { %vm1906_vm10 = vcmp.ge.f32.partialorder %v1901_v59, 0.0  ;;  %v1907_v60 = vmul.f32 0.01, %v1901_v59 }
 0x439   :  { %v1908_v61 = vsel %vm1906_vm10, %v1901_v59, %v1907_v60 }
 0x43a   :  { %v1909_v42 = vpack.c.bf16 %v1908_v61, %v1908_v61 }
 0x43c   :  { %2321 = vmatmul.mubr.msk.bf16.vlgmr.msra.gmra.mrb[24].mxu1 %vm1949_vm11, %v1909_v42 }
 0x50f   :  { %v1987_v63 = vpop.f32.mrb[24].mxu1 }
 0x510   :  { %v1988_v0 = vadd.f32 %v2217_v62, %v1987_v63  ;;  %v2322_v1 = vpop.f32.mrb[25].mxu1 }
 0x511   :  { %v1990_v2 = vpop.f32.mrb[26].mxu1 }
 0x512   :  { %2628 = vtanh.f32 %v1988_v0  ;;  %v2323_v3 = vpop.f32.mrb[27].mxu1 }
 0x51c   :  { %v2629_v4 = vpop.eup %2628 }
 0x51d   :  { %1995 = vst.msk [vmem:[#allocation2] sm:$0x3] %vm1994_vm12, %v2629_v4 }
 0x51e   :  { %2641 = shalt.err (!%p2638_p4)
}
 0x51f   :  { %s2642_s27 = scalar_lea.hbm %s3490_s17, 32 }
 0x520   :  { %p2643_p5 = scmp.ne.s32.totalorder %s3490_s17, %s2642_s27  ;;  %p2646_p6 = scmp.lt.u32.totalorder %s2642_s27, %s3490_s17 }
 0x522   :  { %p2648_p7 = pnand %p2646_p6, %p2643_p5 }
 0x524   :  { %2651 = shalt.err (!%p2648_p7)
}
 0x525   :  { %2005 = dma.vmem_to_hbm [thread:$0]  %s2003_s15, 32, %s3490_s17, [#allocation3]  }
 0x526   :  { %2652 = dma.done.wait [#allocation3], 32  }
 0x527   :  { %2653 = vsyncadd [#allocation3], 4294967264 }
 0x528   :  { %2009 = vsyncpa [#allocation3], 1 }

</bundles_post_ra>
